<compile_context>
chip_gen: v5e
topology: v5e:2x2
jax: 0.10.0
libtpu: 0.0.40
codegen_flags: <defaults>
</compile_context>

<pallas_src>
import jax
import jax.numpy as jnp
from jax.experimental import pallas as pl
from jax.experimental.pallas import tpu as pltpu

_IN_EPS = 1e-5       # InstanceNorm2d default eps
_LRELU = 0.2         # LeakyReLU negative slope


# ------------------------------ tiling helper -------------------------------

def _pick_tile(dim, candidates):
    """Largest candidate tile that evenly divides `dim`, else full dim."""
    for c in candidates:
        if dim >= c and dim % c == 0:
            return c
    return dim


# ------------------------------ Pallas kernels ------------------------------

def _make_mm_kernel(has_bias, leaky_slope):
    """Tiled matmul with f32 accumulator; optional fused bias + LeakyReLU."""

    def kernel(*refs):
        if has_bias:
            x_ref, w_ref, b_ref, o_ref, acc_ref = refs
        else:
            x_ref, w_ref, o_ref, acc_ref = refs

        @pl.when(pl.program_id(2) == 0)
        def _init():
            acc_ref[...] = jnp.zeros_like(acc_ref)

        acc_ref[...] += jnp.dot(x_ref[...], w_ref[...],
                                preferred_element_type=jnp.float32)

        @pl.when(pl.program_id(2) == pl.num_programs(2) - 1)
        def _finalize():
            y = acc_ref[...]
            if has_bias:
                y = y + b_ref[...]
            if leaky_slope is not None:
                y = jnp.where(y >= 0.0, y, leaky_slope * y)
            o_ref[...] = y

    return kernel


def _instnorm_lrelu_kernel(y_ref, o_ref):
    # One sample per grid step: block = (1, HW, C).  InstanceNorm2d default:
    # affine=False, biased variance over spatial positions, eps=1e-5.
    y = y_ref[...]
    hw = y.shape[1]
    mean = jnp.sum(y, axis=1, keepdims=True) / hw
    ex2 = jnp.sum(y * y, axis=1, keepdims=True) / hw
    var = ex2 - mean * mean                       # single-pass variance
    yn = (y - mean) * jax.lax.rsqrt(var + _IN_EPS)
    o_ref[...] = jnp.where(yn >= 0.0, yn, _LRELU * yn)


# ------------------------------ JAX wrappers --------------------------------

def _im2col(x, k, stride, pad):
    """x: (N,H,W,C) NHWC -> (N*Ho*Wo, k*k*C); patch element order (ki,kj,c)."""
    n, h, w, c = x.shape
    xp = jnp.pad(x, ((0, 0), (pad, pad), (pad, pad), (0, 0)))
    ho = (h + 2 * pad - k) // stride + 1
    wo = (w + 2 * pad - k) // stride + 1
    cols = []
    for i in range(k):
        for j in range(k):
            cols.append(xp[:,
                           i:i + stride * (ho - 1) + 1:stride,
                           j:j + stride * (wo - 1) + 1:stride, :])
    cols = jnp.concatenate(cols, axis=-1)
    return cols.reshape(n * ho * wo, k * k * c), (n, ho, wo)


def _conv_matmul(cols, w2, bias=None, leaky_slope=None):
    """(M,K) @ (K,N) with gridded, pipelined, bf16-fed MXU matmul."""
    M, K = cols.shape
    N = w2.shape[1]
    tm = _pick_tile(M, (256, 128, 64, 32, 16, 8))
    tn = _pick_tile(N, (256, 128))
    tk = _pick_tile(K, (512, 256, 128))
    grid = (M // tm, N // tn, K // tk)

    args = [cols.astype(jnp.bfloat16), w2.astype(jnp.bfloat16)]
    in_specs = [
        pl.BlockSpec((tm, tk), lambda i, j, k: (i, k)),
        pl.BlockSpec((tk, tn), lambda i, j, k: (k, j)),
    ]
    has_bias = bias is not None
    if has_bias:
        args.append(bias.reshape(1, N).astype(jnp.float32))
        in_specs.append(pl.BlockSpec((1, tn), lambda i, j, k: (0, j)))

    return pl.pallas_call(
        _make_mm_kernel(has_bias, leaky_slope),
        out_shape=jax.ShapeDtypeStruct((M, N), jnp.float32),
        grid_spec=pltpu.PrefetchScalarGridSpec(
            num_scalar_prefetch=0,
            grid=grid,
            in_specs=in_specs,
            out_specs=pl.BlockSpec((tm, tn), lambda i, j, k: (i, j)),
            scratch_shapes=[pltpu.VMEM((tm, tn), jnp.float32)],
        ),
        compiler_params=pltpu.CompilerParams(
            dimension_semantics=("parallel", "parallel", "arbitrary")),
    )(*args)


def _instance_norm_lrelu(y, batch, hw, c):
    """y: (batch*hw, c) -> normalized (batch*hw, c), per-sample per-channel."""
    y3 = y.reshape(batch, hw, c)
    out = pl.pallas_call(
        _instnorm_lrelu_kernel,
        out_shape=jax.ShapeDtypeStruct((batch, hw, c), jnp.float32),
        grid_spec=pltpu.PrefetchScalarGridSpec(
            num_scalar_prefetch=0,
            grid=(batch,),
            in_specs=[pl.BlockSpec((1, hw, c), lambda b: (b, 0, 0))],
            out_specs=pl.BlockSpec((1, hw, c), lambda b: (b, 0, 0)),
        ),
        compiler_params=pltpu.CompilerParams(
            dimension_semantics=("parallel",)),
    )(y3)
    return out.reshape(batch * hw, c)


def _weight_to_matmul(w):
    """PyTorch (Cout,Cin,kh,kw) -> (kh*kw*Cin, Cout), matching im2col order."""
    cout = w.shape[0]
    return jnp.transpose(w, (2, 3, 1, 0)).reshape(-1, cout)


def conv_lrelu(x, w, b, stride):
    """Conv(4x4,pad=1) + bias + LeakyReLU(0.2), no norm (layer 1)."""
    cols, (n, ho, wo) = _im2col(x, 4, stride, 1)
    y = _conv_matmul(cols, _weight_to_matmul(w), bias=b, leaky_slope=_LRELU)
    return y.reshape(n, ho, wo, -1)


def conv_in_lrelu(x, w, stride):
    """Conv(4x4,pad=1) + InstanceNorm + LeakyReLU(0.2).

    Conv bias is omitted: InstanceNorm's per-channel mean subtraction cancels
    a per-channel constant exactly, so the result is unchanged.
    """
    cols, (n, ho, wo) = _im2col(x, 4, stride, 1)
    cout = w.shape[0]
    y = _conv_matmul(cols, _weight_to_matmul(w))
    y = _instance_norm_lrelu(y, n, ho * wo, cout)
    return y.reshape(n, ho, wo, cout)


def conv_bias(x, w, b, stride):
    """Conv(4x4,pad=1) + bias, no activation (final layer)."""
    cols, (n, ho, wo) = _im2col(x, 4, stride, 1)
    y = _conv_matmul(cols, _weight_to_matmul(w), bias=b)
    return y.reshape(n, ho, wo, -1)


# ---------------------------- parameter init --------------------------------

def _init_conv(key, cout, cin, k=4):
    k1, k2 = jax.random.split(key)
    bound = 1.0 / (cin * k * k) ** 0.5
    w = jax.random.uniform(k1, (cout, cin, k, k), jnp.float32, -bound, bound)
    b = jax.random.uniform(k2, (cout,), jnp.float32, -bound, bound)
    return w, b


def init_discriminator_params(key, input_nc):
    keys = jax.random.split(key, 5)
    p = {}
    p["w1"], p["b1"] = _init_conv(keys[0], 64, input_nc)
    # b2/b3/b4 exist in the PyTorch module but are mathematically cancelled by
    # the following InstanceNorm, so the forward never consumes them.
    p["w2"], p["b2"] = _init_conv(keys[1], 128, 64)
    p["w3"], p["b3"] = _init_conv(keys[2], 256, 128)
    p["w4"], p["b4"] = _init_conv(keys[3], 512, 256)
    p["w5"], p["b5"] = _init_conv(keys[4], 1, 512)
    return p


# -------------------------------- forward -----------------------------------

def discriminator_forward(p, x_nchw):
    x = jnp.transpose(x_nchw, (0, 2, 3, 1)).astype(jnp.float32)   # NCHW->NHWC
    x = conv_lrelu(x, p["w1"], p["b1"], stride=2)                 # -> 64 ch
    x = conv_in_lrelu(x, p["w2"], stride=2)                       # -> 128 ch
    x = conv_in_lrelu(x, p["w3"], stride=2)                       # -> 256 ch
    x = conv_in_lrelu(x, p["w4"], stride=1)                       # -> 512 ch
    x = conv_bias(x, p["w5"], p["b5"], stride=1)                  # -> 1 ch
    # F.avg_pool2d(x, x.size()[2:]).view(N, -1)  == mean over spatial -> (N,1)
    return jnp.mean(x, axis=(1, 2))


if __name__ == "__main__":
    key = jax.random.PRNGKey(0)
    pkey, xkey = jax.random.split(key)
    input_nc = 3
    batch, spatial = 2, 32   # 16x16 would give a zero-size map at the last conv
    params = init_discriminator_params(pkey, input_nc)
    x = jax.random.normal(xkey, (batch, input_nc, spatial, spatial), jnp.float32)

    fwd = jax.jit(discriminator_forward)
    out = jax.block_until_ready(fwd(params, x))

    assert out.shape == (batch, 1), out.shape
    assert bool(jnp.all(jnp.isfinite(out)))
    print("KERNEL_OK")
</pallas_src>

<mosaic_0001>
module attributes {stable_mosaic.version = 11 : i64} {
  func.func @kernel(%arg0: i32, %arg1: i32, %arg2: i32, %arg3: memref<256x48xbf16, #tpu.memory_space<vmem>>, %arg4: memref<48x64xbf16, #tpu.memory_space<vmem>>, %arg5: memref<1x64xf32, #tpu.memory_space<vmem>>, %arg6: memref<256x64xf32, #tpu.memory_space<vmem>>, %arg7: memref<256x64xf32, #tpu.memory_space<vmem>>) attributes {dimension_semantics = [#tpu.dimension_semantics<parallel>, #tpu.dimension_semantics<parallel>, #tpu.dimension_semantics<arbitrary>], iteration_bounds = array<i64: 2, 1, 1>, scalar_prefetch = 0 : i64, scratch_operands = 1 : i64, tpu.core_type = #tpu.core_type<tc>, window_params = [{transform_indices = @transform_0, window_bounds = array<i64: 256, 48>}, {transform_indices = @transform_1, window_bounds = array<i64: 48, 64>}, {transform_indices = @transform_2, window_bounds = array<i64: 1, 64>}, {transform_indices = @transform_3, window_bounds = array<i64: 256, 64>}]} {
    %c0_i32 = arith.constant 0 : i32
    %0 = arith.cmpi eq, %arg2, %c0_i32 : i32
    %1 = arith.extui %0 : i1 to i32
    %c0_i32_0 = arith.constant 0 : i32
    %2 = arith.cmpi ne, %1, %c0_i32_0 : i32
    scf.if %2 {
      %cst_10 = arith.constant 0.000000e+00 : f32
      %12 = vector.broadcast %cst_10 : f32 to vector<256x64xf32>
      %c0_11 = arith.constant 0 : index
      %c0_12 = arith.constant 0 : index
      %13 = vector.load %arg7[%c0_11, %c0_12] : memref<256x64xf32, #tpu.memory_space<vmem>>, vector<256x64xf32>
      tpu.vector_store %arg7[%c0_11, %c0_12], %12 {strides = array<i32>} : memref<256x64xf32, #tpu.memory_space<vmem>>, vector<256x64xf32>,
    } else {
    }
    %c0 = arith.constant 0 : index
    %c0_1 = arith.constant 0 : index
    %3 = vector.load %arg7[%c0, %c0_1] : memref<256x64xf32, #tpu.memory_space<vmem>>, vector<256x64xf32>
    %c0_2 = arith.constant 0 : index
    %c0_3 = arith.constant 0 : index
    %4 = vector.load %arg3[%c0_2, %c0_3] : memref<256x48xbf16, #tpu.memory_space<vmem>>, vector<256x48xbf16>
    %c0_4 = arith.constant 0 : index
    %c0_5 = arith.constant 0 : index
    %5 = vector.load %arg4[%c0_4, %c0_5] : memref<48x64xbf16, #tpu.memory_space<vmem>>, vector<48x64xbf16>
    %cst = arith.constant dense<0.000000e+00> : vector<256x64xf32>
    %6 = tpu.matmul %4, %5, %cst {dimension_numbers = #tpu.dot_dimension_numbers<[1], [0], [0], [1], [0, 0, 1, 1], [], []>} : vector<256x48xbf16>, vector<48x64xbf16>, vector<256x64xf32> -> vector<256x64xf32>
    %7 = arith.addf %3, %6 : vector<256x64xf32>
    %c0_6 = arith.constant 0 : index
    %c0_7 = arith.constant 0 : index
    %8 = vector.load %arg7[%c0_6, %c0_7] : memref<256x64xf32, #tpu.memory_space<vmem>>, vector<256x64xf32>
    tpu.vector_store %arg7[%c0_6, %c0_7], %7 {strides = array<i32>} : memref<256x64xf32, #tpu.memory_space<vmem>>, vector<256x64xf32>,
    %c0_i32_8 = arith.constant 0 : i32
    %9 = arith.cmpi eq, %arg2, %c0_i32_8 : i32
    %10 = arith.extui %9 : i1 to i32
    %c0_i32_9 = arith.constant 0 : i32
    %11 = arith.cmpi ne, %10, %c0_i32_9 : i32
    scf.if %11 {
      %c0_10 = arith.constant 0 : index
      %c0_11 = arith.constant 0 : index
      %12 = vector.load %arg7[%c0_10, %c0_11] : memref<256x64xf32, #tpu.memory_space<vmem>>, vector<256x64xf32>
      %c0_12 = arith.constant 0 : index
      %c0_13 = arith.constant 0 : index
      %13 = vector.load %arg5[%c0_12, %c0_13] : memref<1x64xf32, #tpu.memory_space<vmem>>, vector<1x64xf32>
      %14 = vector.broadcast %13 : vector<1x64xf32> to vector<256x64xf32>
      %15 = arith.addf %12, %14 : vector<256x64xf32>
      %cst_14 = arith.constant 0.000000e+00 : f32
      %16 = vector.broadcast %cst_14 : f32 to vector<256x64xf32>
      %17 = arith.cmpf oge, %15, %16 : vector<256x64xf32>
      %cst_15 = arith.constant 2.000000e-01 : f32
      %18 = vector.broadcast %cst_15 : f32 to vector<256x64xf32>
      %19 = arith.mulf %18, %15 : vector<256x64xf32>
      %20 = arith.select %17, %15, %19 : vector<256x64xi1>, vector<256x64xf32>
      %c0_16 = arith.constant 0 : index
      %c0_17 = arith.constant 0 : index
      %21 = vector.load %arg6[%c0_16, %c0_17] : memref<256x64xf32, #tpu.memory_space<vmem>>, vector<256x64xf32>
      tpu.vector_store %arg6[%c0_16, %c0_17], %20 {strides = array<i32>} : memref<256x64xf32, #tpu.memory_space<vmem>>, vector<256x64xf32>,
    } else {
    }
    return
  }
  func.func @transform_0(%arg0: i32, %arg1: i32, %arg2: i32) -> (i32, i32) {
    %c0_i32 = arith.constant 0 : i32
    return %arg0, %arg2 : i32, i32
  }
  func.func @transform_1(%arg0: i32, %arg1: i32, %arg2: i32) -> (i32, i32) {
    %c0_i32 = arith.constant 0 : i32
    return %arg2, %arg1 : i32, i32
  }
  func.func @transform_2(%arg0: i32, %arg1: i32, %arg2: i32) -> (i32, i32) {
    %c0_i32 = arith.constant 0 : i32
    %c0_i32_0 = arith.constant 0 : i32
    return %c0_i32, %arg1 : i32, i32
  }
  func.func @transform_3(%arg0: i32, %arg1: i32, %arg2: i32) -> (i32, i32) {
    %c0_i32 = arith.constant 0 : i32
    return %arg0, %arg1 : i32, i32
  }
}

module attributes {stable_mosaic.version = 11 : i64} {
  func.func @kernel(%arg0: i32, %arg1: i32, %arg2: i32, %arg3: memref<128x512xbf16, #tpu.memory_space<vmem>>, %arg4: memref<512x128xbf16, #tpu.memory_space<vmem>>, %arg5: memref<128x128xf32, #tpu.memory_space<vmem>>, %arg6: memref<128x128xf32, #tpu.memory_space<vmem>>) attributes {dimension_semantics = [#tpu.dimension_semantics<parallel>, #tpu.dimension_semantics<parallel>, #tpu.dimension_semantics<arbitrary>], iteration_bounds = array<i64: 1, 1, 2>, scalar_prefetch = 0 : i64, scratch_operands = 1 : i64, tpu.core_type = #tpu.core_type<tc>, window_params = [{transform_indices = @transform_0, window_bounds = array<i64: 128, 512>}, {transform_indices = @transform_1, window_bounds = array<i64: 512, 128>}, {transform_indices = @transform_2, window_bounds = array<i64: 128, 128>}]} {
    %c0_i32 = arith.constant 0 : i32
    %0 = arith.cmpi eq, %arg2, %c0_i32 : i32
    %1 = arith.extui %0 : i1 to i32
    %c0_i32_0 = arith.constant 0 : i32
    %2 = arith.cmpi ne, %1, %c0_i32_0 : i32
    scf.if %2 {
      %cst_9 = arith.constant 0.000000e+00 : f32
      %12 = vector.broadcast %cst_9 : f32 to vector<128x128xf32>
      %c0_10 = arith.constant 0 : index
      %c0_11 = arith.constant 0 : index
      %13 = vector.load %arg6[%c0_10, %c0_11] : memref<128x128xf32, #tpu.memory_space<vmem>>, vector<128x128xf32>
      tpu.vector_store %arg6[%c0_10, %c0_11], %12 {strides = array<i32>} : memref<128x128xf32, #tpu.memory_space<vmem>>, vector<128x128xf32>,
    } else {
    }
    %c0 = arith.constant 0 : index
    %c0_1 = arith.constant 0 : index
    %3 = vector.load %arg6[%c0, %c0_1] : memref<128x128xf32, #tpu.memory_space<vmem>>, vector<128x128xf32>
    %c0_2 = arith.constant 0 : index
    %c0_3 = arith.constant 0 : index
    %4 = vector.load %arg3[%c0_2, %c0_3] : memref<128x512xbf16, #tpu.memory_space<vmem>>, vector<128x512xbf16>
    %c0_4 = arith.constant 0 : index
    %c0_5 = arith.constant 0 : index
    %5 = vector.load %arg4[%c0_4, %c0_5] : memref<512x128xbf16, #tpu.memory_space<vmem>>, vector<512x128xbf16>
    %cst = arith.constant dense<0.000000e+00> : vector<128x128xf32>
    %6 = tpu.matmul %4, %5, %cst {dimension_numbers = #tpu.dot_dimension_numbers<[1], [0], [0], [1], [0, 0, 1, 1], [], []>} : vector<128x512xbf16>, vector<512x128xbf16>, vector<128x128xf32> -> vector<128x128xf32>
    %7 = arith.addf %3, %6 : vector<128x128xf32>
    %c0_6 = arith.constant 0 : index
    %c0_7 = arith.constant 0 : index
    %8 = vector.load %arg6[%c0_6, %c0_7] : memref<128x128xf32, #tpu.memory_space<vmem>>, vector<128x128xf32>
    tpu.vector_store %arg6[%c0_6, %c0_7], %7 {strides = array<i32>} : memref<128x128xf32, #tpu.memory_space<vmem>>, vector<128x128xf32>,
    %c1_i32 = arith.constant 1 : i32
    %9 = arith.cmpi eq, %arg2, %c1_i32 : i32
    %10 = arith.extui %9 : i1 to i32
    %c0_i32_8 = arith.constant 0 : i32
    %11 = arith.cmpi ne, %10, %c0_i32_8 : i32
    scf.if %11 {
      %c0_9 = arith.constant 0 : index
      %c0_10 = arith.constant 0 : index
      %12 = vector.load %arg6[%c0_9, %c0_10] : memref<128x128xf32, #tpu.memory_space<vmem>>, vector<128x128xf32>
      %c0_11 = arith.constant 0 : index
      %c0_12 = arith.constant 0 : index
      %13 = vector.load %arg5[%c0_11, %c0_12] : memref<128x128xf32, #tpu.memory_space<vmem>>, vector<128x128xf32>
      tpu.vector_store %arg5[%c0_11, %c0_12], %12 {strides = array<i32>} : memref<128x128xf32, #tpu.memory_space<vmem>>, vector<128x128xf32>,
    } else {
    }
    return
  }
  func.func @transform_0(%arg0: i32, %arg1: i32, %arg2: i32) -> (i32, i32) {
    %c0_i32 = arith.constant 0 : i32
    return %arg0, %arg2 : i32, i32
  }
  func.func @transform_1(%arg0: i32, %arg1: i32, %arg2: i32) -> (i32, i32) {
    %c0_i32 = arith.constant 0 : i32
    return %arg2, %arg1 : i32, i32
  }
  func.func @transform_2(%arg0: i32, %arg1: i32, %arg2: i32) -> (i32, i32) {
    %c0_i32 = arith.constant 0 : i32
    return %arg0, %arg1 : i32, i32
  }
}

module attributes {stable_mosaic.version = 11 : i64} {
  func.func @_instnorm_lrelu_kernel(%arg0: i32, %arg1: memref<1x64x128xf32, #tpu.memory_space<vmem>>, %arg2: memref<1x64x128xf32, #tpu.memory_space<vmem>>) attributes {dimension_semantics = [#tpu.dimension_semantics<parallel>], iteration_bounds = array<i64: 2>, scalar_prefetch = 0 : i64, scratch_operands = 0 : i64, tpu.core_type = #tpu.core_type<tc>, window_params = [{transform_indices = @transform_0, window_bounds = array<i64: 1, 64, 128>}, {transform_indices = @transform_1, window_bounds = array<i64: 1, 64, 128>}]} {
    %c0 = arith.constant 0 : index
    %c0_0 = arith.constant 0 : index
    %c0_1 = arith.constant 0 : index
    %0 = vector.load %arg1[%c0, %c0_0, %c0_1] : memref<1x64x128xf32, #tpu.memory_space<vmem>>, vector<1x64x128xf32>
    %cst = arith.constant dense<0.000000e+00> : vector<1x128xf32>
    %1 = vector.multi_reduction <add>, %0, %cst [1] : vector<1x64x128xf32> to vector<1x128xf32>
    %2 = vector.shape_cast %1 : vector<1x128xf32> to vector<1x1x128xf32>
    %cst_2 = arith.constant 6.400000e+01 : f32
    %3 = vector.broadcast %cst_2 : f32 to vector<1x1x128xf32>
    %4 = arith.divf %2, %3 : vector<1x1x128xf32>
    %5 = arith.mulf %0, %0 : vector<1x64x128xf32>
    %cst_3 = arith.constant dense<0.000000e+00> : vector<1x128xf32>
    %6 = vector.multi_reduction <add>, %5, %cst_3 [1] : vector<1x64x128xf32> to vector<1x128xf32>
    %7 = vector.shape_cast %6 : vector<1x128xf32> to vector<1x1x128xf32>
    %cst_4 = arith.constant 6.400000e+01 : f32
    %8 = vector.broadcast %cst_4 : f32 to vector<1x1x128xf32>
    %9 = arith.divf %7, %8 : vector<1x1x128xf32>
    %10 = arith.mulf %4, %4 : vector<1x1x128xf32>
    %11 = arith.subf %9, %10 : vector<1x1x128xf32>
    %12 = vector.broadcast %4 : vector<1x1x128xf32> to vector<1x64x128xf32>
    %13 = arith.subf %0, %12 : vector<1x64x128xf32>
    %cst_5 = arith.constant 9.99999974E-6 : f32
    %14 = vector.broadcast %cst_5 : f32 to vector<1x1x128xf32>
    %15 = arith.addf %11, %14 : vector<1x1x128xf32>
    %16 = math.rsqrt %15 : vector<1x1x128xf32>
    %17 = vector.broadcast %16 : vector<1x1x128xf32> to vector<1x64x128xf32>
    %18 = arith.mulf %13, %17 : vector<1x64x128xf32>
    %cst_6 = arith.constant 0.000000e+00 : f32
    %19 = vector.broadcast %cst_6 : f32 to vector<1x64x128xf32>
    %20 = arith.cmpf oge, %18, %19 : vector<1x64x128xf32>
    %cst_7 = arith.constant 2.000000e-01 : f32
    %21 = vector.broadcast %cst_7 : f32 to vector<1x64x128xf32>
    %22 = arith.mulf %21, %18 : vector<1x64x128xf32>
    %23 = arith.select %20, %18, %22 : vector<1x64x128xi1>, vector<1x64x128xf32>
    %c0_8 = arith.constant 0 : index
    %c0_9 = arith.constant 0 : index
    %c0_10 = arith.constant 0 : index
    %24 = vector.load %arg2[%c0_8, %c0_9, %c0_10] : memref<1x64x128xf32, #tpu.memory_space<vmem>>, vector<1x64x128xf32>
    tpu.vector_store %arg2[%c0_8, %c0_9, %c0_10], %23 {strides = array<i32>} : memref<1x64x128xf32, #tpu.memory_space<vmem>>, vector<1x64x128xf32>,
    return
  }
  func.func @transform_0(%arg0: i32) -> (i32, i32, i32) {
    %c0_i32 = arith.constant 0 : i32
    %c0_i32_0 = arith.constant 0 : i32
    %c0_i32_1 = arith.constant 0 : i32
    return %arg0, %c0_i32, %c0_i32_0 : i32, i32, i32
  }
  func.func @transform_1(%arg0: i32) -> (i32, i32, i32) {
    %c0_i32 = arith.constant 0 : i32
    %c0_i32_0 = arith.constant 0 : i32
    %c0_i32_1 = arith.constant 0 : i32
    return %arg0, %c0_i32, %c0_i32_0 : i32, i32, i32
  }
}

module attributes {stable_mosaic.version = 11 : i64} {
  func.func @kernel(%arg0: i32, %arg1: i32, %arg2: i32, %arg3: memref<32x512xbf16, #tpu.memory_space<vmem>>, %arg4: memref<512x256xbf16, #tpu.memory_space<vmem>>, %arg5: memref<32x256xf32, #tpu.memory_space<vmem>>, %arg6: memref<32x256xf32, #tpu.memory_space<vmem>>) attributes {dimension_semantics = [#tpu.dimension_semantics<parallel>, #tpu.dimension_semantics<parallel>, #tpu.dimension_semantics<arbitrary>], iteration_bounds = array<i64: 1, 1, 4>, scalar_prefetch = 0 : i64, scratch_operands = 1 : i64, tpu.core_type = #tpu.core_type<tc>, window_params = [{transform_indices = @transform_0, window_bounds = array<i64: 32, 512>}, {transform_indices = @transform_1, window_bounds = array<i64: 512, 256>}, {transform_indices = @transform_2, window_bounds = array<i64: 32, 256>}]} {
    %c0_i32 = arith.constant 0 : i32
    %0 = arith.cmpi eq, %arg2, %c0_i32 : i32
    %1 = arith.extui %0 : i1 to i32
    %c0_i32_0 = arith.constant 0 : i32
    %2 = arith.cmpi ne, %1, %c0_i32_0 : i32
    scf.if %2 {
      %cst_9 = arith.constant 0.000000e+00 : f32
      %12 = vector.broadcast %cst_9 : f32 to vector<32x256xf32>
      %c0_10 = arith.constant 0 : index
      %c0_11 = arith.constant 0 : index
      %13 = vector.load %arg6[%c0_10, %c0_11] : memref<32x256xf32, #tpu.memory_space<vmem>>, vector<32x256xf32>
      tpu.vector_store %arg6[%c0_10, %c0_11], %12 {strides = array<i32>} : memref<32x256xf32, #tpu.memory_space<vmem>>, vector<32x256xf32>,
    } else {
    }
    %c0 = arith.constant 0 : index
    %c0_1 = arith.constant 0 : index
    %3 = vector.load %arg6[%c0, %c0_1] : memref<32x256xf32, #tpu.memory_space<vmem>>, vector<32x256xf32>
    %c0_2 = arith.constant 0 : index
    %c0_3 = arith.constant 0 : index
    %4 = vector.load %arg3[%c0_2, %c0_3] : memref<32x512xbf16, #tpu.memory_space<vmem>>, vector<32x512xbf16>
    %c0_4 = arith.constant 0 : index
    %c0_5 = arith.constant 0 : index
    %5 = vector.load %arg4[%c0_4, %c0_5] : memref<512x256xbf16, #tpu.memory_space<vmem>>, vector<512x256xbf16>
    %cst = arith.constant dense<0.000000e+00> : vector<32x256xf32>
    %6 = tpu.matmul %4, %5, %cst {dimension_numbers = #tpu.dot_dimension_numbers<[1], [0], [0], [1], [0, 0, 1, 1], [], []>} : vector<32x512xbf16>, vector<512x256xbf16>, vector<32x256xf32> -> vector<32x256xf32>
    %7 = arith.addf %3, %6 : vector<32x256xf32>
    %c0_6 = arith.constant 0 : index
    %c0_7 = arith.constant 0 : index
    %8 = vector.load %arg6[%c0_6, %c0_7] : memref<32x256xf32, #tpu.memory_space<vmem>>, vector<32x256xf32>
    tpu.vector_store %arg6[%c0_6, %c0_7], %7 {strides = array<i32>} : memref<32x256xf32, #tpu.memory_space<vmem>>, vector<32x256xf32>,
    %c3_i32 = arith.constant 3 : i32
    %9 = arith.cmpi eq, %arg2, %c3_i32 : i32
    %10 = arith.extui %9 : i1 to i32
    %c0_i32_8 = arith.constant 0 : i32
    %11 = arith.cmpi ne, %10, %c0_i32_8 : i32
    scf.if %11 {
      %c0_9 = arith.constant 0 : index
      %c0_10 = arith.constant 0 : index
      %12 = vector.load %arg6[%c0_9, %c0_10] : memref<32x256xf32, #tpu.memory_space<vmem>>, vector<32x256xf32>
      %c0_11 = arith.constant 0 : index
      %c0_12 = arith.constant 0 : index
      %13 = vector.load %arg5[%c0_11, %c0_12] : memref<32x256xf32, #tpu.memory_space<vmem>>, vector<32x256xf32>
      tpu.vector_store %arg5[%c0_11, %c0_12], %12 {strides = array<i32>} : memref<32x256xf32, #tpu.memory_space<vmem>>, vector<32x256xf32>,
    } else {
    }
    return
  }
  func.func @transform_0(%arg0: i32, %arg1: i32, %arg2: i32) -> (i32, i32) {
    %c0_i32 = arith.constant 0 : i32
    return %arg0, %arg2 : i32, i32
  }
  func.func @transform_1(%arg0: i32, %arg1: i32, %arg2: i32) -> (i32, i32) {
    %c0_i32 = arith.constant 0 : i32
    return %arg2, %arg1 : i32, i32
  }
  func.func @transform_2(%arg0: i32, %arg1: i32, %arg2: i32) -> (i32, i32) {
    %c0_i32 = arith.constant 0 : i32
    return %arg0, %arg1 : i32, i32
  }
}

module attributes {stable_mosaic.version = 11 : i64} {
  func.func @_instnorm_lrelu_kernel(%arg0: i32, %arg1: memref<1x16x256xf32, #tpu.memory_space<vmem>>, %arg2: memref<1x16x256xf32, #tpu.memory_space<vmem>>) attributes {dimension_semantics = [#tpu.dimension_semantics<parallel>], iteration_bounds = array<i64: 2>, scalar_prefetch = 0 : i64, scratch_operands = 0 : i64, tpu.core_type = #tpu.core_type<tc>, window_params = [{transform_indices = @transform_0, window_bounds = array<i64: 1, 16, 256>}, {transform_indices = @transform_1, window_bounds = array<i64: 1, 16, 256>}]} {
    %c0 = arith.constant 0 : index
    %c0_0 = arith.constant 0 : index
    %c0_1 = arith.constant 0 : index
    %0 = vector.load %arg1[%c0, %c0_0, %c0_1] : memref<1x16x256xf32, #tpu.memory_space<vmem>>, vector<1x16x256xf32>
    %cst = arith.constant dense<0.000000e+00> : vector<1x256xf32>
    %1 = vector.multi_reduction <add>, %0, %cst [1] : vector<1x16x256xf32> to vector<1x256xf32>
    %2 = vector.shape_cast %1 : vector<1x256xf32> to vector<1x1x256xf32>
    %cst_2 = arith.constant 1.600000e+01 : f32
    %3 = vector.broadcast %cst_2 : f32 to vector<1x1x256xf32>
    %4 = arith.divf %2, %3 : vector<1x1x256xf32>
    %5 = arith.mulf %0, %0 : vector<1x16x256xf32>
    %cst_3 = arith.constant dense<0.000000e+00> : vector<1x256xf32>
    %6 = vector.multi_reduction <add>, %5, %cst_3 [1] : vector<1x16x256xf32> to vector<1x256xf32>
    %7 = vector.shape_cast %6 : vector<1x256xf32> to vector<1x1x256xf32>
    %cst_4 = arith.constant 1.600000e+01 : f32
    %8 = vector.broadcast %cst_4 : f32 to vector<1x1x256xf32>
    %9 = arith.divf %7, %8 : vector<1x1x256xf32>
    %10 = arith.mulf %4, %4 : vector<1x1x256xf32>
    %11 = arith.subf %9, %10 : vector<1x1x256xf32>
    %12 = vector.broadcast %4 : vector<1x1x256xf32> to vector<1x16x256xf32>
    %13 = arith.subf %0, %12 : vector<1x16x256xf32>
    %cst_5 = arith.constant 9.99999974E-6 : f32
    %14 = vector.broadcast %cst_5 : f32 to vector<1x1x256xf32>
    %15 = arith.addf %11, %14 : vector<1x1x256xf32>
    %16 = math.rsqrt %15 : vector<1x1x256xf32>
    %17 = vector.broadcast %16 : vector<1x1x256xf32> to vector<1x16x256xf32>
    %18 = arith.mulf %13, %17 : vector<1x16x256xf32>
    %cst_6 = arith.constant 0.000000e+00 : f32
    %19 = vector.broadcast %cst_6 : f32 to vector<1x16x256xf32>
    %20 = arith.cmpf oge, %18, %19 : vector<1x16x256xf32>
    %cst_7 = arith.constant 2.000000e-01 : f32
    %21 = vector.broadcast %cst_7 : f32 to vector<1x16x256xf32>
    %22 = arith.mulf %21, %18 : vector<1x16x256xf32>
    %23 = arith.select %20, %18, %22 : vector<1x16x256xi1>, vector<1x16x256xf32>
    %c0_8 = arith.constant 0 : index
    %c0_9 = arith.constant 0 : index
    %c0_10 = arith.constant 0 : index
    %24 = vector.load %arg2[%c0_8, %c0_9, %c0_10] : memref<1x16x256xf32, #tpu.memory_space<vmem>>, vector<1x16x256xf32>
    tpu.vector_store %arg2[%c0_8, %c0_9, %c0_10], %23 {strides = array<i32>} : memref<1x16x256xf32, #tpu.memory_space<vmem>>, vector<1x16x256xf32>,
    return
  }
  func.func @transform_0(%arg0: i32) -> (i32, i32, i32) {
    %c0_i32 = arith.constant 0 : i32
    %c0_i32_0 = arith.constant 0 : i32
    %c0_i32_1 = arith.constant 0 : i32
    return %arg0, %c0_i32, %c0_i32_0 : i32, i32, i32
  }
  func.func @transform_1(%arg0: i32) -> (i32, i32, i32) {
    %c0_i32 = arith.constant 0 : i32
    %c0_i32_0 = arith.constant 0 : i32
    %c0_i32_1 = arith.constant 0 : i32
    return %arg0, %c0_i32, %c0_i32_0 : i32, i32, i32
  }
}

module attributes {stable_mosaic.version = 11 : i64} {
  func.func @_instnorm_lrelu_kernel(%arg0: i32, %arg1: memref<1x9x512xf32, #tpu.memory_space<vmem>>, %arg2: memref<1x9x512xf32, #tpu.memory_space<vmem>>) attributes {dimension_semantics = [#tpu.dimension_semantics<parallel>], iteration_bounds = array<i64: 2>, scalar_prefetch = 0 : i64, scratch_operands = 0 : i64, tpu.core_type = #tpu.core_type<tc>, window_params = [{transform_indices = @transform_0, window_bounds = array<i64: 1, 9, 512>}, {transform_indices = @transform_1, window_bounds = array<i64: 1, 9, 512>}]} {
    %c0 = arith.constant 0 : index
    %c0_0 = arith.constant 0 : index
    %c0_1 = arith.constant 0 : index
    %0 = vector.load %arg1[%c0, %c0_0, %c0_1] : memref<1x9x512xf32, #tpu.memory_space<vmem>>, vector<1x9x512xf32>
    %cst = arith.constant dense<0.000000e+00> : vector<1x512xf32>
    %1 = vector.multi_reduction <add>, %0, %cst [1] : vector<1x9x512xf32> to vector<1x512xf32>
    %2 = vector.shape_cast %1 : vector<1x512xf32> to vector<1x1x512xf32>
    %cst_2 = arith.constant 9.000000e+00 : f32
    %3 = vector.broadcast %cst_2 : f32 to vector<1x1x512xf32>
    %4 = arith.divf %2, %3 : vector<1x1x512xf32>
    %5 = arith.mulf %0, %0 : vector<1x9x512xf32>
    %cst_3 = arith.constant dense<0.000000e+00> : vector<1x512xf32>
    %6 = vector.multi_reduction <add>, %5, %cst_3 [1] : vector<1x9x512xf32> to vector<1x512xf32>
    %7 = vector.shape_cast %6 : vector<1x512xf32> to vector<1x1x512xf32>
    %cst_4 = arith.constant 9.000000e+00 : f32
    %8 = vector.broadcast %cst_4 : f32 to vector<1x1x512xf32>
    %9 = arith.divf %7, %8 : vector<1x1x512xf32>
    %10 = arith.mulf %4, %4 : vector<1x1x512xf32>
    %11 = arith.subf %9, %10 : vector<1x1x512xf32>
    %12 = vector.broadcast %4 : vector<1x1x512xf32> to vector<1x9x512xf32>
    %13 = arith.subf %0, %12 : vector<1x9x512xf32>
    %cst_5 = arith.constant 9.99999974E-6 : f32
    %14 = vector.broadcast %cst_5 : f32 to vector<1x1x512xf32>
    %15 = arith.addf %11, %14 : vector<1x1x512xf32>
    %16 = math.rsqrt %15 : vector<1x1x512xf32>
    %17 = vector.broadcast %16 : vector<1x1x512xf32> to vector<1x9x512xf32>
    %18 = arith.mulf %13, %17 : vector<1x9x512xf32>
    %cst_6 = arith.constant 0.000000e+00 : f32
    %19 = vector.broadcast %cst_6 : f32 to vector<1x9x512xf32>
    %20 = arith.cmpf oge, %18, %19 : vector<1x9x512xf32>
    %cst_7 = arith.constant 2.000000e-01 : f32
    %21 = vector.broadcast %cst_7 : f32 to vector<1x9x512xf32>
    %22 = arith.mulf %21, %18 : vector<1x9x512xf32>
    %23 = arith.select %20, %18, %22 : vector<1x9x512xi1>, vector<1x9x512xf32>
    %c0_8 = arith.constant 0 : index
    %c0_9 = arith.constant 0 : index
    %c0_10 = arith.constant 0 : index
    %24 = vector.load %arg2[%c0_8, %c0_9, %c0_10] : memref<1x9x512xf32, #tpu.memory_space<vmem>>, vector<1x9x512xf32>
    tpu.vector_store %arg2[%c0_8, %c0_9, %c0_10], %23 {strides = array<i32>} : memref<1x9x512xf32, #tpu.memory_space<vmem>>, vector<1x9x512xf32>,
    return
  }
  func.func @transform_0(%arg0: i32) -> (i32, i32, i32) {
    %c0_i32 = arith.constant 0 : i32
    %c0_i32_0 = arith.constant 0 : i32
    %c0_i32_1 = arith.constant 0 : i32
    return %arg0, %c0_i32, %c0_i32_0 : i32, i32, i32
  }
  func.func @transform_1(%arg0: i32) -> (i32, i32, i32) {
    %c0_i32 = arith.constant 0 : i32
    %c0_i32_0 = arith.constant 0 : i32
    %c0_i32_1 = arith.constant 0 : i32
    return %arg0, %c0_i32, %c0_i32_0 : i32, i32, i32
  }
}

module attributes {stable_mosaic.version = 11 : i64} {
  func.func @kernel(%arg0: i32, %arg1: i32, %arg2: i32, %arg3: memref<18x512xbf16, #tpu.memory_space<vmem>>, %arg4: memref<512x256xbf16, #tpu.memory_space<vmem>>, %arg5: memref<18x256xf32, #tpu.memory_space<vmem>>, %arg6: memref<18x256xf32, #tpu.memory_space<vmem>>) attributes {dimension_semantics = [#tpu.dimension_semantics<parallel>, #tpu.dimension_semantics<parallel>, #tpu.dimension_semantics<arbitrary>], iteration_bounds = array<i64: 1, 2, 8>, scalar_prefetch = 0 : i64, scratch_operands = 1 : i64, tpu.core_type = #tpu.core_type<tc>, window_params = [{transform_indices = @transform_0, window_bounds = array<i64: 18, 512>}, {transform_indices = @transform_1, window_bounds = array<i64: 512, 256>}, {transform_indices = @transform_2, window_bounds = array<i64: 18, 256>}]} {
    %c0_i32 = arith.constant 0 : i32
    %0 = arith.cmpi eq, %arg2, %c0_i32 : i32
    %1 = arith.extui %0 : i1 to i32
    %c0_i32_0 = arith.constant 0 : i32
    %2 = arith.cmpi ne, %1, %c0_i32_0 : i32
    scf.if %2 {
      %cst_9 = arith.constant 0.000000e+00 : f32
      %12 = vector.broadcast %cst_9 : f32 to vector<18x256xf32>
      %c0_10 = arith.constant 0 : index
      %c0_11 = arith.constant 0 : index
      %13 = vector.load %arg6[%c0_10, %c0_11] : memref<18x256xf32, #tpu.memory_space<vmem>>, vector<18x256xf32>
      tpu.vector_store %arg6[%c0_10, %c0_11], %12 {strides = array<i32>} : memref<18x256xf32, #tpu.memory_space<vmem>>, vector<18x256xf32>,
    } else {
    }
    %c0 = arith.constant 0 : index
    %c0_1 = arith.constant 0 : index
    %3 = vector.load %arg6[%c0, %c0_1] : memref<18x256xf32, #tpu.memory_space<vmem>>, vector<18x256xf32>
    %c0_2 = arith.constant 0 : index
    %c0_3 = arith.constant 0 : index
    %4 = vector.load %arg3[%c0_2, %c0_3] : memref<18x512xbf16, #tpu.memory_space<vmem>>, vector<18x512xbf16>
    %c0_4 = arith.constant 0 : index
    %c0_5 = arith.constant 0 : index
    %5 = vector.load %arg4[%c0_4, %c0_5] : memref<512x256xbf16, #tpu.memory_space<vmem>>, vector<512x256xbf16>
    %cst = arith.constant dense<0.000000e+00> : vector<18x256xf32>
    %6 = tpu.matmul %4, %5, %cst {dimension_numbers = #tpu.dot_dimension_numbers<[1], [0], [0], [1], [0, 0, 1, 1], [], []>} : vector<18x512xbf16>, vector<512x256xbf16>, vector<18x256xf32> -> vector<18x256xf32>
    %7 = arith.addf %3, %6 : vector<18x256xf32>
    %c0_6 = arith.constant 0 : index
    %c0_7 = arith.constant 0 : index
    %8 = vector.load %arg6[%c0_6, %c0_7] : memref<18x256xf32, #tpu.memory_space<vmem>>, vector<18x256xf32>
    tpu.vector_store %arg6[%c0_6, %c0_7], %7 {strides = array<i32>} : memref<18x256xf32, #tpu.memory_space<vmem>>, vector<18x256xf32>,
    %c7_i32 = arith.constant 7 : i32
    %9 = arith.cmpi eq, %arg2, %c7_i32 : i32
    %10 = arith.extui %9 : i1 to i32
    %c0_i32_8 = arith.constant 0 : i32
    %11 = arith.cmpi ne, %10, %c0_i32_8 : i32
    scf.if %11 {
      %c0_9 = arith.constant 0 : index
      %c0_10 = arith.constant 0 : index
      %12 = vector.load %arg6[%c0_9, %c0_10] : memref<18x256xf32, #tpu.memory_space<vmem>>, vector<18x256xf32>
      %c0_11 = arith.constant 0 : index
      %c0_12 = arith.constant 0 : index
      %13 = vector.load %arg5[%c0_11, %c0_12] : memref<18x256xf32, #tpu.memory_space<vmem>>, vector<18x256xf32>
      tpu.vector_store %arg5[%c0_11, %c0_12], %12 {strides = array<i32>} : memref<18x256xf32, #tpu.memory_space<vmem>>, vector<18x256xf32>,
    } else {
    }
    return
  }
  func.func @transform_0(%arg0: i32, %arg1: i32, %arg2: i32) -> (i32, i32) {
    %c0_i32 = arith.constant 0 : i32
    return %arg0, %arg2 : i32, i32
  }
  func.func @transform_1(%arg0: i32, %arg1: i32, %arg2: i32) -> (i32, i32) {
    %c0_i32 = arith.constant 0 : i32
    return %arg2, %arg1 : i32, i32
  }
  func.func @transform_2(%arg0: i32, %arg1: i32, %arg2: i32) -> (i32, i32) {
    %c0_i32 = arith.constant 0 : i32
    return %arg0, %arg1 : i32, i32
  }
}

module attributes {stable_mosaic.version = 11 : i64} {
  func.func @kernel(%arg0: i32, %arg1: i32, %arg2: i32, %arg3: memref<8x512xbf16, #tpu.memory_space<vmem>>, %arg4: memref<512x1xbf16, #tpu.memory_space<vmem>>, %arg5: memref<1x1xf32, #tpu.memory_space<vmem>>, %arg6: memref<8x1xf32, #tpu.memory_space<vmem>>, %arg7: memref<8x1xf32, #tpu.memory_space<vmem>>) attributes {dimension_semantics = [#tpu.dimension_semantics<parallel>, #tpu.dimension_semantics<parallel>, #tpu.dimension_semantics<arbitrary>], iteration_bounds = array<i64: 1, 1, 16>, scalar_prefetch = 0 : i64, scratch_operands = 1 : i64, tpu.core_type = #tpu.core_type<tc>, window_params = [{transform_indices = @transform_0, window_bounds = array<i64: 8, 512>}, {transform_indices = @transform_1, window_bounds = array<i64: 512, 1>}, {transform_indices = @transform_2, window_bounds = array<i64: 1, 1>}, {transform_indices = @transform_3, window_bounds = array<i64: 8, 1>}]} {
    %c0_i32 = arith.constant 0 : i32
    %0 = arith.cmpi eq, %arg2, %c0_i32 : i32
    %1 = arith.extui %0 : i1 to i32
    %c0_i32_0 = arith.constant 0 : i32
    %2 = arith.cmpi ne, %1, %c0_i32_0 : i32
    scf.if %2 {
      %cst_9 = arith.constant 0.000000e+00 : f32
      %12 = vector.broadcast %cst_9 : f32 to vector<8x1xf32>
      %c0_10 = arith.constant 0 : index
      %c0_11 = arith.constant 0 : index
      %13 = vector.load %arg7[%c0_10, %c0_11] : memref<8x1xf32, #tpu.memory_space<vmem>>, vector<8x1xf32>
      tpu.vector_store %arg7[%c0_10, %c0_11], %12 {strides = array<i32>} : memref<8x1xf32, #tpu.memory_space<vmem>>, vector<8x1xf32>,
    } else {
    }
    %c0 = arith.constant 0 : index
    %c0_1 = arith.constant 0 : index
    %3 = vector.load %arg7[%c0, %c0_1] : memref<8x1xf32, #tpu.memory_space<vmem>>, vector<8x1xf32>
    %c0_2 = arith.constant 0 : index
    %c0_3 = arith.constant 0 : index
    %4 = vector.load %arg3[%c0_2, %c0_3] : memref<8x512xbf16, #tpu.memory_space<vmem>>, vector<8x512xbf16>
    %c0_4 = arith.constant 0 : index
    %c0_5 = arith.constant 0 : index
    %5 = vector.load %arg4[%c0_4, %c0_5] : memref<512x1xbf16, #tpu.memory_space<vmem>>, vector<512x1xbf16>
    %cst = arith.constant dense<0.000000e+00> : vector<8x1xf32>
    %6 = tpu.matmul %4, %5, %cst {dimension_numbers = #tpu.dot_dimension_numbers<[1], [0], [0], [1], [0, 0, 1, 1], [], []>} : vector<8x512xbf16>, vector<512x1xbf16>, vector<8x1xf32> -> vector<8x1xf32>
    %7 = arith.addf %3, %6 : vector<8x1xf32>
    %c0_6 = arith.constant 0 : index
    %c0_7 = arith.constant 0 : index
    %8 = vector.load %arg7[%c0_6, %c0_7] : memref<8x1xf32, #tpu.memory_space<vmem>>, vector<8x1xf32>
    tpu.vector_store %arg7[%c0_6, %c0_7], %7 {strides = array<i32>} : memref<8x1xf32, #tpu.memory_space<vmem>>, vector<8x1xf32>,
    %c15_i32 = arith.constant 15 : i32
    %9 = arith.cmpi eq, %arg2, %c15_i32 : i32
    %10 = arith.extui %9 : i1 to i32
    %c0_i32_8 = arith.constant 0 : i32
    %11 = arith.cmpi ne, %10, %c0_i32_8 : i32
    scf.if %11 {
      %c0_9 = arith.constant 0 : index
      %c0_10 = arith.constant 0 : index
      %12 = vector.load %arg7[%c0_9, %c0_10] : memref<8x1xf32, #tpu.memory_space<vmem>>, vector<8x1xf32>
      %c0_11 = arith.constant 0 : index
      %c0_12 = arith.constant 0 : index
      %13 = vector.load %arg5[%c0_11, %c0_12] : memref<1x1xf32, #tpu.memory_space<vmem>>, vector<1x1xf32>
      %14 = vector.broadcast %13 : vector<1x1xf32> to vector<8x1xf32>
      %15 = arith.addf %12, %14 : vector<8x1xf32>
      %c0_13 = arith.constant 0 : index
      %c0_14 = arith.constant 0 : index
      %16 = vector.load %arg6[%c0_13, %c0_14] : memref<8x1xf32, #tpu.memory_space<vmem>>, vector<8x1xf32>
      tpu.vector_store %arg6[%c0_13, %c0_14], %15 {strides = array<i32>} : memref<8x1xf32, #tpu.memory_space<vmem>>, vector<8x1xf32>,
    } else {
    }
    return
  }
  func.func @transform_0(%arg0: i32, %arg1: i32, %arg2: i32) -> (i32, i32) {
    %c0_i32 = arith.constant 0 : i32
    return %arg0, %arg2 : i32, i32
  }
  func.func @transform_1(%arg0: i32, %arg1: i32, %arg2: i32) -> (i32, i32) {
    %c0_i32 = arith.constant 0 : i32
    return %arg2, %arg1 : i32, i32
  }
  func.func @transform_2(%arg0: i32, %arg1: i32, %arg2: i32) -> (i32, i32) {
    %c0_i32 = arith.constant 0 : i32
    %c0_i32_0 = arith.constant 0 : i32
    return %c0_i32, %arg1 : i32, i32
  }
  func.func @transform_3(%arg0: i32, %arg1: i32, %arg2: i32) -> (i32, i32) {
    %c0_i32 = arith.constant 0 : i32
    return %arg0, %arg1 : i32, i32
  }
}

</mosaic_0001>

<bundles_post_ra>
// kernel: discriminator_forward.8
= control target key start
LH: loop header
LB: loop body
LE: loop exit
PB: predicated region body
PF: predicated region fallthrough
CT: control target
= control target key end

     0   :  { %s1182_s12 = smov 0   ;;  %s1184_s13 = smov 0   ;;  %s1429_s0 = inlined_call_operand.vmem [shape: bf16[512,48], index: 0, kind: input, shape index: {}]   ;;  %s1430_s1 = inlined_call_operand.vmem [shape: bf16[48,64], index: 1, kind: input, shape index: {}]   ;;  %s1431_s2 = inlined_call_operand.vmem [shape: f32[1,64], index: 2, kind: input, shape index: {}]   ;;  %s1432_s3 = inlined_call_operand.vmem [shape: f32[512,64], index: 3, kind: output, shape index: {}]  }
   0x1   :  { %s1186_s14 = smov 0  }
   0x2 LB: > { %s32_s15 = sadd.s32 1, %s1155_s13  ;;  %p984_p0 = scmp.ge.s32.totalorder %s1159_s14, 1  ;;  %s1159_s14 = sphi %s1186_s14, %s13_s14   ;;  %s1155_s13 = sphi %s1184_s13, %s1434_s13   ;;  %s1151_s12 = sphi %s1182_s12, %s1433_s12  }
   0x3   : > { %p34_p1 = scmp.ge.s32.totalorder %s32_s15, 2  ;;  %p188_p2 = scmp.lt.s32.totalorder %s1159_s14, 3 }
   0x5   : > { %s1436_s15 = smov (%p34_p1, %s32_s15), 0  ;;  %p189_p3 = pnand %p984_p0, %p188_p2 }
   0x6   : > { %s985_s18 = sshll.u32 (!%p189_p3), %s1151_s12, 5 }
   0x7   : > { %192 = sbr.rel (%p189_p3) target bundleno = 233 (0xe9), region = 32  ;;  %p230_p4 = scmp.lt.s32.totalorder (!%p189_p3), %s985_s18, 63 }
   0xc   : > { %v1101_v0 = vld [vmem:[%s1430_s1 + $0x10] sm:$0xff]  ;;  %v1100_v1 = vld [vmem:[%s1430_s1 + $0x8] sm:$0xff]  ;;  %s1438_s18 = smov (!%p230_p4, %s985_s18), 63  ;;  %v1099_v2 = vld [vmem:[%s1430_s1] sm:$0xff]  ;;  %vm465_vm0 = vcmask 392192   ;;  %vm264_vm1 = vcmask 523264  }
   0xd   : > { %519 = vmatpush.bf16.msra.mxu0 %v1101_v0  ;;  %1102 = vmatpush.bf16.msra.mxu1 %v1101_v0  ;;  %s986_s21 = sshll.u32 %s1438_s18, 2  ;;  %v1161_v11 = vmov 0.0   ;;  %v1286_v30 = vld [vmem:[%s1431_s2] ss:$0 sm:$0xff]  ;;  %s988_s29 = sshll.u32 %s1438_s18, 3 }
   0xe   : > { %1103 = vmatpush.bf16.msra.mxu2 %v1101_v0  ;;  %1104 = vmatpush.bf16.msra.mxu3 %v1101_v0  ;;  %s1215_s26 = scalar_lea.vmem %s1429_s0, %s986_s21  ;;  %265 = vst.msk [vmem:[#allocation2] sm:$0xff] %vm264_vm1, %v1161_v11  ;;  %s1297_s5 = scalar_lea.vmem %s1432_s3, %s988_s29 }
   0xf   : > { %v1083_v3 = vld [vmem:[%s1215_s26] sm:$0xff]  ;;  %v1084_v7 = vld [vmem:[%s1215_s26 + $0x8] sm:$0xff]  ;;  %266 = vst.msk [vmem:[#allocation2 + $0x8] sm:$0xff] %vm264_vm1, %v1161_v11  ;;  %v1085_v12 = vld [vmem:[%s1215_s26 + $0x10] sm:$0xff] }
  0x10   : > { %v1087_v4 = vld [vmem:[%s1215_s26 + $0x20] sm:$0xff]  ;;  %v1088_v8 = vld [vmem:[%s1215_s26 + $0x28] sm:$0xff]  ;;  %267 = vst.msk [vmem:[#allocation2 + $0x10] sm:$0xff] %vm264_vm1, %v1161_v11  ;;  %v1089_v13 = vld [vmem:[%s1215_s26 + $0x30] sm:$0xff] }
  0x11   : > { %520 = vmatpush.bf16.msra.mxu0 %v1100_v1  ;;  %1105 = vmatpush.bf16.msra.mxu1 %v1100_v1  ;;  %v1091_v5 = vld [vmem:[%s1215_s26 + $0x40] sm:$0xff]  ;;  %v1092_v9 = vld [vmem:[%s1215_s26 + $0x48] sm:$0xff]  ;;  %268 = vst.msk [vmem:[#allocation2 + $0x18] sm:$0xff] %vm264_vm1, %v1161_v11  ;;  %v1093_v14 = vld [vmem:[%s1215_s26 + $0x50] sm:$0xff] }
  0x12   : > { %1106 = vmatpush.bf16.msra.mxu2 %v1100_v1  ;;  %1107 = vmatpush.bf16.msra.mxu3 %v1100_v1  ;;  %v1095_v6 = vld [vmem:[%s1215_s26 + $0x60] sm:$0xff]  ;;  %v1096_v10 = vld [vmem:[%s1215_s26 + $0x68] sm:$0xff]  ;;  %269 = vst.msk [vmem:[#allocation2 + $0x20] sm:$0xff] %vm264_vm1, %v1161_v11  ;;  %v1097_v15 = vld [vmem:[%s1215_s26 + $0x70] sm:$0xff] }
  0x13   : > { %270 = vst.msk [vmem:[#allocation2 + $0x28] sm:$0xff] %vm264_vm1, %v1161_v11  ;;  %v1086_v16 = vld [vmem:[%s1215_s26 + $0x18] sm:$0xff] }
  0x14   : > { %271 = vst.msk [vmem:[#allocation2 + $0x30] sm:$0xff] %vm264_vm1, %v1161_v11  ;;  %v1090_v17 = vld [vmem:[%s1215_s26 + $0x38] sm:$0xff] }
  0x15   : > { %521 = vmatpush.bf16.msra.mxu0 %v1099_v2  ;;  %1108 = vmatpush.bf16.msra.mxu1 %v1099_v2  ;;  %272 = vst.msk [vmem:[#allocation2 + $0x38] sm:$0xff] %vm264_vm1, %v1161_v11  ;;  %v1094_v18 = vld [vmem:[%s1215_s26 + $0x58] sm:$0xff]  ;;  %v297_v20 = vld [vmem:[#allocation2] sm:$0xff] }
  0x16   : > { %1109 = vmatpush.bf16.msra.mxu2 %v1099_v2  ;;  %1110 = vmatpush.bf16.msra.mxu3 %v1099_v2  ;;  %273 = vst.msk [vmem:[#allocation2 + $0x40] sm:$0xff] %vm264_vm1, %v1161_v11  ;;  %v1098_v19 = vld [vmem:[%s1215_s26 + $0x78] sm:$0xff]  ;;  %v298_v28 = vld [vmem:[#allocation2 + $0x8] sm:$0xff] }
  0x17   : > { %274 = vst.msk [vmem:[#allocation2 + $0x48] sm:$0xff] %vm264_vm1, %v1161_v11  ;;  %v299_v47 = vld [vmem:[#allocation2 + $0x10] sm:$0xff] }
  0x18   : > { %1065 = vmatmul.msk.bf16.vlgmr.msra.gmra.mxu0 %vm465_vm0, %v1083_v3  ;;  %1069 = vmatmul.msk.bf16.vlgmr.msra.gmra.mxu1 %vm465_vm0, %v1087_v4  ;;  %275 = vst.msk [vmem:[#allocation2 + $0x50] sm:$0xff] %vm264_vm1, %v1161_v11 }
  0x19   : > { %1073 = vmatmul.msk.bf16.vlgmr.msra.gmra.mxu2 %vm465_vm0, %v1091_v5  ;;  %1077 = vmatmul.msk.bf16.vlgmr.msra.gmra.mxu3 %vm465_vm0, %v1095_v6  ;;  %276 = vst.msk [vmem:[#allocation2 + $0x58] sm:$0xff] %vm264_vm1, %v1161_v11 }
  0x1a   : > { %277 = vst.msk [vmem:[#allocation2 + $0x60] sm:$0xff] %vm264_vm1, %v1161_v11 }
  0x1b   : > { %278 = vst.msk [vmem:[#allocation2 + $0x68] sm:$0xff] %vm264_vm1, %v1161_v11 }
  0x1c   : > { %279 = vst.msk [vmem:[#allocation2 + $0x70] sm:$0xff] %vm264_vm1, %v1161_v11 }
  0x1d   : > { %280 = vst.msk [vmem:[#allocation2 + $0x78] sm:$0xff] %vm264_vm1, %v1161_v11  ;;  %v305_v21 = vld [vmem:[#allocation2 + $0x40] sm:$0xff] }
  0x1e   : > { %281 = vst.msk [vmem:[#allocation2 + $0x80] sm:$0xff] %vm264_vm1, %v1161_v11  ;;  %v306_v29 = vld [vmem:[#allocation2 + $0x48] sm:$0xff] }
  0x1f   : > { %282 = vst.msk [vmem:[#allocation2 + $0x88] sm:$0xff] %vm264_vm1, %v1161_v11  ;;  %v307_v48 = vld [vmem:[#allocation2 + $0x50] sm:$0xff] }
  0x20   : > { %283 = vst.msk [vmem:[#allocation2 + $0x90] sm:$0xff] %vm264_vm1, %v1161_v11 }
  0x21   : > { %284 = vst.msk [vmem:[#allocation2 + $0x98] sm:$0xff] %vm264_vm1, %v1161_v11 }
  0x22   : > { %285 = vst.msk [vmem:[#allocation2 + $0xa0] sm:$0xff] %vm264_vm1, %v1161_v11 }
  0x23   : > { %286 = vst.msk [vmem:[#allocation2 + $0xa8] sm:$0xff] %vm264_vm1, %v1161_v11 }
  0x24   : > { %287 = vst.msk [vmem:[#allocation2 + $0xb0] sm:$0xff] %vm264_vm1, %v1161_v11 }
  0x25   : > { %288 = vst.msk [vmem:[#allocation2 + $0xb8] sm:$0xff] %vm264_vm1, %v1161_v11  ;;  %v313_v26 = vld [vmem:[#allocation2 + $0x80] sm:$0xff] }
  0x26   : > { %289 = vst.msk [vmem:[#allocation2 + $0xc0] sm:$0xff] %vm264_vm1, %v1161_v11  ;;  %v314_v44 = vld [vmem:[#allocation2 + $0x88] sm:$0xff] }
  0x27   : > { %290 = vst.msk [vmem:[#allocation2 + $0xc8] sm:$0xff] %vm264_vm1, %v1161_v11  ;;  %v315_v5 = vld [vmem:[#allocation2 + $0x90] sm:$0xff] }
  0x28   : > { %1066 = vmatmul.msk.bf16.gmra.mxu0 %vm465_vm0, %v1084_v7  ;;  %1070 = vmatmul.msk.bf16.gmra.mxu1 %vm465_vm0, %v1088_v8  ;;  %291 = vst.msk [vmem:[#allocation2 + $0xd0] sm:$0xff] %vm264_vm1, %v1161_v11 }
  0x29   : > { %1074 = vmatmul.msk.bf16.gmra.mxu2 %vm465_vm0, %v1092_v9  ;;  %1078 = vmatmul.msk.bf16.gmra.mxu3 %vm465_vm0, %v1096_v10  ;;  %292 = vst.msk [vmem:[#allocation2 + $0xd8] sm:$0xff] %vm264_vm1, %v1161_v11  ;;  %v300_v9 = vld [vmem:[#allocation2 + $0x18] sm:$0xff] }
  0x2a   : > { %293 = vst.msk [vmem:[#allocation2 + $0xe0] sm:$0xff] %vm264_vm1, %v1161_v11 }
  0x2b   : > { %294 = vst.msk [vmem:[#allocation2 + $0xe8] sm:$0xff] %vm264_vm1, %v1161_v11 }
  0x2c   : > { %295 = vst.msk [vmem:[#allocation2 + $0xf0] sm:$0xff] %vm264_vm1, %v1161_v11 }
  0x2d   : > { %296 = vst.msk [vmem:[#allocation2 + $0xf8] sm:$0xff] %vm264_vm1, %v1161_v11  ;;  %v321_v27 = vld [vmem:[#allocation2 + $0xc0] sm:$0xff] }
  0x2e   : > { %v322_v45 = vld [vmem:[#allocation2 + $0xc8] sm:$0xff] }
  0x2f   : > { %v323_v6 = vld [vmem:[#allocation2 + $0xd0] sm:$0xff] }
  0x38   : > { %1067 = vmatmul.msk.bf16.gmra.mxu0 %vm465_vm0, %v1085_v12  ;;  %1071 = vmatmul.msk.bf16.gmra.mxu1 %vm465_vm0, %v1089_v13 }
  0x39   : > { %1075 = vmatmul.msk.bf16.gmra.mxu2 %vm465_vm0, %v1093_v14  ;;  %1079 = vmatmul.msk.bf16.gmra.mxu3 %vm465_vm0, %v1097_v15  ;;  %v308_v14 = vld [vmem:[#allocation2 + $0x58] sm:$0xff] }
  0x48   : > { %1068 = vmatmul.msk.bf16.gmra.mxu0 %vm465_vm0, %v1086_v16  ;;  %1072 = vmatmul.msk.bf16.gmra.mxu1 %vm465_vm0, %v1090_v17 }
  0x49   : > { %1076 = vmatmul.msk.bf16.gmra.mxu2 %vm465_vm0, %v1094_v18  ;;  %1080 = vmatmul.msk.bf16.gmra.mxu3 %vm465_vm0, %v1098_v19 }
  0x95   : > { %v523_v22 = vpop.f32.mrf.mxu0  ;;  %v543_v23 = vpop.f32.mrf.mxu1 }
  0x96   : > { %v603_v24 = vadd.f32 %v523_v22, %v297_v20  ;;  %v611_v25 = vadd.f32 %v543_v23, %v305_v21 }
  0x98   : > { %636 = vst.msk [vmem:[#allocation2] sm:$0xff] %vm264_vm1, %v603_v24 }
  0x99   : > { %644 = vst.msk [vmem:[#allocation2 + $0x40] sm:$0xff] %vm264_vm1, %v611_v25 }
  0x9c   : > { %v563_v31 = vpop.f32.mrf.mxu2  ;;  %v583_v32 = vpop.f32.mrf.mxu3 }
  0x9d   : > { %v619_v33 = vadd.f32 %v563_v31, %v313_v26  ;;  %v627_v34 = vadd.f32 %v583_v32, %v321_v27  ;;  %v525_v35 = vpop.f32.mrf.mxu0  ;;  %v545_v36 = vpop.f32.mrf.mxu1 }
  0x9e   : > { %v604_v37 = vadd.f32 %v525_v35, %v298_v28  ;;  %v612_v38 = vadd.f32 %v545_v36, %v306_v29  ;;  %v324_v35 = vld [vmem:[#allocation2 + $0xd8] sm:$0xff] }
  0x9f   : > { %v671_v39 = vld [vmem:[#allocation2] sm:$0xff]  ;;  %652 = vst.msk [vmem:[#allocation2 + $0x80] sm:$0xff] %vm264_vm1, %v619_v33 }
  0xa0   : > { %v707_v40 = vadd.f32 %v1286_v30, %v671_v39  ;;  %v679_v41 = vld [vmem:[#allocation2 + $0x40] sm:$0xff]  ;;  %660 = vst.msk [vmem:[#allocation2 + $0xc0] sm:$0xff] %vm264_vm1, %v627_v34  ;;  %v316_v34 = vld [vmem:[#allocation2 + $0x98] sm:$0xff] }
  0xa1   : > { %v715_v42 = vadd.f32 %v1286_v30, %v679_v41  ;;  %637 = vst.msk [vmem:[#allocation2 + $0x8] sm:$0xff] %vm264_vm1, %v604_v37 }
  0xa2   : > { %vm739_vm2 = vcmp.ge.f32.partialorder %v707_v40, 0.0  ;;  %v771_v43 = vmul.f32 0.2, %v707_v40  ;;  %645 = vst.msk [vmem:[#allocation2 + $0x48] sm:$0xff] %vm264_vm1, %v612_v38  ;;  %v301_v38 = vld [vmem:[#allocation2 + $0x20] sm:$0xff] }
  0xa3   : > { %vm747_vm3 = vcmp.ge.f32.partialorder %v715_v42, 0.0  ;;  %v779_v46 = vmul.f32 0.2, %v715_v42 }
  0xa4   : > { %v803_v49 = vsel %vm739_vm2, %v707_v40, %v771_v43  ;;  %v565_v50 = vpop.f32.mrf.mxu2  ;;  %v585_v51 = vpop.f32.mrf.mxu3  ;;  %v309_v43 = vld [vmem:[#allocation2 + $0x60] sm:$0xff] }
  0xa5   : > { %835 = vst.msk [vmem:[%s1297_s5] sm:$0xff] %vm264_vm1, %v803_v49  ;;  %v811_v52 = vsel %vm747_vm3, %v715_v42, %v779_v46  ;;  %v620_v53 = vadd.f32 %v565_v50, %v314_v44  ;;  %v628_v54 = vadd.f32 %v585_v51, %v322_v45  ;;  %v528_v55 = vpop.f32.mrf.mxu0  ;;  %v548_v56 = vpop.f32.mrf.mxu1 }
  0xa6   : > { %843 = vst.msk [vmem:[%s1297_s5 + $0x40] sm:$0xff] %vm264_vm1, %v811_v52  ;;  %v687_v57 = vld [vmem:[#allocation2 + $0x80] sm:$0xff]  ;;  %v605_v58 = vadd.f32 %v528_v55, %v299_v47  ;;  %v613_v59 = vadd.f32 %v548_v56, %v307_v48 }
  0xa7   : > { %v723_v60 = vadd.f32 %v1286_v30, %v687_v57  ;;  %v695_v61 = vld [vmem:[#allocation2 + $0xc0] sm:$0xff]  ;;  %653 = vst.msk [vmem:[#allocation2 + $0x88] sm:$0xff] %vm264_vm1, %v620_v53 }
  0xa8   : > { %v731_v62 = vadd.f32 %v1286_v30, %v695_v61  ;;  %v672_v63 = vld [vmem:[#allocation2 + $0x8] sm:$0xff]  ;;  %661 = vst.msk [vmem:[#allocation2 + $0xc8] sm:$0xff] %vm264_vm1, %v628_v54 }
  0xa9   : > { %vm755_vm4 = vcmp.ge.f32.partialorder %v723_v60, 0.0  ;;  %v787_v0 = vmul.f32 0.2, %v723_v60  ;;  %v708_v1 = vadd.f32 %v1286_v30, %v672_v63  ;;  %v680_v2 = vld [vmem:[#allocation2 + $0x48] sm:$0xff]  ;;  %638 = vst.msk [vmem:[#allocation2 + $0x10] sm:$0xff] %vm264_vm1, %v605_v58  ;;  %v325_v63 = vld [vmem:[#allocation2 + $0xe0] sm:$0xff] }
  0xaa   : > { %vm763_vm5 = vcmp.ge.f32.partialorder %v731_v62, 0.0  ;;  %v795_v3 = vmul.f32 0.2, %v731_v62  ;;  %v716_v4 = vadd.f32 %v1286_v30, %v680_v2  ;;  %646 = vst.msk [vmem:[#allocation2 + $0x50] sm:$0xff] %vm264_vm1, %v613_v59 }
  0xab   : > { %v819_v7 = vsel %vm755_vm4, %v723_v60, %v787_v0  ;;  %vm740_vm6 = vcmp.ge.f32.partialorder %v708_v1, 0.0  ;;  %v772_v8 = vmul.f32 0.2, %v708_v1  ;;  %v317_v60 = vld [vmem:[#allocation2 + $0xa0] sm:$0xff] }
  0xac   : > { %851 = vst.msk [vmem:[%s1297_s5 + $0x80] sm:$0xff] %vm264_vm1, %v819_v7  ;;  %v827_v10 = vsel %vm763_vm5, %v731_v62, %v795_v3  ;;  %vm748_vm7 = vcmp.ge.f32.partialorder %v716_v4, 0.0  ;;  %v780_v11 = vmul.f32 0.2, %v716_v4  ;;  %v568_v12 = vpop.f32.mrf.mxu2  ;;  %v588_v13 = vpop.f32.mrf.mxu3 }
  0xad   : > { %859 = vst.msk [vmem:[%s1297_s5 + $0xc0] sm:$0xff] %vm264_vm1, %v827_v10  ;;  %v804_v15 = vsel %vm740_vm6, %v708_v1, %v772_v8  ;;  %v621_v16 = vadd.f32 %v568_v12, %v315_v5  ;;  %v629_v17 = vadd.f32 %v588_v13, %v323_v6  ;;  %v530_v18 = vpop.f32.mrf.mxu0  ;;  %v550_v19 = vpop.f32.mrf.mxu1 }
  0xae   : > { %836 = vst.msk [vmem:[%s1297_s5 + $0x8] sm:$0xff] %vm264_vm1, %v804_v15  ;;  %v812_v20 = vsel %vm748_vm7, %v716_v4, %v780_v11  ;;  %v688_v21 = vld [vmem:[#allocation2 + $0x88] sm:$0xff]  ;;  %v606_v22 = vadd.f32 %v530_v18, %v300_v9  ;;  %v614_v25 = vadd.f32 %v550_v19, %v308_v14 }
  0xaf   : > { %844 = vst.msk [vmem:[%s1297_s5 + $0x48] sm:$0xff] %vm264_vm1, %v812_v20  ;;  %v724_v23 = vadd.f32 %v1286_v30, %v688_v21  ;;  %v696_v24 = vld [vmem:[#allocation2 + $0xc8] sm:$0xff] }
  0xb0   : > { %v732_v26 = vadd.f32 %v1286_v30, %v696_v24  ;;  %v673_v27 = vld [vmem:[#allocation2 + $0x10] sm:$0xff]  ;;  %654 = vst.msk [vmem:[#allocation2 + $0x90] sm:$0xff] %vm264_vm1, %v621_v16  ;;  %v302_v4 = vld [vmem:[#allocation2 + $0x28] sm:$0xff] }
  0xb1   : > { %vm756_vm8 = vcmp.ge.f32.partialorder %v724_v23, 0.0  ;;  %v788_v28 = vmul.f32 0.2, %v724_v23  ;;  %v709_v29 = vadd.f32 %v1286_v30, %v673_v27  ;;  %v681_v31 = vld [vmem:[#allocation2 + $0x50] sm:$0xff]  ;;  %662 = vst.msk [vmem:[#allocation2 + $0xd0] sm:$0xff] %vm264_vm1, %v629_v17  ;;  %v310_v9 = vld [vmem:[#allocation2 + $0x68] sm:$0xff] }
  0xb2   : > { %vm764_vm9 = vcmp.ge.f32.partialorder %v732_v26, 0.0  ;;  %v796_v32 = vmul.f32 0.2, %v732_v26  ;;  %v717_v33 = vadd.f32 %v1286_v30, %v681_v31  ;;  %639 = vst.msk [vmem:[#allocation2 + $0x18] sm:$0xff] %vm264_vm1, %v606_v22  ;;  %v318_v24 = vld [vmem:[#allocation2 + $0xa8] sm:$0xff] }
  0xb3   : > { %v820_v36 = vsel %vm756_vm8, %v724_v23, %v788_v28  ;;  %vm741_vm10 = vcmp.ge.f32.partialorder %v709_v29, 0.0  ;;  %v773_v37 = vmul.f32 0.2, %v709_v29  ;;  %647 = vst.msk [vmem:[#allocation2 + $0x58] sm:$0xff] %vm264_vm1, %v614_v25  ;;  %v326_v27 = vld [vmem:[#allocation2 + $0xe8] sm:$0xff] }
  0xb4   : > { %852 = vst.msk [vmem:[%s1297_s5 + $0x88] sm:$0xff] %vm264_vm1, %v820_v36  ;;  %v828_v39 = vsel %vm764_vm9, %v732_v26, %v796_v32  ;;  %vm749_vm11 = vcmp.ge.f32.partialorder %v717_v33, 0.0  ;;  %v781_v40 = vmul.f32 0.2, %v717_v33  ;;  %v570_v41 = vpop.f32.mrf.mxu2  ;;  %v590_v42 = vpop.f32.mrf.mxu3 }
  0xb5   : > { %860 = vst.msk [vmem:[%s1297_s5 + $0xc8] sm:$0xff] %vm264_vm1, %v828_v39  ;;  %v805_v44 = vsel %vm741_vm10, %v709_v29, %v773_v37  ;;  %v622_v45 = vadd.f32 %v570_v41, %v316_v34  ;;  %v630_v46 = vadd.f32 %v590_v42, %v324_v35  ;;  %v533_v47 = vpop.f32.mrf.mxu0  ;;  %v553_v48 = vpop.f32.mrf.mxu1 }
  0xb6   : > { %837 = vst.msk [vmem:[%s1297_s5 + $0x10] sm:$0xff] %vm264_vm1, %v805_v44  ;;  %v813_v49 = vsel %vm749_vm11, %v717_v33, %v781_v40  ;;  %v607_v50 = vadd.f32 %v533_v47, %v301_v38  ;;  %v615_v52 = vadd.f32 %v553_v48, %v309_v43  ;;  %v303_v33 = vld [vmem:[#allocation2 + $0x30] sm:$0xff] }
  0xb7   : > { %845 = vst.msk [vmem:[%s1297_s5 + $0x50] sm:$0xff] %vm264_vm1, %v813_v49  ;;  %v689_v51 = vld [vmem:[#allocation2 + $0x90] sm:$0xff] }
  0xb8   : > { %v725_v53 = vadd.f32 %v1286_v30, %v689_v51  ;;  %v697_v54 = vld [vmem:[#allocation2 + $0xd0] sm:$0xff]  ;;  %655 = vst.msk [vmem:[#allocation2 + $0x98] sm:$0xff] %vm264_vm1, %v622_v45 }
  0xb9   : > { %v733_v55 = vadd.f32 %v1286_v30, %v697_v54  ;;  %v674_v56 = vld [vmem:[#allocation2 + $0x18] sm:$0xff]  ;;  %663 = vst.msk [vmem:[#allocation2 + $0xd8] sm:$0xff] %vm264_vm1, %v630_v46  ;;  %v311_v38 = vld [vmem:[#allocation2 + $0x70] sm:$0xff] }
  0xba   : > { %vm757_vm12 = vcmp.ge.f32.partialorder %v725_v53, 0.0  ;;  %v789_v57 = vmul.f32 0.2, %v725_v53  ;;  %v710_v58 = vadd.f32 %v1286_v30, %v674_v56  ;;  %v682_v59 = vld [vmem:[#allocation2 + $0x58] sm:$0xff]  ;;  %640 = vst.msk [vmem:[#allocation2 + $0x20] sm:$0xff] %vm264_vm1, %v607_v50 }
  0xbb   : > { %vm765_vm13 = vcmp.ge.f32.partialorder %v733_v55, 0.0  ;;  %v797_v61 = vmul.f32 0.2, %v733_v55  ;;  %v718_v62 = vadd.f32 %v1286_v30, %v682_v59  ;;  %648 = vst.msk [vmem:[#allocation2 + $0x60] sm:$0xff] %vm264_vm1, %v615_v52 }
  0xbc   : > { %v821_v0 = vsel %vm757_vm12, %v725_v53, %v789_v57  ;;  %vm742_vm14 = vcmp.ge.f32.partialorder %v710_v58, 0.0  ;;  %v774_v1 = vmul.f32 0.2, %v710_v58  ;;  %v573_v2 = vpop.f32.mrf.mxu2  ;;  %v593_v3 = vpop.f32.mrf.mxu3  ;;  %v319_v53 = vld [vmem:[#allocation2 + $0xb0] sm:$0xff] }
  0xbd   : > { %853 = vst.msk [vmem:[%s1297_s5 + $0x90] sm:$0xff] %vm264_vm1, %v821_v0  ;;  %v829_v5 = vsel %vm765_vm13, %v733_v55, %v797_v61  ;;  %vm750_vm15 = vcmp.ge.f32.partialorder %v718_v62, 0.0  ;;  %v782_v6 = vmul.f32 0.2, %v718_v62  ;;  %v623_v7 = vadd.f32 %v573_v2, %v317_v60  ;;  %v535_v8 = vpop.f32.mrf.mxu0  ;;  %v555_v10 = vpop.f32.mrf.mxu1  ;;  %v327_v57 = vld [vmem:[#allocation2 + $0xf0] sm:$0xff]  ;;  %v304_v61 = vld [vmem:[#allocation2 + $0x38] sm:$0xff] }
  0xbe   : > { %861 = vst.msk [vmem:[%s1297_s5 + $0xd0] sm:$0xff] %vm264_vm1, %v829_v5  ;;  %v806_v11 = vsel %vm742_vm14, %v710_v58, %v774_v1  ;;  %v631_v12 = vadd.f32 %v593_v3, %v325_v63  ;;  %v608_v15 = vadd.f32 %v535_v8, %v302_v4  ;;  %v616_v18 = vadd.f32 %v555_v10, %v310_v9  ;;  %v312_v2 = vld [vmem:[#allocation2 + $0x78] sm:$0xff] }
  0xbf   : > { %838 = vst.msk [vmem:[%s1297_s5 + $0x18] sm:$0xff] %vm264_vm1, %v806_v11  ;;  %v814_v13 = vsel %vm750_vm15, %v718_v62, %v782_v6  ;;  %v690_v14 = vld [vmem:[#allocation2 + $0x98] sm:$0xff] }
  0xc0   : > { %846 = vst.msk [vmem:[%s1297_s5 + $0x58] sm:$0xff] %vm264_vm1, %v814_v13  ;;  %v726_v16 = vadd.f32 %v1286_v30, %v690_v14  ;;  %v698_v17 = vld [vmem:[#allocation2 + $0xd8] sm:$0xff] }
  0xc1   : > { %v734_v19 = vadd.f32 %v1286_v30, %v698_v17  ;;  %v675_v20 = vld [vmem:[#allocation2 + $0x20] sm:$0xff]  ;;  %656 = vst.msk [vmem:[#allocation2 + $0xa0] sm:$0xff] %vm264_vm1, %v623_v7  ;;  %v320_v17 = vld [vmem:[#allocation2 + $0xb8] sm:$0xff] }
  0xc2   : > { %vm758_vm0 = vcmp.ge.f32.partialorder %v726_v16, 0.0  ;;  %v790_v21 = vmul.f32 0.2, %v726_v16  ;;  %v711_v22 = vadd.f32 %v1286_v30, %v675_v20  ;;  %v683_v23 = vld [vmem:[#allocation2 + $0x60] sm:$0xff]  ;;  %664 = vst.msk [vmem:[#allocation2 + $0xe0] sm:$0xff] %vm264_vm1, %v631_v12 }
  0xc3   : > { %vm766_vm2 = vcmp.ge.f32.partialorder %v734_v19, 0.0  ;;  %v798_v25 = vmul.f32 0.2, %v734_v19  ;;  %v719_v26 = vadd.f32 %v1286_v30, %v683_v23  ;;  %641 = vst.msk [vmem:[#allocation2 + $0x28] sm:$0xff] %vm264_vm1, %v608_v15 }
  0xc4   : > { %v822_v28 = vsel %vm758_vm0, %v726_v16, %v790_v21  ;;  %vm743_vm3 = vcmp.ge.f32.partialorder %v711_v22, 0.0  ;;  %v775_v29 = vmul.f32 0.2, %v711_v22  ;;  %649 = vst.msk [vmem:[#allocation2 + $0x68] sm:$0xff] %vm264_vm1, %v616_v18  ;;  %v575_v31 = vpop.f32.mrf.mxu2  ;;  %v595_v32 = vpop.f32.mrf.mxu3  ;;  %v328_v21 = vld [vmem:[#allocation2 + $0xf8] sm:$0xff] }
  0xc5   : > { %854 = vst.msk [vmem:[%s1297_s5 + $0x98] sm:$0xff] %vm264_vm1, %v822_v28  ;;  %v830_v34 = vsel %vm766_vm2, %v734_v19, %v798_v25  ;;  %vm751_vm4 = vcmp.ge.f32.partialorder %v719_v26, 0.0  ;;  %v783_v35 = vmul.f32 0.2, %v719_v26  ;;  %v624_v36 = vadd.f32 %v575_v31, %v318_v24  ;;  %v538_v37 = vpop.f32.mrf.mxu0  ;;  %v558_v39 = vpop.f32.mrf.mxu1 }
  0xc6   : > { %862 = vst.msk [vmem:[%s1297_s5 + $0xd8] sm:$0xff] %vm264_vm1, %v830_v34  ;;  %v807_v40 = vsel %vm743_vm3, %v711_v22, %v775_v29  ;;  %v632_v41 = vadd.f32 %v595_v32, %v326_v27  ;;  %v609_v43 = vadd.f32 %v538_v37, %v303_v33  ;;  %v617_v45 = vadd.f32 %v558_v39, %v311_v38 }
  0xc7   : > { %839 = vst.msk [vmem:[%s1297_s5 + $0x20] sm:$0xff] %vm264_vm1, %v807_v40  ;;  %v815_v42 = vsel %vm751_vm4, %v719_v26, %v783_v35 }
  0xc8   : > { %847 = vst.msk [vmem:[%s1297_s5 + $0x60] sm:$0xff] %vm264_vm1, %v815_v42  ;;  %v691_v44 = vld [vmem:[#allocation2 + $0xa0] sm:$0xff] }
  0xc9   : > { %v727_v46 = vadd.f32 %v1286_v30, %v691_v44  ;;  %v699_v47 = vld [vmem:[#allocation2 + $0xe0] sm:$0xff]  ;;  %657 = vst.msk [vmem:[#allocation2 + $0xa8] sm:$0xff] %vm264_vm1, %v624_v36 }
  0xca   : > { %v735_v48 = vadd.f32 %v1286_v30, %v699_v47  ;;  %v676_v49 = vld [vmem:[#allocation2 + $0x28] sm:$0xff]  ;;  %665 = vst.msk [vmem:[#allocation2 + $0xe8] sm:$0xff] %vm264_vm1, %v632_v41 }
  0xcb   : > { %vm759_vm5 = vcmp.ge.f32.partialorder %v727_v46, 0.0  ;;  %v791_v50 = vmul.f32 0.2, %v727_v46  ;;  %v712_v51 = vadd.f32 %v1286_v30, %v676_v49  ;;  %v684_v52 = vld [vmem:[#allocation2 + $0x68] sm:$0xff]  ;;  %642 = vst.msk [vmem:[#allocation2 + $0x30] sm:$0xff] %vm264_vm1, %v609_v43 }
  0xcc   : > { %vm767_vm6 = vcmp.ge.f32.partialorder %v735_v48, 0.0  ;;  %v799_v54 = vmul.f32 0.2, %v735_v48  ;;  %v720_v55 = vadd.f32 %v1286_v30, %v684_v52  ;;  %650 = vst.msk [vmem:[#allocation2 + $0x70] sm:$0xff] %vm264_vm1, %v617_v45  ;;  %v578_v56 = vpop.f32.mrf.mxu2  ;;  %v598_v58 = vpop.f32.mrf.mxu3 }
  0xcd   : > { %v823_v59 = vsel %vm759_vm5, %v727_v46, %v791_v50  ;;  %vm744_vm7 = vcmp.ge.f32.partialorder %v712_v51, 0.0  ;;  %v776_v60 = vmul.f32 0.2, %v712_v51  ;;  %v540_v62 = vpop.f32.mrf.mxu0  ;;  %v625_v1 = vadd.f32 %v578_v56, %v319_v53  ;;  %v560_v3 = vpop.f32.mrf.mxu1 }
  0xce   : > { %855 = vst.msk [vmem:[%s1297_s5 + $0xa0] sm:$0xff] %vm264_vm1, %v823_v59  ;;  %v831_v63 = vsel %vm767_vm6, %v735_v48, %v799_v54  ;;  %vm752_vm8 = vcmp.ge.f32.partialorder %v720_v55, 0.0  ;;  %v784_v0 = vmul.f32 0.2, %v720_v55  ;;  %v633_v5 = vadd.f32 %v598_v58, %v327_v57 }
  0xcf   : > { %863 = vst.msk [vmem:[%s1297_s5 + $0xe0] sm:$0xff] %vm264_vm1, %v831_v63  ;;  %v808_v4 = vsel %vm744_vm7, %v712_v51, %v776_v60  ;;  %v610_v8 = vadd.f32 %v540_v62, %v304_v61  ;;  %v618_v11 = vadd.f32 %v560_v3, %v312_v2 }
  0xd0   : > { %840 = vst.msk [vmem:[%s1297_s5 + $0x28] sm:$0xff] %vm264_vm1, %v808_v4  ;;  %v816_v6 = vsel %vm752_vm8, %v720_v55, %v784_v0  ;;  %v692_v7 = vld [vmem:[#allocation2 + $0xa8] sm:$0xff] }
  0xd1   : > { %848 = vst.msk [vmem:[%s1297_s5 + $0x68] sm:$0xff] %vm264_vm1, %v816_v6  ;;  %v728_v9 = vadd.f32 %v1286_v30, %v692_v7  ;;  %v700_v10 = vld [vmem:[#allocation2 + $0xe8] sm:$0xff] }
  0xd2   : > { %v736_v12 = vadd.f32 %v1286_v30, %v700_v10  ;;  %v677_v13 = vld [vmem:[#allocation2 + $0x30] sm:$0xff]  ;;  %658 = vst.msk [vmem:[#allocation2 + $0xb0] sm:$0xff] %vm264_vm1, %v625_v1 }
  0xd3   : > { %vm760_vm9 = vcmp.ge.f32.partialorder %v728_v9, 0.0  ;;  %v792_v14 = vmul.f32 0.2, %v728_v9  ;;  %v713_v15 = vadd.f32 %v1286_v30, %v677_v13  ;;  %v685_v16 = vld [vmem:[#allocation2 + $0x70] sm:$0xff]  ;;  %666 = vst.msk [vmem:[#allocation2 + $0xf0] sm:$0xff] %vm264_vm1, %v633_v5 }
  0xd4   : > { %vm768_vm10 = vcmp.ge.f32.partialorder %v736_v12, 0.0  ;;  %v800_v18 = vmul.f32 0.2, %v736_v12  ;;  %v721_v19 = vadd.f32 %v1286_v30, %v685_v16  ;;  %643 = vst.msk [vmem:[#allocation2 + $0x38] sm:$0xff] %vm264_vm1, %v610_v8  ;;  %v580_v20 = vpop.f32.mrf.mxu2  ;;  %v600_v22 = vpop.f32.mrf.mxu3 }
  0xd5   : > { %v824_v23 = vsel %vm760_vm9, %v728_v9, %v792_v14  ;;  %vm745_vm11 = vcmp.ge.f32.partialorder %v713_v15, 0.0  ;;  %v777_v24 = vmul.f32 0.2, %v713_v15  ;;  %651 = vst.msk [vmem:[#allocation2 + $0x78] sm:$0xff] %vm264_vm1, %v618_v11  ;;  %v626_v27 = vadd.f32 %v580_v20, %v320_v17 }
  0xd6   : > { %856 = vst.msk [vmem:[%s1297_s5 + $0xa8] sm:$0xff] %vm264_vm1, %v824_v23  ;;  %v832_v25 = vsel %vm768_vm10, %v736_v12, %v800_v18  ;;  %vm753_vm12 = vcmp.ge.f32.partialorder %v721_v19, 0.0  ;;  %v785_v26 = vmul.f32 0.2, %v721_v19  ;;  %v634_v29 = vadd.f32 %v600_v22, %v328_v21 }
  0xd7   : > { %864 = vst.msk [vmem:[%s1297_s5 + $0xe8] sm:$0xff] %vm264_vm1, %v832_v25  ;;  %v809_v28 = vsel %vm745_vm11, %v713_v15, %v777_v24 }
  0xd8   : > { %841 = vst.msk [vmem:[%s1297_s5 + $0x30] sm:$0xff] %vm264_vm1, %v809_v28  ;;  %v817_v31 = vsel %vm753_vm12, %v721_v19, %v785_v26 }
  0xd9   : > { %849 = vst.msk [vmem:[%s1297_s5 + $0x70] sm:$0xff] %vm264_vm1, %v817_v31  ;;  %v693_v32 = vld [vmem:[#allocation2 + $0xb0] sm:$0xff] }
  0xda   : > { %v729_v33 = vadd.f32 %v1286_v30, %v693_v32  ;;  %v701_v34 = vld [vmem:[#allocation2 + $0xf0] sm:$0xff]  ;;  %659 = vst.msk [vmem:[#allocation2 + $0xb8] sm:$0xff] %vm264_vm1, %v626_v27 }
  0xdb   : > { %v737_v35 = vadd.f32 %v1286_v30, %v701_v34  ;;  %v678_v36 = vld [vmem:[#allocation2 + $0x38] sm:$0xff]  ;;  %667 = vst.msk [vmem:[#allocation2 + $0xf8] sm:$0xff] %vm264_vm1, %v634_v29 }
  0xdc   : > { %vm761_vm13 = vcmp.ge.f32.partialorder %v729_v33, 0.0  ;;  %v793_v37 = vmul.f32 0.2, %v729_v33  ;;  %v714_v38 = vadd.f32 %v1286_v30, %v678_v36  ;;  %v686_v39 = vld [vmem:[#allocation2 + $0x78] sm:$0xff] }
  0xdd   : > { %vm769_vm14 = vcmp.ge.f32.partialorder %v737_v35, 0.0  ;;  %v801_v40 = vmul.f32 0.2, %v737_v35  ;;  %v722_v41 = vadd.f32 %v1286_v30, %v686_v39 }
  0xde   : > { %v825_v42 = vsel %vm761_vm13, %v729_v33, %v793_v37  ;;  %vm746_vm15 = vcmp.ge.f32.partialorder %v714_v38, 0.0  ;;  %v778_v43 = vmul.f32 0.2, %v714_v38 }
  0xdf   : > { %857 = vst.msk [vmem:[%s1297_s5 + $0xb0] sm:$0xff] %vm264_vm1, %v825_v42  ;;  %v833_v44 = vsel %vm769_vm14, %v737_v35, %v801_v40  ;;  %vm754_vm0 = vcmp.ge.f32.partialorder %v722_v41, 0.0  ;;  %v786_v45 = vmul.f32 0.2, %v722_v41 }
  0xe0   : > { %865 = vst.msk [vmem:[%s1297_s5 + $0xf0] sm:$0xff] %vm264_vm1, %v833_v44  ;;  %v810_v46 = vsel %vm746_vm15, %v714_v38, %v778_v43 }
  0xe1   : > { %842 = vst.msk [vmem:[%s1297_s5 + $0x38] sm:$0xff] %vm264_vm1, %v810_v46  ;;  %v818_v47 = vsel %vm754_vm0, %v722_v41, %v786_v45  ;;  %v694_v48 = vld [vmem:[#allocation2 + $0xb8] sm:$0xff] }
  0xe2   : > { %850 = vst.msk [vmem:[%s1297_s5 + $0x78] sm:$0xff] %vm264_vm1, %v818_v47  ;;  %v730_v49 = vadd.f32 %v1286_v30, %v694_v48  ;;  %v702_v50 = vld [vmem:[#allocation2 + $0xf8] sm:$0xff] }
  0xe3   : > { %v738_v51 = vadd.f32 %v1286_v30, %v702_v50 }
  0xe4   : > { %vm762_vm2 = vcmp.ge.f32.partialorder %v730_v49, 0.0  ;;  %v794_v52 = vmul.f32 0.2, %v730_v49 }
  0xe5   : > { %vm770_vm3 = vcmp.ge.f32.partialorder %v738_v51, 0.0  ;;  %v802_v53 = vmul.f32 0.2, %v738_v51 }
  0xe6   : > { %v826_v54 = vsel %vm762_vm2, %v730_v49, %v794_v52 }
  0xe7   : > { %858 = vst.msk [vmem:[%s1297_s5 + $0xb8] sm:$0xff] %vm264_vm1, %v826_v54  ;;  %v834_v55 = vsel %vm770_vm3, %v738_v51, %v802_v53 }
  0xe8   : > { %866 = vst.msk [vmem:[%s1297_s5 + $0xf8] sm:$0xff] %vm264_vm1, %v834_v55 }
  0xe9 PF: > { %s13_s14 = sadd.s32 1, %s1159_s14   ;;  %s1433_s12 = smov %s1155_s13 }
  0xea   : > { %p10_p5 = scmp.ge.s32.totalorder %s13_s14, 4   ;;  %s1434_s13 = smov %s1436_s15 }
  0xec   :  { %12 = sbr.rel (!%p10_p5) target bundleno = 2 (0x2), region = 76 }

// kernel: discriminator_forward.9
= control target key start
LH: loop header
LB: loop body
LE: loop exit
PB: predicated region body
PF: predicated region fallthrough
CT: control target
= control target key end

     0   :  { %s1575_s9 = smov 0   ;;  %s1577_s10 = smov 0   ;;  %s1858_s0 = inlined_call_operand.vmem [shape: bf16[128,1024], index: 0, kind: input, shape index: {}]   ;;  %s1859_s1 = inlined_call_operand.vmem [shape: bf16[1024,128], index: 1, kind: input, shape index: {}]   ;;  %s1860_s2 = inlined_call_operand.vmem [shape: f32[128,128], index: 2, kind: output, shape index: {}]  }
   0x1   :  { %s1579_s11 = smov 0   ;;  %s1581_s12 = smov 0  }
   0x2   :  { %s1583_s13 = smov 0  }
   0x3 LB: > { %s24_s14 = sadd.s32 1, %s1553_s12  ;;  %p47_p1 = scmp.ne.s32.totalorder %s1545_s10, %s1541_s9  ;;  %s1557_s13 = sphi %s1583_s13, %s12_s13   ;;  %s1553_s12 = sphi %s1581_s12, %s1864_s12   ;;  %s1549_s11 = sphi %s1579_s11, %s1863_s11   ;;  %s1545_s10 = sphi %s1577_s10, %s1862_s10   ;;  %s1541_s9 = sphi %s1575_s9, %s1861_s9  }
   0x4   : > { %p25_p0 = scmp.ge.s32.totalorder %s24_s14, 2  ;;  %p48_p2 = scmp.eq.s32.totalorder %s1557_s13, 0 }
   0x5   : > { %s40_s16 = sadd.s32 1, %s1545_s10  ;;  %p1143_p5 = scmp.ge.s32.totalorder %s1557_s13, 2 }
   0x6   : > { %s1866_s14 = smov (%p25_p0, %s24_s14), 0  ;;  %p49_p3 = por %p48_p2, %p47_p1 }
   0x7   : > { %s36_s15 = ssub.s32 %s1553_s12, %s1866_s14  ;;  %129 = sbr.rel (%p1143_p5) target bundleno = 48 (0x30), region = 16 }
   0x8   : > { %p38_p4 = scmp.eq.s32.totalorder %s36_s15, 0 }
   0xa   : > { %s1610_s17 = scalar_select %p38_p4, %s1545_s10, %s40_s16  }
   0xc   : > { %132 = sbr.rel (!%p49_p3) target bundleno = 48 (0x30), region = 20  ;;  %s134_s18 = sand.u32 (%p49_p3), 1, %s1545_s10  }
   0xd   : > { %s1413_s19 = sshll.u32 (%p49_p3), %s1553_s12, 4  ;;  %s1144_s20 = sshll.u32 (%p49_p3), %s134_s18, 8 }
   0xe   : > { %s1618_s23 = scalar_lea.vmem (%p49_p3), %s1858_s0, %s1413_s19  ;;  %s1623_s24 = scalar_lea.vmem (%p49_p3), [#allocation3], %s1144_s20 }
   0xf   : > { %v155_v0 = vld [vmem:[%s1618_s23] sm:$0xff] (%p49_p3)  ;;  %v157_v1 = vld [vmem:[%s1618_s23 + $0x8] sm:$0xff] (%p49_p3) }
  0x10   : > { %v159_v2 = vld [vmem:[%s1618_s23 + $0x20] sm:$0xff] (%p49_p3)  ;;  %156 = vst [vmem:[%s1623_s24] sm:$0xff] (%p49_p3), %v155_v0  ;;  %v161_v3 = vld [vmem:[%s1618_s23 + $0x28] sm:$0xff] (%p49_p3) }
  0x11   : > { %158 = vst [vmem:[%s1623_s24 + $0x8] sm:$0xff] %v157_v1  ;;  %v163_v4 = vld [vmem:[%s1618_s23 + $0x40] sm:$0xff]  ;;  %v165_v5 = vld [vmem:[%s1618_s23 + $0x48] sm:$0xff] }
  0x12   : > { %160 = vst [vmem:[%s1623_s24 + $0x10] sm:$0xff] %v159_v2  ;;  %v167_v6 = vld [vmem:[%s1618_s23 + $0x60] sm:$0xff]  ;;  %v169_v7 = vld [vmem:[%s1618_s23 + $0x68] sm:$0xff] }
  0x13   : > { %162 = vst [vmem:[%s1623_s24 + $0x18] sm:$0xff] %v161_v3  ;;  %v171_v8 = vld [vmem:[%s1618_s23 + $0x80] sm:$0xff]  ;;  %v173_v9 = vld [vmem:[%s1618_s23 + $0x88] sm:$0xff] }
  0x14   : > { %164 = vst [vmem:[%s1623_s24 + $0x20] sm:$0xff] %v163_v4  ;;  %v175_v10 = vld [vmem:[%s1618_s23 + $0xa0] sm:$0xff]  ;;  %v177_v11 = vld [vmem:[%s1618_s23 + $0xa8] sm:$0xff] }
  0x15   : > { %166 = vst [vmem:[%s1623_s24 + $0x28] sm:$0xff] %v165_v5  ;;  %v179_v12 = vld [vmem:[%s1618_s23 + $0xc0] sm:$0xff]  ;;  %v181_v13 = vld [vmem:[%s1618_s23 + $0xc8] sm:$0xff] }
  0x16   : > { %168 = vst [vmem:[%s1623_s24 + $0x30] sm:$0xff] %v167_v6  ;;  %v183_v14 = vld [vmem:[%s1618_s23 + $0xe0] sm:$0xff]  ;;  %v185_v15 = vld [vmem:[%s1618_s23 + $0xe8] sm:$0xff] }
  0x17   : > { %170 = vst [vmem:[%s1623_s24 + $0x38] sm:$0xff] %v169_v7  ;;  %v187_v16 = vld [vmem:[%s1618_s23 + $0x100] sm:$0xff]  ;;  %v189_v17 = vld [vmem:[%s1618_s23 + $0x108] sm:$0xff] }
  0x18   : > { %172 = vst [vmem:[%s1623_s24 + $0x40] sm:$0xff] %v171_v8  ;;  %v191_v18 = vld [vmem:[%s1618_s23 + $0x120] sm:$0xff]  ;;  %v193_v19 = vld [vmem:[%s1618_s23 + $0x128] sm:$0xff] }
  0x19   : > { %174 = vst [vmem:[%s1623_s24 + $0x48] sm:$0xff] %v173_v9  ;;  %v195_v20 = vld [vmem:[%s1618_s23 + $0x140] sm:$0xff]  ;;  %v197_v21 = vld [vmem:[%s1618_s23 + $0x148] sm:$0xff] }
  0x1a   : > { %176 = vst [vmem:[%s1623_s24 + $0x50] sm:$0xff] %v175_v10  ;;  %v199_v22 = vld [vmem:[%s1618_s23 + $0x160] sm:$0xff]  ;;  %v201_v23 = vld [vmem:[%s1618_s23 + $0x168] sm:$0xff] }
  0x1b   : > { %178 = vst [vmem:[%s1623_s24 + $0x58] sm:$0xff] %v177_v11  ;;  %v203_v24 = vld [vmem:[%s1618_s23 + $0x180] sm:$0xff]  ;;  %v205_v25 = vld [vmem:[%s1618_s23 + $0x188] sm:$0xff] }
  0x1c   : > { %180 = vst [vmem:[%s1623_s24 + $0x60] sm:$0xff] %v179_v12  ;;  %v207_v26 = vld [vmem:[%s1618_s23 + $0x1a0] sm:$0xff]  ;;  %v209_v27 = vld [vmem:[%s1618_s23 + $0x1a8] sm:$0xff] }
  0x1d   : > { %182 = vst [vmem:[%s1623_s24 + $0x68] sm:$0xff] %v181_v13  ;;  %v211_v28 = vld [vmem:[%s1618_s23 + $0x1c0] sm:$0xff]  ;;  %v213_v29 = vld [vmem:[%s1618_s23 + $0x1c8] sm:$0xff] }
  0x1e   : > { %184 = vst [vmem:[%s1623_s24 + $0x70] sm:$0xff] %v183_v14  ;;  %v215_v30 = vld [vmem:[%s1618_s23 + $0x1e0] sm:$0xff]  ;;  %v217_v31 = vld [vmem:[%s1618_s23 + $0x1e8] sm:$0xff] }
  0x1f   : > { %186 = vst [vmem:[%s1623_s24 + $0x78] sm:$0xff] %v185_v15 }
  0x20   : > { %188 = vst [vmem:[%s1623_s24 + $0x80] sm:$0xff] %v187_v16 }
  0x21   : > { %190 = vst [vmem:[%s1623_s24 + $0x88] sm:$0xff] %v189_v17 }
  0x22   : > { %192 = vst [vmem:[%s1623_s24 + $0x90] sm:$0xff] %v191_v18 }
  0x23   : > { %194 = vst [vmem:[%s1623_s24 + $0x98] sm:$0xff] %v193_v19 }
  0x24   : > { %196 = vst [vmem:[%s1623_s24 + $0xa0] sm:$0xff] %v195_v20 }
  0x25   : > { %198 = vst [vmem:[%s1623_s24 + $0xa8] sm:$0xff] %v197_v21 }
  0x26   : > { %200 = vst [vmem:[%s1623_s24 + $0xb0] sm:$0xff] %v199_v22 }
  0x27   : > { %202 = vst [vmem:[%s1623_s24 + $0xb8] sm:$0xff] %v201_v23 }
  0x28   : > { %204 = vst [vmem:[%s1623_s24 + $0xc0] sm:$0xff] %v203_v24 }
  0x29   : > { %206 = vst [vmem:[%s1623_s24 + $0xc8] sm:$0xff] %v205_v25 }
  0x2a   : > { %208 = vst [vmem:[%s1623_s24 + $0xd0] sm:$0xff] %v207_v26 }
  0x2b   : > { %210 = vst [vmem:[%s1623_s24 + $0xd8] sm:$0xff] %v209_v27 }
  0x2c   : > { %212 = vst [vmem:[%s1623_s24 + $0xe0] sm:$0xff] %v211_v28 }
  0x2d   : > { %214 = vst [vmem:[%s1623_s24 + $0xe8] sm:$0xff] %v213_v29 }
  0x2e   : > { %216 = vst [vmem:[%s1623_s24 + $0xf0] sm:$0xff] %v215_v30 }
  0x2f   : > { %218 = vst [vmem:[%s1623_s24 + $0xf8] sm:$0xff] %v217_v31 }
  0x30 PF: > { %p1147_p6 = scmp.ge.s32.totalorder %s1557_s13, 1  ;;  %p235_p7 = scmp.lt.s32.totalorder %s1557_s13, 3 }
  0x32   : > { %p236_p8 = pnand %p1147_p6, %p235_p7 }
  0x33   : > { %s242_s25 = sand.u32 (!%p236_p8), 1, %s1541_s9   ;;  %s1149_s26 = sshll.u32 (!%p236_p8), %s1549_s11, 6 }
  0x34   : > { %239 = sbr.rel (%p236_p8) target bundleno = 389 (0x185), region = 47  ;;  %s1148_s27 = sshll.u32 (!%p236_p8), %s242_s25, 8 }
  0x35   : > { %p277_p9 = scmp.lt.s32.totalorder (!%p236_p8), %s1149_s26, 127  ;;  %s1695_s4 = scalar_lea.vmem (!%p236_p8), [#allocation3], %s1148_s27 }
  0x36   : > { %p1151_p10 = scmp.ne.s32.totalorder (!%p236_p8), %s1549_s11, 0 }
  0x39   : > { %s1868_s26 = smov (!%p277_p9, %s1149_s26), 127  ;;  %297 = sbr.rel (%p1151_p10) target bundleno = 79 (0x4f), region = 55 }
  0x3a   : > { %s1150_s28 = sshll.u32 %s1868_s26, 2 }
  0x3b   : > { %s1693_s3 = scalar_lea.vmem %s1859_s1, %s1150_s28 }
  0x3e   : > { %v1559_v32 = vmov 0.0  }
  0x3f   : > { %298 = vst [vmem:[#allocation2 + $0x30] sm:$0xff] %v1559_v32 }
  0x40   : > { %299 = vst [vmem:[#allocation2] sm:$0xff] %v1559_v32 }
  0x41   : > { %300 = vst [vmem:[#allocation2 + $0x58] sm:$0xff] %v1559_v32 }
  0x42   : > { %301 = vst [vmem:[#allocation2 + $0x18] sm:$0xff] %v1559_v32 }
  0x43   : > { %302 = vst [vmem:[#allocation2 + $0x50] sm:$0xff] %v1559_v32 }
  0x44   : > { %303 = vst [vmem:[#allocation2 + $0x68] sm:$0xff] %v1559_v32 }
  0x45   : > { %304 = vst [vmem:[#allocation2 + $0x8] sm:$0xff] %v1559_v32 }
  0x46   : > { %305 = vst [vmem:[#allocation2 + $0x48] sm:$0xff] %v1559_v32 }
  0x47   : > { %306 = vst [vmem:[#allocation2 + $0x40] sm:$0xff] %v1559_v32 }
  0x48   : > { %307 = vst [vmem:[#allocation2 + $0x20] sm:$0xff] %v1559_v32 }
  0x49   : > { %308 = vst [vmem:[#allocation2 + $0x10] sm:$0xff] %v1559_v32 }
  0x4a   : > { %309 = vst [vmem:[#allocation2 + $0x38] sm:$0xff] %v1559_v32 }
  0x4b   : > { %310 = vst [vmem:[#allocation2 + $0x60] sm:$0xff] %v1559_v32 }
  0x4c   : > { %311 = vst [vmem:[#allocation2 + $0x70] sm:$0xff] %v1559_v32 }
  0x4d   : > { %312 = vst [vmem:[#allocation2 + $0x78] sm:$0xff] %v1559_v32 }
  0x4e   : > { %313 = vst [vmem:[#allocation2 + $0x28] sm:$0xff] %v1559_v32 }
  0x4f PF: > { %v1453_v33 = vld [vmem:[%s1693_s3 + $0x38] sm:$0xff]  ;;  %v1452_v37 = vld [vmem:[%s1693_s3 + $0x30] sm:$0xff]  ;;  %v1451_v41 = vld [vmem:[%s1693_s3 + $0x28] sm:$0xff]  ;;  %p1408_p11 = scmp.ne.s32.totalorder %s1549_s11, 1 }
  0x50   : > { %v1461_v34 = vld [vmem:[%s1693_s3 + $0x78] sm:$0xff]  ;;  %778 = vmatpush.bf16.msra.mxu0 %v1453_v33  ;;  %v1460_v38 = vld [vmem:[%s1693_s3 + $0x70] sm:$0xff]  ;;  %v1459_v42 = vld [vmem:[%s1693_s3 + $0x68] sm:$0xff] }
  0x51   : > { %v1469_v35 = vld [vmem:[%s1693_s3 + $0xb8] sm:$0xff]  ;;  %827 = vmatpush.bf16.msra.mxu1 %v1461_v34  ;;  %v1468_v39 = vld [vmem:[%s1693_s3 + $0xb0] sm:$0xff]  ;;  %v1467_v43 = vld [vmem:[%s1693_s3 + $0xa8] sm:$0xff] }
  0x52   : > { %v1477_v36 = vld [vmem:[%s1693_s3 + $0xf8] sm:$0xff]  ;;  %876 = vmatpush.bf16.msra.mxu2 %v1469_v35  ;;  %v1476_v40 = vld [vmem:[%s1693_s3 + $0xf0] sm:$0xff]  ;;  %v1475_v44 = vld [vmem:[%s1693_s3 + $0xe8] sm:$0xff] }
  0x53   : > { %925 = vmatpush.bf16.msra.mxu3 %v1477_v36  ;;  %v1450_v45 = vld [vmem:[%s1693_s3 + $0x20] sm:$0xff]  ;;  %v1449_v49 = vld [vmem:[%s1693_s3 + $0x18] sm:$0xff]  ;;  %v1448_v53 = vld [vmem:[%s1693_s3 + $0x10] sm:$0xff] }
  0x54   : > { %779 = vmatpush.bf16.msra.mxu0 %v1452_v37  ;;  %v1458_v46 = vld [vmem:[%s1693_s3 + $0x60] sm:$0xff]  ;;  %v1457_v50 = vld [vmem:[%s1693_s3 + $0x58] sm:$0xff]  ;;  %v1456_v54 = vld [vmem:[%s1693_s3 + $0x50] sm:$0xff] }
  0x55   : > { %828 = vmatpush.bf16.msra.mxu1 %v1460_v38  ;;  %v1466_v47 = vld [vmem:[%s1693_s3 + $0xa0] sm:$0xff]  ;;  %v1465_v51 = vld [vmem:[%s1693_s3 + $0x98] sm:$0xff]  ;;  %v1464_v55 = vld [vmem:[%s1693_s3 + $0x90] sm:$0xff] }
  0x56   : > { %877 = vmatpush.bf16.msra.mxu2 %v1468_v39  ;;  %v1474_v48 = vld [vmem:[%s1693_s3 + $0xe0] sm:$0xff]  ;;  %v1473_v52 = vld [vmem:[%s1693_s3 + $0xd8] sm:$0xff]  ;;  %v1472_v56 = vld [vmem:[%s1693_s3 + $0xd0] sm:$0xff] }
  0x57   : > { %926 = vmatpush.bf16.msra.mxu3 %v1476_v40  ;;  %v1447_v57 = vld [vmem:[%s1693_s3 + $0x8] sm:$0xff]  ;;  %v1446_v61 = vld [vmem:[%s1693_s3] sm:$0xff]  ;;  %v1416_v2 = vld [vmem:[%s1695_s4 + $0xc] sm:$0xf0] }
  0x58   : > { %780 = vmatpush.bf16.msra.mxu0 %v1451_v41  ;;  %v1455_v58 = vld [vmem:[%s1693_s3 + $0x48] sm:$0xff]  ;;  %v1454_v62 = vld [vmem:[%s1693_s3 + $0x40] sm:$0xff]  ;;  %v1156_v4 = vld [vmem:[%s1695_s4 + $0x10] sm:$0xf0] }
  0x59   : > { %829 = vmatpush.bf16.msra.mxu1 %v1459_v42  ;;  %v1463_v59 = vld [vmem:[%s1693_s3 + $0x88] sm:$0xff]  ;;  %v1462_v63 = vld [vmem:[%s1693_s3 + $0x80] sm:$0xff]  ;;  %v1417_v6 = vld [vmem:[%s1695_s4 + $0x14] sm:$0xf0] }
  0x5a   : > { %878 = vmatpush.bf16.msra.mxu2 %v1467_v43  ;;  %v1471_v60 = vld [vmem:[%s1693_s3 + $0xc8] sm:$0xff]  ;;  %v1470_v0 = vld [vmem:[%s1693_s3 + $0xc0] sm:$0xff]  ;;  %v1164_v8 = vld [vmem:[%s1695_s4 + $0x18] sm:$0xf0] }
  0x5b   : > { %927 = vmatpush.bf16.msra.mxu3 %v1475_v44  ;;  %v1154_v1 = vld [vmem:[%s1695_s4] sm:$0xf]  ;;  %v1414_v3 = vld [vmem:[%s1695_s4 + $0x4] sm:$0xf]  ;;  %v1162_v5 = vld [vmem:[%s1695_s4 + $0x8] sm:$0xf] }
  0x5c   : > { %781 = vmatpush.bf16.msra.mxu0 %v1450_v45  ;;  %v1415_v7 = vld [vmem:[%s1695_s4 + $0xc] sm:$0xf]  ;;  %v1155_v9 = vor.u32 %v1416_v2, %v1154_v1  ;;  %v1159_v10 = vor.u32 %v1414_v3, %v1156_v4  ;;  %v1163_v11 = vor.u32 %v1417_v6, %v1162_v5  ;;  %v1170_v13 = vld [vmem:[%s1695_s4 + $0x20] sm:$0xf]  ;;  %v1420_v14 = vld [vmem:[%s1695_s4 + $0x2c] sm:$0xf0] }
  0x5d   : > { %830 = vmatpush.bf16.msra.mxu1 %v1458_v46  ;;  %v1167_v12 = vor.u32 %v1415_v7, %v1164_v8  ;;  %v1418_v15 = vld [vmem:[%s1695_s4 + $0x24] sm:$0xf]  ;;  %v1172_v16 = vld [vmem:[%s1695_s4 + $0x30] sm:$0xf0]  ;;  %v1178_v17 = vld [vmem:[%s1695_s4 + $0x28] sm:$0xf]  ;;  %v1171_v21 = vor.u32 %v1420_v14, %v1170_v13 }
  0x5e   : > { %879 = vmatpush.bf16.msra.mxu2 %v1466_v47  ;;  %v1421_v18 = vld [vmem:[%s1695_s4 + $0x34] sm:$0xf0]  ;;  %v1419_v19 = vld [vmem:[%s1695_s4 + $0x2c] sm:$0xf]  ;;  %v1180_v20 = vld [vmem:[%s1695_s4 + $0x38] sm:$0xf0]  ;;  %v1175_v22 = vor.u32 %v1418_v15, %v1172_v16 }
  0x5f   : > { %928 = vmatpush.bf16.msra.mxu3 %v1474_v48  ;;  %v1179_v23 = vor.u32 %v1421_v18, %v1178_v17  ;;  %v1183_v24 = vor.u32 %v1419_v19, %v1180_v20  ;;  %v1186_v25 = vld [vmem:[%s1695_s4 + $0x40] sm:$0xf]  ;;  %v1424_v26 = vld [vmem:[%s1695_s4 + $0x4c] sm:$0xf0]  ;;  %v1422_v27 = vld [vmem:[%s1695_s4 + $0x44] sm:$0xf] }
  0x60   : > { %782 = vmatpush.bf16.msra.mxu0 %v1449_v49  ;;  %v1188_v28 = vld [vmem:[%s1695_s4 + $0x50] sm:$0xf0]  ;;  %v1194_v29 = vld [vmem:[%s1695_s4 + $0x48] sm:$0xf]  ;;  %v1425_v30 = vld [vmem:[%s1695_s4 + $0x54] sm:$0xf0]  ;;  %v1187_v33 = vor.u32 %v1424_v26, %v1186_v25 }
  0x61   : > { %831 = vmatpush.bf16.msra.mxu1 %v1457_v50  ;;  %v1423_v31 = vld [vmem:[%s1695_s4 + $0x4c] sm:$0xf]  ;;  %v1196_v32 = vld [vmem:[%s1695_s4 + $0x58] sm:$0xf0]  ;;  %v1191_v34 = vor.u32 %v1422_v27, %v1188_v28  ;;  %v1195_v35 = vor.u32 %v1425_v30, %v1194_v29  ;;  %v1202_v37 = vld [vmem:[%s1695_s4 + $0x60] sm:$0xf] }
  0x62   : > { %880 = vmatpush.bf16.msra.mxu2 %v1465_v51  ;;  %v1199_v36 = vor.u32 %v1423_v31, %v1196_v32  ;;  %v1428_v38 = vld [vmem:[%s1695_s4 + $0x6c] sm:$0xf0]  ;;  %v1426_v39 = vld [vmem:[%s1695_s4 + $0x64] sm:$0xf]  ;;  %v1204_v40 = vld [vmem:[%s1695_s4 + $0x70] sm:$0xf0] }
  0x63   : > { %929 = vmatpush.bf16.msra.mxu3 %v1473_v52  ;;  %v1210_v41 = vld [vmem:[%s1695_s4 + $0x68] sm:$0xf]  ;;  %v1429_v42 = vld [vmem:[%s1695_s4 + $0x74] sm:$0xf0]  ;;  %v1427_v43 = vld [vmem:[%s1695_s4 + $0x6c] sm:$0xf]  ;;  %v1203_v45 = vor.u32 %v1428_v38, %v1202_v37  ;;  %v1207_v46 = vor.u32 %v1426_v39, %v1204_v40 }
  0x64   : > { %783 = vmatpush.bf16.msra.mxu0 %v1448_v53  ;;  %v1212_v44 = vld [vmem:[%s1695_s4 + $0x78] sm:$0xf0]  ;;  %v1211_v47 = vor.u32 %v1429_v42, %v1210_v41  ;;  %v1218_v49 = vld [vmem:[%s1695_s4 + $0x80] sm:$0xf]  ;;  %v1432_v50 = vld [vmem:[%s1695_s4 + $0x8c] sm:$0xf0] }
  0x65   : > { %832 = vmatpush.bf16.msra.mxu1 %v1456_v54  ;;  %v1215_v48 = vor.u32 %v1427_v43, %v1212_v44  ;;  %v1430_v51 = vld [vmem:[%s1695_s4 + $0x84] sm:$0xf]  ;;  %v1220_v52 = vld [vmem:[%s1695_s4 + $0x90] sm:$0xf0]  ;;  %v1226_v53 = vld [vmem:[%s1695_s4 + $0x88] sm:$0xf] }
  0x66   : > { %881 = vmatpush.bf16.msra.mxu2 %v1464_v55  ;;  %v1433_v54 = vld [vmem:[%s1695_s4 + $0x94] sm:$0xf0]  ;;  %v1431_v55 = vld [vmem:[%s1695_s4 + $0x8c] sm:$0xf]  ;;  %v1242_v1 = vld [vmem:[%s1695_s4 + $0xa8] sm:$0xf] }
  0x67   : > { %930 = vmatpush.bf16.msra.mxu3 %v1472_v56  ;;  %v1228_v56 = vld [vmem:[%s1695_s4 + $0x98] sm:$0xf0]  ;;  %v1437_v2 = vld [vmem:[%s1695_s4 + $0xb4] sm:$0xf0]  ;;  %v1435_v3 = vld [vmem:[%s1695_s4 + $0xac] sm:$0xf] }
  0x68   : > { %784 = vmatpush.bf16.msra.mxu0 %v1447_v57  ;;  %v1219_v57 = vor.u32 %v1432_v50, %v1218_v49  ;;  %v1244_v4 = vld [vmem:[%s1695_s4 + $0xb8] sm:$0xf0]  ;;  %v1243_v7 = vor.u32 %v1437_v2, %v1242_v1  ;;  %v1258_v13 = vld [vmem:[%s1695_s4 + $0xc8] sm:$0xf]  ;;  %v1441_v14 = vld [vmem:[%s1695_s4 + $0xd4] sm:$0xf0] }
  0x69   : > { %833 = vmatpush.bf16.msra.mxu1 %v1455_v58  ;;  %v1223_v58 = vor.u32 %v1430_v51, %v1220_v52  ;;  %v1247_v8 = vor.u32 %v1435_v3, %v1244_v4  ;;  %v1439_v15 = vld [vmem:[%s1695_s4 + $0xcc] sm:$0xf]  ;;  %v1260_v16 = vld [vmem:[%s1695_s4 + $0xd8] sm:$0xf0]  ;;  %v1259_v19 = vor.u32 %v1441_v14, %v1258_v13  ;;  %v1274_v25 = vld [vmem:[%s1695_s4 + $0xe8] sm:$0xf] }
  0x6a   : > { %882 = vmatpush.bf16.msra.mxu2 %v1463_v59  ;;  %v1227_v59 = vor.u32 %v1433_v54, %v1226_v53  ;;  %v1263_v20 = vor.u32 %v1439_v15, %v1260_v16  ;;  %v1445_v26 = vld [vmem:[%s1695_s4 + $0xf4] sm:$0xf0]  ;;  %v1443_v27 = vld [vmem:[%s1695_s4 + $0xec] sm:$0xf]  ;;  %v1276_v28 = vld [vmem:[%s1695_s4 + $0xf8] sm:$0xf0] }
  0x6b   : > { %931 = vmatpush.bf16.msra.mxu3 %v1471_v60  ;;  %v1231_v60 = vor.u32 %v1431_v55, %v1228_v56  ;;  %v1275_v31 = vor.u32 %v1445_v26, %v1274_v25  ;;  %v1279_v32 = vor.u32 %v1443_v27, %v1276_v28  ;;  %v314_v41 = vld [vmem:[#allocation2 + $0x30] sm:$0xff]  ;;  %v315_v50 = vld [vmem:[#allocation2] sm:$0xff]  ;;  %v317_v4 = vld [vmem:[#allocation2 + $0x18] sm:$0xff] }
  0x6c   : > { %785 = vmatpush.bf16.msra.mxu0 %v1446_v61  ;;  %v1234_v61 = vld [vmem:[%s1695_s4 + $0xa0] sm:$0xf]  ;;  %v318_v13 = vld [vmem:[#allocation2 + $0x50] sm:$0xff] }
  0x6d   : > { %834 = vmatpush.bf16.msra.mxu1 %v1454_v62  ;;  %v1436_v62 = vld [vmem:[%s1695_s4 + $0xac] sm:$0xf0] }
  0x6e   : > { %883 = vmatpush.bf16.msra.mxu2 %v1462_v63  ;;  %v1434_v63 = vld [vmem:[%s1695_s4 + $0xa4] sm:$0xf]  ;;  %v1235_v5 = vor.u32 %v1436_v62, %v1234_v61 }
  0x6f   : > { %932 = vmatpush.bf16.msra.mxu3 %v1470_v0  ;;  %786 = vmatmul.bf16.vlgmr.msra.gmra.mxu0 %v1155_v9  ;;  %v1236_v0 = vld [vmem:[%s1695_s4 + $0xb0] sm:$0xf0]  ;;  %v1250_v9 = vld [vmem:[%s1695_s4 + $0xc0] sm:$0xf] }
  0x70   : > { %835 = vmatmul.bf16.vlgmr.msra.gmra.mxu1 %v1159_v10  ;;  %v1239_v6 = vor.u32 %v1434_v63, %v1236_v0  ;;  %v1440_v10 = vld [vmem:[%s1695_s4 + $0xcc] sm:$0xf0] }
  0x71   : > { %884 = vmatmul.bf16.vlgmr.msra.gmra.mxu2 %v1163_v11  ;;  %v1438_v11 = vld [vmem:[%s1695_s4 + $0xc4] sm:$0xf]  ;;  %v1251_v17 = vor.u32 %v1440_v10, %v1250_v9 }
  0x72   : > { %933 = vmatmul.bf16.vlgmr.msra.gmra.mxu3 %v1167_v12  ;;  %v1252_v12 = vld [vmem:[%s1695_s4 + $0xd0] sm:$0xf0] }
  0x73   : > { %v1255_v18 = vor.u32 %v1438_v11, %v1252_v12 }
  0x7f   : > { %791 = vmatmul.bf16.gmra.mxu0 %v1171_v21  ;;  %v1266_v21 = vld [vmem:[%s1695_s4 + $0xe0] sm:$0xf] }
  0x80   : > { %840 = vmatmul.bf16.gmra.mxu1 %v1175_v22  ;;  %v1444_v22 = vld [vmem:[%s1695_s4 + $0xec] sm:$0xf0] }
  0x81   : > { %889 = vmatmul.bf16.gmra.mxu2 %v1179_v23  ;;  %v1442_v23 = vld [vmem:[%s1695_s4 + $0xe4] sm:$0xf]  ;;  %v1267_v29 = vor.u32 %v1444_v22, %v1266_v21  ;;  %v319_v22 = vld [vmem:[#allocation2 + $0x68] sm:$0xff] }
  0x82   : > { %938 = vmatmul.bf16.gmra.mxu3 %v1183_v24  ;;  %v1268_v24 = vld [vmem:[%s1695_s4 + $0xf0] sm:$0xf0] }
  0x83   : > { %v1271_v30 = vor.u32 %v1442_v23, %v1268_v24 }
  0x8f   : > { %796 = vmatmul.bf16.gmra.mxu0 %v1187_v33 }
  0x90   : > { %845 = vmatmul.bf16.gmra.mxu1 %v1191_v34 }
  0x91   : > { %894 = vmatmul.bf16.gmra.mxu2 %v1195_v35 }
  0x92   : > { %943 = vmatmul.bf16.gmra.mxu3 %v1199_v36 }
  0x9f   : > { %801 = vmatmul.bf16.gmra.mxu0 %v1203_v45 }
  0xa0   : > { %850 = vmatmul.bf16.gmra.mxu1 %v1207_v46 }
  0xa1   : > { %899 = vmatmul.bf16.gmra.mxu2 %v1211_v47 }
  0xa2   : > { %948 = vmatmul.bf16.gmra.mxu3 %v1215_v48 }
  0xaf   : > { %806 = vmatmul.bf16.gmra.mxu0 %v1219_v57 }
  0xb0   : > { %855 = vmatmul.bf16.gmra.mxu1 %v1223_v58 }
  0xb1   : > { %904 = vmatmul.bf16.gmra.mxu2 %v1227_v59  ;;  %v316_v59 = vld [vmem:[#allocation2 + $0x58] sm:$0xff] }
  0xb2   : > { %953 = vmatmul.bf16.gmra.mxu3 %v1231_v60 }
  0xbf   : > { %811 = vmatmul.bf16.gmra.mxu0 %v1235_v5 }
  0xc0   : > { %860 = vmatmul.bf16.gmra.mxu1 %v1239_v6 }
  0xc1   : > { %909 = vmatmul.bf16.gmra.mxu2 %v1243_v7 }
  0xc2   : > { %958 = vmatmul.bf16.gmra.mxu3 %v1247_v8 }
  0xcf   : > { %816 = vmatmul.bf16.gmra.mxu0 %v1251_v17 }
  0xd0   : > { %865 = vmatmul.bf16.gmra.mxu1 %v1255_v18 }
  0xd1   : > { %914 = vmatmul.bf16.gmra.mxu2 %v1259_v19 }
  0xd2   : > { %963 = vmatmul.bf16.gmra.mxu3 %v1263_v20 }
  0xdf   : > { %821 = vmatmul.bf16.gmra.mxu0 %v1267_v29 }
  0xe0   : > { %870 = vmatmul.bf16.gmra.mxu1 %v1271_v30 }
  0xe1   : > { %919 = vmatmul.bf16.gmra.mxu2 %v1275_v31  ;;  %v320_v31 = vld [vmem:[#allocation2 + $0x8] sm:$0xff] }
  0xe2   : > { %968 = vmatmul.bf16.gmra.mxu3 %v1279_v32 }
  0xec   : > { %v787_v33 = vpop.f32.mrf.mxu0 }
  0xed   : > { %v836_v34 = vpop.f32.mrf.mxu1 }
  0xee   : > { %v837_v35 = vadd.f32 %v836_v34, %v787_v33 }
  0xf4   : > { %v885_v36 = vpop.f32.mrf.mxu2  ;;  %v789_v39 = vpop.f32.mrf.mxu0 }
  0xf5   : > { %v934_v37 = vpop.f32.mrf.mxu3  ;;  %v886_v38 = vadd.f32 %v885_v36, %v837_v35  ;;  %v838_v40 = vpop.f32.mrf.mxu1 }
  0xf6   : > { %v839_v44 = vadd.f32 %v838_v40, %v789_v39  ;;  %v321_v40 = vld [vmem:[#allocation2 + $0x48] sm:$0xff] }
  0xf7   : > { %v935_v42 = vadd.f32 %v934_v37, %v886_v38 }
  0xf9   : > { %v974_v43 = vadd.f32 %v935_v42, %v314_v41 }
  0xfb   : > { %990 = vst [vmem:[#allocation2 + $0x30] sm:$0xff] %v974_v43 }
  0xfc   : > { %v887_v45 = vpop.f32.mrf.mxu2  ;;  %v792_v48 = vpop.f32.mrf.mxu0 }
  0xfd   : > { %v936_v46 = vpop.f32.mrf.mxu3  ;;  %v888_v47 = vadd.f32 %v887_v45, %v839_v44  ;;  %v841_v49 = vpop.f32.mrf.mxu1 }
  0xfe   : > { %v842_v53 = vadd.f32 %v841_v49, %v792_v48  ;;  %v322_v49 = vld [vmem:[#allocation2 + $0x40] sm:$0xff] }
  0xff   : > { %v937_v51 = vadd.f32 %v936_v46, %v888_v47 }
 0x101   : > { %v975_v52 = vadd.f32 %v937_v51, %v315_v50 }
 0x103   : > { %991 = vst [vmem:[#allocation2] sm:$0xff] %v975_v52 }
 0x104   : > { %v890_v54 = vpop.f32.mrf.mxu2  ;;  %v794_v57 = vpop.f32.mrf.mxu0 }
 0x105   : > { %v939_v55 = vpop.f32.mrf.mxu3  ;;  %v891_v56 = vadd.f32 %v890_v54, %v842_v53  ;;  %v843_v58 = vpop.f32.mrf.mxu1 }
 0x106   : > { %v844_v62 = vadd.f32 %v843_v58, %v794_v57  ;;  %v323_v58 = vld [vmem:[#allocation2 + $0x20] sm:$0xff] }
 0x107   : > { %v940_v60 = vadd.f32 %v939_v55, %v891_v56 }
 0x109   : > { %v976_v61 = vadd.f32 %v940_v60, %v316_v59 }
 0x10b   : > { %992 = vst [vmem:[#allocation2 + $0x58] sm:$0xff] %v976_v61 }
 0x10c   : > { %v892_v63 = vpop.f32.mrf.mxu2  ;;  %v797_v2 = vpop.f32.mrf.mxu0 }
 0x10d   : > { %v941_v0 = vpop.f32.mrf.mxu3  ;;  %v893_v1 = vadd.f32 %v892_v63, %v844_v62  ;;  %v846_v3 = vpop.f32.mrf.mxu1 }
 0x10e   : > { %v847_v7 = vadd.f32 %v846_v3, %v797_v2  ;;  %v324_v3 = vld [vmem:[#allocation2 + $0x10] sm:$0xff] }
 0x10f   : > { %v942_v5 = vadd.f32 %v941_v0, %v893_v1 }
 0x111   : > { %v977_v6 = vadd.f32 %v942_v5, %v317_v4 }
 0x113   : > { %993 = vst [vmem:[#allocation2 + $0x18] sm:$0xff] %v977_v6 }
 0x114   : > { %v895_v8 = vpop.f32.mrf.mxu2  ;;  %v799_v11 = vpop.f32.mrf.mxu0 }
 0x115   : > { %v944_v9 = vpop.f32.mrf.mxu3  ;;  %v896_v10 = vadd.f32 %v895_v8, %v847_v7  ;;  %v848_v12 = vpop.f32.mrf.mxu1 }
 0x116   : > { %v849_v16 = vadd.f32 %v848_v12, %v799_v11  ;;  %v325_v12 = vld [vmem:[#allocation2 + $0x38] sm:$0xff] }
 0x117   : > { %v945_v14 = vadd.f32 %v944_v9, %v896_v10 }
 0x119   : > { %v978_v15 = vadd.f32 %v945_v14, %v318_v13 }
 0x11b   : > { %994 = vst [vmem:[#allocation2 + $0x50] sm:$0xff] %v978_v15 }
 0x11c   : > { %v897_v17 = vpop.f32.mrf.mxu2  ;;  %v802_v20 = vpop.f32.mrf.mxu0 }
 0x11d   : > { %v946_v18 = vpop.f32.mrf.mxu3  ;;  %v898_v19 = vadd.f32 %v897_v17, %v849_v16  ;;  %v851_v21 = vpop.f32.mrf.mxu1 }
 0x11e   : > { %v852_v25 = vadd.f32 %v851_v21, %v802_v20  ;;  %v326_v21 = vld [vmem:[#allocation2 + $0x60] sm:$0xff] }
 0x11f   : > { %v947_v23 = vadd.f32 %v946_v18, %v898_v19 }
 0x121   : > { %v979_v24 = vadd.f32 %v947_v23, %v319_v22 }
 0x123   : > { %995 = vst [vmem:[#allocation2 + $0x68] sm:$0xff] %v979_v24 }
 0x124   : > { %v900_v26 = vpop.f32.mrf.mxu2  ;;  %v804_v29 = vpop.f32.mrf.mxu0 }
 0x125   : > { %v949_v27 = vpop.f32.mrf.mxu3  ;;  %v901_v28 = vadd.f32 %v900_v26, %v852_v25  ;;  %v853_v30 = vpop.f32.mrf.mxu1 }
 0x126   : > { %v854_v34 = vadd.f32 %v853_v30, %v804_v29 }
 0x127   : > { %v950_v32 = vadd.f32 %v949_v27, %v901_v28  ;;  %v327_v28 = vld [vmem:[#allocation2 + $0x70] sm:$0xff] }
 0x129   : > { %v980_v33 = vadd.f32 %v950_v32, %v320_v31 }
 0x12b   : > { %996 = vst [vmem:[#allocation2 + $0x8] sm:$0xff] %v980_v33 }
 0x12c   : > { %v902_v35 = vpop.f32.mrf.mxu2  ;;  %v807_v38 = vpop.f32.mrf.mxu0 }
 0x12d   : > { %v951_v36 = vpop.f32.mrf.mxu3  ;;  %v903_v37 = vadd.f32 %v902_v35, %v854_v34  ;;  %v856_v39 = vpop.f32.mrf.mxu1 }
 0x12e   : > { %v857_v43 = vadd.f32 %v856_v39, %v807_v38 }
 0x12f   : > { %v952_v41 = vadd.f32 %v951_v36, %v903_v37  ;;  %v328_v37 = vld [vmem:[#allocation2 + $0x78] sm:$0xff] }
 0x131   : > { %v981_v42 = vadd.f32 %v952_v41, %v321_v40 }
 0x133   : > { %997 = vst [vmem:[#allocation2 + $0x48] sm:$0xff] %v981_v42 }
 0x134   : > { %v905_v44 = vpop.f32.mrf.mxu2  ;;  %v809_v47 = vpop.f32.mrf.mxu0 }
 0x135   : > { %v954_v45 = vpop.f32.mrf.mxu3  ;;  %v906_v46 = vadd.f32 %v905_v44, %v857_v43  ;;  %v858_v48 = vpop.f32.mrf.mxu1 }
 0x136   : > { %v859_v52 = vadd.f32 %v858_v48, %v809_v47 }
 0x137   : > { %v955_v50 = vadd.f32 %v954_v45, %v906_v46  ;;  %v329_v45 = vld [vmem:[#allocation2 + $0x28] sm:$0xff] }
 0x139   : > { %v982_v51 = vadd.f32 %v955_v50, %v322_v49 }
 0x13b   : > { %998 = vst [vmem:[#allocation2 + $0x40] sm:$0xff] %v982_v51 }
 0x13c   : > { %v907_v53 = vpop.f32.mrf.mxu2  ;;  %v812_v56 = vpop.f32.mrf.mxu0 }
 0x13d   : > { %v956_v54 = vpop.f32.mrf.mxu3  ;;  %v908_v55 = vadd.f32 %v907_v53, %v859_v52  ;;  %v861_v57 = vpop.f32.mrf.mxu1 }
 0x13e   : > { %v862_v61 = vadd.f32 %v861_v57, %v812_v56 }
 0x13f   : > { %v957_v59 = vadd.f32 %v956_v54, %v908_v55 }
 0x141   : > { %v983_v60 = vadd.f32 %v957_v59, %v323_v58 }
 0x143   : > { %999 = vst [vmem:[#allocation2 + $0x20] sm:$0xff] %v983_v60 }
 0x144   : > { %v910_v62 = vpop.f32.mrf.mxu2  ;;  %v814_v1 = vpop.f32.mrf.mxu0 }
 0x145   : > { %v959_v63 = vpop.f32.mrf.mxu3  ;;  %v911_v0 = vadd.f32 %v910_v62, %v862_v61  ;;  %v863_v2 = vpop.f32.mrf.mxu1 }
 0x146   : > { %v864_v6 = vadd.f32 %v863_v2, %v814_v1 }
 0x147   : > { %v960_v4 = vadd.f32 %v959_v63, %v911_v0 }
 0x149   : > { %v984_v5 = vadd.f32 %v960_v4, %v324_v3 }
 0x14b   : > { %1000 = vst [vmem:[#allocation2 + $0x10] sm:$0xff] %v984_v5 }
 0x14c   : > { %v912_v7 = vpop.f32.mrf.mxu2  ;;  %v817_v10 = vpop.f32.mrf.mxu0 }
 0x14d   : > { %v961_v8 = vpop.f32.mrf.mxu3  ;;  %v913_v9 = vadd.f32 %v912_v7, %v864_v6  ;;  %v866_v11 = vpop.f32.mrf.mxu1 }
 0x14e   : > { %v867_v15 = vadd.f32 %v866_v11, %v817_v10 }
 0x14f   : > { %v962_v13 = vadd.f32 %v961_v8, %v913_v9 }
 0x151   : > { %v985_v14 = vadd.f32 %v962_v13, %v325_v12 }
 0x153   : > { %1001 = vst [vmem:[#allocation2 + $0x38] sm:$0xff] %v985_v14 }
 0x154   : > { %v915_v16 = vpop.f32.mrf.mxu2  ;;  %v819_v19 = vpop.f32.mrf.mxu0 }
 0x155   : > { %v964_v17 = vpop.f32.mrf.mxu3  ;;  %v916_v18 = vadd.f32 %v915_v16, %v867_v15  ;;  %v868_v20 = vpop.f32.mrf.mxu1 }
 0x156   : > { %v869_v24 = vadd.f32 %v868_v20, %v819_v19 }
 0x157   : > { %v965_v22 = vadd.f32 %v964_v17, %v916_v18 }
 0x159   : > { %v986_v23 = vadd.f32 %v965_v22, %v326_v21 }
 0x15b   : > { %1002 = vst [vmem:[#allocation2 + $0x60] sm:$0xff] %v986_v23 }
 0x15c   : > { %v917_v25 = vpop.f32.mrf.mxu2  ;;  %v822_v29 = vpop.f32.mrf.mxu0 }
 0x15d   : > { %v966_v26 = vpop.f32.mrf.mxu3  ;;  %v918_v27 = vadd.f32 %v917_v25, %v869_v24  ;;  %v871_v30 = vpop.f32.mrf.mxu1 }
 0x15e   : > { %v872_v33 = vadd.f32 %v871_v30, %v822_v29 }
 0x15f   : > { %v967_v31 = vadd.f32 %v966_v26, %v918_v27 }
 0x161   : > { %v987_v32 = vadd.f32 %v967_v31, %v327_v28 }
 0x163   : > { %1003 = vst [vmem:[#allocation2 + $0x70] sm:$0xff] %v987_v32 }
 0x164   : > { %v920_v34 = vpop.f32.mrf.mxu2  ;;  %v824_v39 = vpop.f32.mrf.mxu0 }
 0x165   : > { %v969_v35 = vpop.f32.mrf.mxu3  ;;  %v921_v36 = vadd.f32 %v920_v34, %v872_v33  ;;  %v873_v40 = vpop.f32.mrf.mxu1 }
 0x166   : > { %v874_v42 = vadd.f32 %v873_v40, %v824_v39 }
 0x167   : > { %v970_v38 = vadd.f32 %v969_v35, %v921_v36 }
 0x169   : > { %v988_v41 = vadd.f32 %v970_v38, %v328_v37 }
 0x16b   : > { %1004 = vst [vmem:[#allocation2 + $0x78] sm:$0xff] %v988_v41 }
 0x16c   : > { %v922_v43 = vpop.f32.mrf.mxu2 }
 0x16d   : > { %v923_v44 = vadd.f32 %v922_v43, %v874_v42  ;;  %v971_v46 = vpop.f32.mrf.mxu3 }
 0x16f   : > { %v972_v47 = vadd.f32 %v971_v46, %v923_v44  ;;  %1009 = sbr.rel (%p1408_p11) target bundleno = 389 (0x185), region = 59 }
 0x171   : > { %v989_v48 = vadd.f32 %v972_v47, %v329_v45 }
 0x173   : > { %1005 = vst [vmem:[#allocation2 + $0x28] sm:$0xff] %v989_v48 }
 0x174   : > { %v1010_v49 = vld [vmem:[#allocation2 + $0x30] sm:$0xff]  ;;  %v1011_v50 = vld [vmem:[#allocation2] sm:$0xff]  ;;  %v1012_v51 = vld [vmem:[#allocation2 + $0x58] sm:$0xff] }
 0x175   : > { %1026 = vst [vmem:[%s1860_s2] sm:$0xff] %v1010_v49  ;;  %v1013_v52 = vld [vmem:[#allocation2 + $0x18] sm:$0xff]  ;;  %v1014_v53 = vld [vmem:[#allocation2 + $0x50] sm:$0xff]  ;;  %v1015_v54 = vld [vmem:[#allocation2 + $0x68] sm:$0xff] }
 0x176   : > { %1027 = vst [vmem:[%s1860_s2 + $0x8] sm:$0xff] %v1011_v50  ;;  %v1016_v55 = vld [vmem:[#allocation2 + $0x8] sm:$0xff]  ;;  %v1018_v57 = vld [vmem:[#allocation2 + $0x40] sm:$0xff]  ;;  %v1020_v59 = vld [vmem:[#allocation2 + $0x10] sm:$0xff] }
 0x177   : > { %1028 = vst [vmem:[%s1860_s2 + $0x10] sm:$0xff] %v1012_v51  ;;  %v1017_v56 = vld [vmem:[#allocation2 + $0x48] sm:$0xff]  ;;  %v1019_v58 = vld [vmem:[#allocation2 + $0x20] sm:$0xff]  ;;  %v1021_v60 = vld [vmem:[#allocation2 + $0x38] sm:$0xff] }
 0x178   : > { %1029 = vst [vmem:[%s1860_s2 + $0x18] sm:$0xff] %v1013_v52  ;;  %v1022_v61 = vld [vmem:[#allocation2 + $0x60] sm:$0xff]  ;;  %v1023_v62 = vld [vmem:[#allocation2 + $0x70] sm:$0xff]  ;;  %v1024_v63 = vld [vmem:[#allocation2 + $0x78] sm:$0xff] }
 0x179   : > { %1030 = vst [vmem:[%s1860_s2 + $0x20] sm:$0xff] %v1014_v53 }
 0x17a   : > { %1031 = vst [vmem:[%s1860_s2 + $0x28] sm:$0xff] %v1015_v54  ;;  %v1025_v0 = vld [vmem:[#allocation2 + $0x28] sm:$0xff] }
 0x17b   : > { %1032 = vst [vmem:[%s1860_s2 + $0x30] sm:$0xff] %v1016_v55 }
 0x17c   : > { %1033 = vst [vmem:[%s1860_s2 + $0x38] sm:$0xff] %v1017_v56 }
 0x17d   : > { %1034 = vst [vmem:[%s1860_s2 + $0x40] sm:$0xff] %v1018_v57 }
 0x17e   : > { %1035 = vst [vmem:[%s1860_s2 + $0x48] sm:$0xff] %v1019_v58 }
 0x17f   : > { %1036 = vst [vmem:[%s1860_s2 + $0x50] sm:$0xff] %v1020_v59 }
 0x180   : > { %1037 = vst [vmem:[%s1860_s2 + $0x58] sm:$0xff] %v1021_v60 }
 0x181   : > { %1038 = vst [vmem:[%s1860_s2 + $0x60] sm:$0xff] %v1022_v61 }
 0x182   : > { %1039 = vst [vmem:[%s1860_s2 + $0x68] sm:$0xff] %v1023_v62 }
 0x183   : > { %1040 = vst [vmem:[%s1860_s2 + $0x70] sm:$0xff] %v1024_v63 }
 0x184   : > { %1041 = vst [vmem:[%s1860_s2 + $0x78] sm:$0xff] %v1025_v0 }
 0x185 PF: > { %s12_s13 = sadd.s32 1, %s1557_s13   ;;  %s1861_s9 = smov %s1545_s10 }
 0x186   : > { %p9_p12 = scmp.ge.s32.totalorder %s12_s13, 4   ;;  %s1862_s10 = smov %s1610_s17 }
 0x187   : > { %s1863_s11 = smov %s1553_s12  ;;  %s1864_s12 = smov %s1866_s14 }
 0x188   :  { %11 = sbr.rel (!%p9_p12) target bundleno = 3 (0x3), region = 97 }

// kernel: discriminator_forward.10
= control target key start
LH: loop header
LB: loop body
LE: loop exit
PB: predicated region body
PF: predicated region fallthrough
CT: control target
= control target key end

     0   :  { %s329_s6 = smov 0   ;;  %s405_s0 = inlined_call_operand.vmem [shape: f32[2,64,128], index: 0, kind: input, shape index: {}]   ;;  %s406_s1 = inlined_call_operand.vmem [shape: f32[2,64,128], index: 1, kind: output, shape index: {}]  }
   0x1 LB: > { %s284_s7 = sadd.s32 4294967295, %s316_s6   ;;  %p288_p0 = scmp.ge.s32.totalorder %s316_s6, 1  ;;  %s316_s6 = sphi %s329_s6, %s11_s6  }
   0x2   : > { %p87_p1 = scmp.lt.s32.totalorder %s316_s6, 3 }
   0x4   : > { %p88_p2 = pnand %p288_p0, %p87_p1 }
   0x5   : > { %p107_p3 = scmp.lt.s32.totalorder (!%p88_p2), %s284_s7, 1 }
   0x6   : > { %91 = sbr.rel (%p88_p2) target bundleno = 80 (0x50), region = 24 }
   0xb   : > { %s408_s7 = smov (!%p107_p3, %s284_s7), 1  ;;  %v318_v0 = vmov 64.0  }
   0xc   : > { %s295_s8 = sshll.u32 %s408_s7, 6  ;;  %306 = vrcp.f32 %v318_v0 }
   0xd   : > { %s111_s11 = scalar_lea.vmem %s405_s0, %s295_s8  ;;  %s392_s14 = scalar_lea.vmem %s406_s1, %s295_s8 }
   0xe   : > { %v345_v1 = vld [vmem:[%s111_s11] sm:$0xff]  ;;  %v347_v2 = vld [vmem:[%s111_s11 + $0x8] sm:$0xff]  ;;  %v349_v3 = vld [vmem:[%s111_s11 + $0x10] sm:$0xff] }
   0xf   : > { %v351_v4 = vld [vmem:[%s111_s11 + $0x18] sm:$0xff]  ;;  %v125_v5 = vadd.f32 %v347_v2, %v345_v1  ;;  %v146_v6 = vmul.f32 %v345_v1, %v345_v1  ;;  %v147_v7 = vmul.f32 %v347_v2, %v347_v2  ;;  %v148_v8 = vmul.f32 %v349_v3, %v349_v3  ;;  %v361_v9 = vld [vmem:[%s111_s11 + $0x20] sm:$0xff]  ;;  %v366_v14 = vld [vmem:[%s111_s11 + $0x28] sm:$0xff] }
  0x10   : > { %v149_v11 = vmul.f32 %v351_v4, %v351_v4  ;;  %v150_v16 = vmul.f32 %v361_v9, %v361_v9  ;;  %v371_v18 = vld [vmem:[%s111_s11 + $0x30] sm:$0xff]  ;;  %v151_v21 = vmul.f32 %v366_v14, %v366_v14  ;;  %v124_v23 = vld [vmem:[%s111_s11 + $0x38] sm:$0xff] }
  0x11   : > { %v126_v10 = vadd.f32 %v125_v5, %v349_v3  ;;  %v154_v12 = vadd.f32 %v147_v7, %v146_v6  ;;  %v152_v25 = vmul.f32 %v371_v18, %v371_v18  ;;  %v153_v29 = vmul.f32 %v124_v23, %v124_v23 }
  0x12   : > { %v307_v13 = vpop.eup %306 }
  0x13   : > { %v127_v15 = vadd.f32 %v126_v10, %v351_v4  ;;  %v155_v17 = vadd.f32 %v154_v12, %v148_v8  ;;  %v139_v20 = vmul.f32 64.0, %v307_v13  ;;  %vm143_vm0 = vweird.f32 %v307_v13 }
  0x15   : > { %v128_v19 = vadd.f32 %v127_v15, %v361_v9  ;;  %v156_v22 = vadd.f32 %v155_v17, %v149_v11  ;;  %v140_v28 = vsub.f32 1.0, %v139_v20 }
  0x17   : > { %v129_v24 = vadd.f32 %v128_v19, %v366_v14  ;;  %v157_v26 = vadd.f32 %v156_v22, %v150_v16  ;;  %v141_v34 = vmul.f32 %v307_v13, %v140_v28 }
  0x19   : > { %v130_v27 = vadd.f32 %v129_v24, %v371_v18  ;;  %v158_v30 = vadd.f32 %v157_v26, %v151_v21  ;;  %v142_v39 = vadd.f32 %v307_v13, %v141_v34 }
  0x1b   : > { %v131_v31 = vadd.f32 %v130_v27, %v124_v23  ;;  %v159_v32 = vadd.f32 %v158_v30, %v152_v25  ;;  %v144_v44 = vsel %vm143_vm0, %v307_v13, %v142_v39 }
  0x1d   : > { %v132_v33 = vrot.slane %v131_v31, 4  ;;  %v160_v35 = vadd.f32 %v159_v32, %v153_v29 }
  0x1f   : > { %v133_v36 = vadd.f32 %v132_v33, %v131_v31  ;;  %v161_v37 = vrot.slane %v160_v35, 4 }
  0x21   : > { %v134_v38 = vrot.slane %v133_v36, 2  ;;  %v162_v40 = vadd.f32 %v161_v37, %v160_v35 }
  0x23   : > { %v135_v41 = vadd.f32 %v134_v38, %v133_v36  ;;  %v163_v42 = vrot.slane %v162_v40, 2 }
  0x25   : > { %v136_v43 = vrot.slane %v135_v41, 1  ;;  %v164_v45 = vadd.f32 %v163_v42, %v162_v40 }
  0x27   : > { %v137_v46 = vadd.f32 %v136_v43, %v135_v41  ;;  %v165_v47 = vrot.slane %v164_v45, 1 }
  0x29   : > { %v145_v48 = vmul.f32 %v144_v44, %v137_v46  ;;  %v166_v49 = vadd.f32 %v165_v47, %v164_v45 }
  0x2b   : > { %v168_v50 = vmul.f32 %v145_v48, %v145_v48  ;;  %v167_v51 = vmul.f32 %v166_v49, %v144_v44  ;;  %v170_v58 = vsub.f32 %v345_v1, %v145_v48  ;;  %v171_v60 = vsub.f32 %v347_v2, %v145_v48 }
  0x2c   : > { %v172_v61 = vsub.f32 %v349_v3, %v145_v48  ;;  %v173_v62 = vsub.f32 %v351_v4, %v145_v48  ;;  %v174_v63 = vsub.f32 %v361_v9, %v145_v48  ;;  %v175_v5 = vsub.f32 %v366_v14, %v145_v48 }
  0x2d   : > { %v169_v52 = vsub.f32 %v167_v51, %v168_v50  ;;  %v176_v6 = vsub.f32 %v371_v18, %v145_v48  ;;  %v177_v7 = vsub.f32 %v124_v23, %v145_v48 }
  0x2f   : > { %v178_v53 = vadd.f32 1e-05, %v169_v52 }
  0x31   : > { %308 = vrsqrt.f32 %v178_v53  ;;  %vm185_vm1 = vweird.f32 %v178_v53 }
  0x37   : > { %v309_v54 = vpop.eup %308 }
  0x38   : > { %v180_v55 = vmul.f32 %v309_v54, %v178_v53  ;;  %vm186_vm2 = vweird.f32 %v309_v54 }
  0x39   : > { %vm187_vm3 = vmor %vm185_vm1, %vm186_vm2 }
  0x3a   : > { %v181_v56 = vmul.f32 %v309_v54, %v180_v55 }
  0x3c   : > { %v182_v57 = vmul.f32 0.5, %v181_v56 }
  0x3e   : > { %v183_v59 = vsub.f32 1.5, %v182_v57 }
  0x40   : > { %v184_v0 = vmul.f32 %v309_v54, %v183_v59 }
  0x42   : > { %v188_v8 = vsel %vm187_vm3, %v309_v54, %v184_v0 }
  0x43   : > { %v189_v10 = vmul.f32 %v188_v8, %v170_v58  ;;  %v190_v1 = vmul.f32 %v188_v8, %v171_v60  ;;  %v191_v11 = vmul.f32 %v188_v8, %v172_v61  ;;  %v192_v12 = vmul.f32 %v188_v8, %v173_v62 }
  0x44   : > { %v193_v13 = vmul.f32 %v188_v8, %v174_v63  ;;  %v194_v2 = vmul.f32 %v188_v8, %v175_v5  ;;  %v195_v15 = vmul.f32 %v188_v8, %v176_v6  ;;  %v196_v3 = vmul.f32 %v188_v8, %v177_v7 }
  0x45   : > { %vm197_vm4 = vcmp.ge.f32.partialorder %v189_v10, 0.0  ;;  %v205_v4 = vmul.f32 0.2, %v189_v10  ;;  %vm198_vm5 = vcmp.ge.f32.partialorder %v190_v1, 0.0  ;;  %v206_v9 = vmul.f32 0.2, %v190_v1 }
  0x46   : > { %vm199_vm6 = vcmp.ge.f32.partialorder %v191_v11, 0.0  ;;  %v207_v14 = vmul.f32 0.2, %v191_v11  ;;  %vm200_vm7 = vcmp.ge.f32.partialorder %v192_v12, 0.0  ;;  %v208_v16 = vmul.f32 0.2, %v192_v12 }
  0x47   : > { %v213_v17 = vsel %vm197_vm4, %v189_v10, %v205_v4  ;;  %v214_v18 = vsel %vm198_vm5, %v190_v1, %v206_v9  ;;  %vm201_vm8 = vcmp.ge.f32.partialorder %v193_v13, 0.0  ;;  %v209_v19 = vmul.f32 0.2, %v193_v13 }
  0x48   : > { %221 = vst [vmem:[%s392_s14] sm:$0xff] %v213_v17  ;;  %v215_v20 = vsel %vm199_vm6, %v191_v11, %v207_v14  ;;  %v216_v21 = vsel %vm200_vm7, %v192_v12, %v208_v16  ;;  %vm202_vm9 = vcmp.ge.f32.partialorder %v194_v2, 0.0  ;;  %v210_v22 = vmul.f32 0.2, %v194_v2 }
  0x49   : > { %222 = vst [vmem:[%s392_s14 + $0x8] sm:$0xff] %v214_v18  ;;  %v217_v23 = vsel %vm201_vm8, %v193_v13, %v209_v19  ;;  %vm203_vm10 = vcmp.ge.f32.partialorder %v195_v15, 0.0  ;;  %v211_v24 = vmul.f32 0.2, %v195_v15  ;;  %vm204_vm11 = vcmp.ge.f32.partialorder %v196_v3, 0.0 }
  0x4a   : > { %223 = vst [vmem:[%s392_s14 + $0x10] sm:$0xff] %v215_v20  ;;  %v218_v25 = vsel %vm202_vm9, %v194_v2, %v210_v22  ;;  %v212_v26 = vmul.f32 0.2, %v196_v3 }
  0x4b   : > { %224 = vst [vmem:[%s392_s14 + $0x18] sm:$0xff] %v216_v21  ;;  %v219_v27 = vsel %vm203_vm10, %v195_v15, %v211_v24 }
  0x4c   : > { %225 = vst [vmem:[%s392_s14 + $0x20] sm:$0xff] %v217_v23  ;;  %v220_v28 = vsel %vm204_vm11, %v196_v3, %v212_v26 }
  0x4d   : > { %226 = vst [vmem:[%s392_s14 + $0x28] sm:$0xff] %v218_v25 }
  0x4e   : > { %227 = vst [vmem:[%s392_s14 + $0x30] sm:$0xff] %v219_v27 }
  0x4f   : > { %228 = vst [vmem:[%s392_s14 + $0x38] sm:$0xff] %v220_v28 }
  0x50 PF: > { %s11_s6 = sadd.s32 1, %s316_s6  }
  0x51   : > { %p8_p4 = scmp.ge.s32.totalorder %s11_s6, 4  }
  0x53   :  { %10 = sbr.rel (!%p8_p4) target bundleno = 1 (0x1), region = 54 }

// kernel: discriminator_forward.12
= control target key start
LH: loop header
LB: loop body
LE: loop exit
PB: predicated region body
PF: predicated region fallthrough
CT: control target
= control target key end

     0   :  { %s316_s6 = smov 0   ;;  %s364_s0 = inlined_call_operand.vmem [shape: f32[2,16,256], index: 0, kind: input, shape index: {}]   ;;  %s365_s1 = inlined_call_operand.vmem [shape: f32[2,16,256], index: 1, kind: output, shape index: {}]  }
   0x1 LB: > { %s269_s7 = sadd.s32 4294967295, %s303_s6   ;;  %p273_p0 = scmp.ge.s32.totalorder %s303_s6, 1  ;;  %s303_s6 = sphi %s316_s6, %s11_s6  }
   0x2   : > { %p87_p1 = scmp.lt.s32.totalorder %s303_s6, 3 }
   0x4   : > { %p88_p2 = pnand %p273_p0, %p87_p1 }
   0x5   : > { %p107_p3 = scmp.lt.s32.totalorder (!%p88_p2), %s269_s7, 1 }
   0x6   : > { %91 = sbr.rel (%p88_p2) target bundleno = 64 (0x40), region = 24 }
   0xb   : > { %v305_v0 = vmov 16.0   ;;  %s367_s7 = smov (!%p107_p3, %s269_s7), 1 }
   0xc   : > { %291 = vrcp.f32 %v305_v0  ;;  %s280_s8 = sshll.u32 %s367_s7, 5 }
   0xd   : > { %s111_s11 = scalar_lea.vmem %s364_s0, %s280_s8  ;;  %s116_s14 = scalar_lea.vmem %s365_s1, %s280_s8 }
   0xe   : > { %v332_v1 = vld [vmem:[%s111_s11] sm:$0xff]  ;;  %v334_v2 = vld [vmem:[%s111_s11 + $0x10] sm:$0xff]  ;;  %v336_v3 = vld [vmem:[%s111_s11 + $0x18] sm:$0xff] }
   0xf   : > { %v121_v5 = vadd.f32 %v334_v2, %v332_v1  ;;  %v144_v6 = vmul.f32 %v332_v1, %v332_v1  ;;  %v146_v7 = vmul.f32 %v334_v2, %v334_v2  ;;  %v147_v8 = vmul.f32 %v336_v3, %v336_v3  ;;  %v346_v9 = vld [vmem:[%s111_s11 + $0x8] sm:$0xff] }
  0x10   : > { %v128_v11 = vadd.f32 %v336_v3, %v346_v9  ;;  %v145_v12 = vmul.f32 %v346_v9, %v346_v9 }
  0x11   : > { %v122_v13 = vrot.slane %v121_v5, 4  ;;  %v148_v14 = vadd.f32 %v146_v7, %v144_v6 }
  0x12   : > { %v292_v4 = vpop.eup %291  ;;  %v129_v16 = vrot.slane %v128_v11, 4  ;;  %v155_v17 = vadd.f32 %v147_v8, %v145_v12 }
  0x13   : > { %v136_v10 = vmul.f32 16.0, %v292_v4  ;;  %v123_v18 = vadd.f32 %v122_v13, %v121_v5  ;;  %v149_v19 = vrot.slane %v148_v14, 4  ;;  %vm140_vm0 = vweird.f32 %v292_v4 }
  0x14   : > { %v130_v21 = vadd.f32 %v129_v16, %v128_v11  ;;  %v156_v22 = vrot.slane %v155_v17, 4 }
  0x15   : > { %v137_v15 = vsub.f32 1.0, %v136_v10  ;;  %v124_v23 = vrot.slane %v123_v18, 2  ;;  %v150_v24 = vadd.f32 %v149_v19, %v148_v14 }
  0x16   : > { %v131_v26 = vrot.slane %v130_v21, 2  ;;  %v157_v27 = vadd.f32 %v156_v22, %v155_v17 }
  0x17   : > { %v138_v20 = vmul.f32 %v292_v4, %v137_v15  ;;  %v125_v28 = vadd.f32 %v124_v23, %v123_v18  ;;  %v151_v29 = vrot.slane %v150_v24, 2 }
  0x18   : > { %v132_v30 = vadd.f32 %v131_v26, %v130_v21  ;;  %v158_v31 = vrot.slane %v157_v27, 2 }
  0x19   : > { %v139_v25 = vadd.f32 %v292_v4, %v138_v20  ;;  %v126_v32 = vrot.slane %v125_v28, 1  ;;  %v152_v33 = vadd.f32 %v151_v29, %v150_v24 }
  0x1a   : > { %v133_v35 = vrot.slane %v132_v30, 1  ;;  %v159_v36 = vadd.f32 %v158_v31, %v157_v27 }
  0x1b   : > { %v141_v34 = vsel %vm140_vm0, %v292_v4, %v139_v25  ;;  %v127_v37 = vadd.f32 %v126_v32, %v125_v28  ;;  %v153_v38 = vrot.slane %v152_v33, 1 }
  0x1c   : > { %v134_v39 = vadd.f32 %v133_v35, %v132_v30  ;;  %v160_v40 = vrot.slane %v159_v36, 1 }
  0x1d   : > { %v142_v41 = vmul.f32 %v141_v34, %v127_v37  ;;  %v154_v42 = vadd.f32 %v153_v38, %v152_v33 }
  0x1e   : > { %v143_v43 = vmul.f32 %v141_v34, %v134_v39  ;;  %v161_v44 = vadd.f32 %v160_v40, %v159_v36 }
  0x1f   : > { %v162_v45 = vmul.f32 %v154_v42, %v141_v34  ;;  %v164_v46 = vmul.f32 %v142_v41, %v142_v41  ;;  %v168_v62 = vsub.f32 %v332_v1, %v142_v41  ;;  %v170_v0 = vsub.f32 %v334_v2, %v142_v41 }
  0x20   : > { %v163_v47 = vmul.f32 %v161_v44, %v141_v34  ;;  %v165_v48 = vmul.f32 %v143_v43, %v143_v43  ;;  %v169_v5 = vsub.f32 %v346_v9, %v143_v43  ;;  %v171_v6 = vsub.f32 %v336_v3, %v143_v43 }
  0x21   : > { %v166_v49 = vsub.f32 %v162_v45, %v164_v46 }
  0x22   : > { %v167_v50 = vsub.f32 %v163_v47, %v165_v48 }
  0x23   : > { %v172_v51 = vadd.f32 1e-05, %v166_v49 }
  0x24   : > { %v173_v52 = vadd.f32 1e-05, %v167_v50 }
  0x25   : > { %293 = vrsqrt.f32 %v172_v51  ;;  %vm180_vm1 = vweird.f32 %v172_v51 }
  0x26   : > { %295 = vrsqrt.f32 %v173_v52  ;;  %vm190_vm3 = vweird.f32 %v173_v52 }
  0x2b   : > { %v294_v53 = vpop.eup %293 }
  0x2c   : > { %v296_v54 = vpop.eup %295  ;;  %v175_v55 = vmul.f32 %v294_v53, %v172_v51  ;;  %vm181_vm2 = vweird.f32 %v294_v53 }
  0x2d   : > { %v185_v56 = vmul.f32 %v296_v54, %v173_v52  ;;  %vm191_vm4 = vweird.f32 %v296_v54  ;;  %vm182_vm5 = vmor %vm180_vm1, %vm181_vm2 }
  0x2e   : > { %v176_v57 = vmul.f32 %v294_v53, %v175_v55  ;;  %vm192_vm6 = vmor %vm190_vm3, %vm191_vm4 }
  0x2f   : > { %v186_v58 = vmul.f32 %v296_v54, %v185_v56 }
  0x30   : > { %v177_v59 = vmul.f32 0.5, %v176_v57 }
  0x31   : > { %v187_v60 = vmul.f32 0.5, %v186_v58 }
  0x32   : > { %v178_v61 = vsub.f32 1.5, %v177_v59 }
  0x33   : > { %v188_v63 = vsub.f32 1.5, %v187_v60 }
  0x34   : > { %v179_v4 = vmul.f32 %v294_v53, %v178_v61 }
  0x35   : > { %v189_v7 = vmul.f32 %v296_v54, %v188_v63 }
  0x36   : > { %v183_v8 = vsel %vm182_vm5, %v294_v53, %v179_v4 }
  0x37   : > { %v194_v10 = vmul.f32 %v183_v8, %v168_v62  ;;  %v193_v11 = vsel %vm192_vm6, %v296_v54, %v189_v7  ;;  %v196_v12 = vmul.f32 %v183_v8, %v170_v0 }
  0x38   : > { %v195_v13 = vmul.f32 %v193_v11, %v169_v5  ;;  %v197_v14 = vmul.f32 %v193_v11, %v171_v6 }
  0x39   : > { %vm198_vm7 = vcmp.ge.f32.partialorder %v194_v10, 0.0  ;;  %v202_v1 = vmul.f32 0.2, %v194_v10  ;;  %vm200_vm8 = vcmp.ge.f32.partialorder %v196_v12, 0.0  ;;  %v204_v2 = vmul.f32 0.2, %v196_v12 }
  0x3a   : > { %vm199_vm9 = vcmp.ge.f32.partialorder %v195_v13, 0.0  ;;  %v203_v9 = vmul.f32 0.2, %v195_v13  ;;  %vm201_vm10 = vcmp.ge.f32.partialorder %v197_v14, 0.0  ;;  %v205_v3 = vmul.f32 0.2, %v197_v14 }
  0x3b   : > { %v206_v15 = vsel %vm198_vm7, %v194_v10, %v202_v1  ;;  %v208_v16 = vsel %vm200_vm8, %v196_v12, %v204_v2 }
  0x3c   : > { %210 = vst [vmem:[%s116_s14] sm:$0xff] %v206_v15  ;;  %v207_v17 = vsel %vm199_vm9, %v195_v13, %v203_v9  ;;  %v209_v18 = vsel %vm201_vm10, %v197_v14, %v205_v3 }
  0x3d   : > { %211 = vst [vmem:[%s116_s14 + $0x8] sm:$0xff] %v207_v17 }
  0x3e   : > { %212 = vst [vmem:[%s116_s14 + $0x10] sm:$0xff] %v208_v16 }
  0x3f   : > { %213 = vst [vmem:[%s116_s14 + $0x18] sm:$0xff] %v209_v18 }
  0x40 PF: > { %s11_s6 = sadd.s32 1, %s303_s6  }
  0x41   : > { %p8_p4 = scmp.ge.s32.totalorder %s11_s6, 4  }
  0x43   :  { %10 = sbr.rel (!%p8_p4) target bundleno = 1 (0x1), region = 54 }

// kernel: discriminator_forward.11
= control target key start
LH: loop header
LB: loop body
LE: loop exit
PB: predicated region body
PF: predicated region fallthrough
CT: control target
= control target key end

     0   :  { %s1486_s9 = smov 0   ;;  %s1488_s10 = smov 0   ;;  %s1753_s0 = inlined_call_operand.vmem [shape: bf16[32,2048], index: 0, kind: input, shape index: {}]   ;;  %s1754_s1 = inlined_call_operand.vmem [shape: bf16[2048,256], index: 1, kind: input, shape index: {}]   ;;  %s1755_s2 = inlined_call_operand.vmem [shape: f32[32,256], index: 2, kind: output, shape index: {}]  }
   0x1   :  { %s1490_s11 = smov 0   ;;  %s1492_s12 = smov 0  }
   0x2   :  { %s1494_s13 = smov 0  }
   0x3 LB: > { %s24_s14 = sadd.s32 1, %s1464_s12  ;;  %p47_p1 = scmp.ne.s32.totalorder %s1456_s10, %s1452_s9  ;;  %s1468_s13 = sphi %s1494_s13, %s12_s13   ;;  %s1464_s12 = sphi %s1492_s12, %s1759_s12   ;;  %s1460_s11 = sphi %s1490_s11, %s1758_s11   ;;  %s1456_s10 = sphi %s1488_s10, %s1757_s10   ;;  %s1452_s9 = sphi %s1486_s9, %s1756_s9  }
   0x4   : > { %p25_p0 = scmp.ge.s32.totalorder %s24_s14, 4  ;;  %p48_p2 = scmp.eq.s32.totalorder %s1468_s13, 0 }
   0x5   : > { %s40_s16 = sadd.s32 1, %s1456_s10  ;;  %p1012_p5 = scmp.ge.s32.totalorder %s1468_s13, 4 }
   0x6   : > { %s1761_s14 = smov (%p25_p0, %s24_s14), 0  ;;  %p49_p3 = por %p48_p2, %p47_p1 }
   0x7   : > { %s36_s15 = ssub.s32 %s1464_s12, %s1761_s14  ;;  %129 = sbr.rel (%p1012_p5) target bundleno = 24 (0x18), region = 16 }
   0x8   : > { %p38_p4 = scmp.eq.s32.totalorder %s36_s15, 0 }
   0xa   : > { %s1521_s17 = scalar_select %p38_p4, %s1456_s10, %s40_s16  }
   0xc   : > { %132 = sbr.rel (!%p49_p3) target bundleno = 24 (0x18), region = 20  ;;  %s134_s18 = sand.u32 (%p49_p3), 1, %s1456_s10  }
   0xd   : > { %s1315_s19 = sshll.u32 (%p49_p3), %s1464_s12, 4  ;;  %s1013_s20 = sshll.u32 (%p49_p3), %s134_s18, 6 }
   0xe   : > { %s142_s23 = scalar_lea.vmem (%p49_p3), %s1753_s0, %s1315_s19  ;;  %s136_s24 = scalar_lea.vmem (%p49_p3), [#allocation3], %s1013_s20 }
   0xf   : > { %v155_v0 = vld [vmem:[%s142_s23] sm:$0xff] (%p49_p3)  ;;  %v157_v1 = vld [vmem:[%s142_s23 + $0x8] sm:$0xff] (%p49_p3) }
  0x10   : > { %v159_v2 = vld [vmem:[%s142_s23 + $0x40] sm:$0xff] (%p49_p3)  ;;  %156 = vst [vmem:[%s136_s24] sm:$0xff] (%p49_p3), %v155_v0  ;;  %v161_v3 = vld [vmem:[%s142_s23 + $0x48] sm:$0xff] (%p49_p3) }
  0x11   : > { %158 = vst [vmem:[%s136_s24 + $0x8] sm:$0xff] %v157_v1  ;;  %v163_v4 = vld [vmem:[%s142_s23 + $0x80] sm:$0xff]  ;;  %v165_v5 = vld [vmem:[%s142_s23 + $0x88] sm:$0xff] }
  0x12   : > { %160 = vst [vmem:[%s136_s24 + $0x10] sm:$0xff] %v159_v2  ;;  %v167_v6 = vld [vmem:[%s142_s23 + $0xc0] sm:$0xff]  ;;  %v169_v7 = vld [vmem:[%s142_s23 + $0xc8] sm:$0xff] }
  0x13   : > { %162 = vst [vmem:[%s136_s24 + $0x18] sm:$0xff] %v161_v3 }
  0x14   : > { %164 = vst [vmem:[%s136_s24 + $0x20] sm:$0xff] %v163_v4 }
  0x15   : > { %166 = vst [vmem:[%s136_s24 + $0x28] sm:$0xff] %v165_v5 }
  0x16   : > { %168 = vst [vmem:[%s136_s24 + $0x30] sm:$0xff] %v167_v6 }
  0x17   : > { %170 = vst [vmem:[%s136_s24 + $0x38] sm:$0xff] %v169_v7 }
  0x18 PF: > { %p1016_p6 = scmp.ge.s32.totalorder %s1468_s13, 1  ;;  %p190_p7 = scmp.lt.s32.totalorder %s1468_s13, 5 }
  0x1a   : > { %p191_p8 = pnand %p1016_p6, %p190_p7 }
  0x1b   : > { %s197_s25 = sand.u32 (!%p191_p8), 1, %s1452_s9   ;;  %s1018_s26 = sshll.u32 (!%p191_p8), %s1460_s11, 6 }
  0x1c   : > { %194 = sbr.rel (%p191_p8) target bundleno = 287 (0x11f), region = 47  ;;  %s1017_s27 = sshll.u32 (!%p191_p8), %s197_s25, 6 }
  0x1d   : > { %p237_p9 = scmp.lt.s32.totalorder (!%p191_p8), %s1018_s26, 255  ;;  %s1538_s4 = scalar_lea.vmem (!%p191_p8), [#allocation3], %s1017_s27 }
  0x1e   : > { %p1021_p10 = scmp.ne.s32.totalorder (!%p191_p8), %s1460_s11, 0 }
  0x21   : > { %s1763_s26 = smov (!%p237_p9, %s1018_s26), 255  ;;  %262 = sbr.rel (%p1021_p10) target bundleno = 47 (0x2f), region = 55 }
  0x22   : > { %s1316_s28 = sshll.u32 %s1763_s26, 3 }
  0x23   : > { %s1536_s3 = scalar_lea.vmem %s1754_s1, %s1316_s28 }
  0x26   : > { %v1470_v8 = vmov 0.0  }
  0x27   : > { %263 = vst [vmem:[#allocation2 + $0x30] sm:$0xff] %v1470_v8 }
  0x28   : > { %264 = vst [vmem:[#allocation2] sm:$0xff] %v1470_v8 }
  0x29   : > { %265 = vst [vmem:[#allocation2 + $0x18] sm:$0xff] %v1470_v8 }
  0x2a   : > { %266 = vst [vmem:[#allocation2 + $0x10] sm:$0xff] %v1470_v8 }
  0x2b   : > { %267 = vst [vmem:[#allocation2 + $0x8] sm:$0xff] %v1470_v8 }
  0x2c   : > { %268 = vst [vmem:[#allocation2 + $0x20] sm:$0xff] %v1470_v8 }
  0x2d   : > { %269 = vst [vmem:[#allocation2 + $0x28] sm:$0xff] %v1470_v8 }
  0x2e   : > { %270 = vst [vmem:[#allocation2 + $0x38] sm:$0xff] %v1470_v8 }
  0x2f PF: > { %v1112_v9 = vld [vmem:[%s1536_s3 + $0x70] sm:$0xf]  ;;  %v1340_v10 = vld [vmem:[%s1536_s3 + $0x74] sm:$0xf0]  ;;  %v1104_v20 = vld [vmem:[%s1536_s3 + $0x60] sm:$0xf] }
  0x30   : > { %v1176_v11 = vld [vmem:[%s1536_s3 + $0xf0] sm:$0xf]  ;;  %v1113_v12 = vor.u32 %v1340_v10, %v1112_v9  ;;  %v1356_v13 = vld [vmem:[%s1536_s3 + $0xf4] sm:$0xf0]  ;;  %v1338_v22 = vld [vmem:[%s1536_s3 + $0x64] sm:$0xf0] }
  0x31   : > { %v1240_v14 = vld [vmem:[%s1536_s3 + $0x170] sm:$0xf]  ;;  %v1372_v15 = vld [vmem:[%s1536_s3 + $0x174] sm:$0xf0]  ;;  %v1177_v16 = vor.u32 %v1356_v13, %v1176_v11  ;;  %v1168_v23 = vld [vmem:[%s1536_s3 + $0xe0] sm:$0xf]  ;;  %v1105_v25 = vor.u32 %v1338_v22, %v1104_v20 }
  0x32   : > { %v1241_v17 = vor.u32 %v1372_v15, %v1240_v14  ;;  %v1304_v18 = vld [vmem:[%s1536_s3 + $0x1f0] sm:$0xf]  ;;  %v1388_v19 = vld [vmem:[%s1536_s3 + $0x1f4] sm:$0xf0]  ;;  %711 = vmatpush.bf16.msra.mxu0 %v1113_v12  ;;  %v1354_v24 = vld [vmem:[%s1536_s3 + $0xe4] sm:$0xf0] }
  0x33   : > { %v1305_v21 = vor.u32 %v1388_v19, %v1304_v18  ;;  %730 = vmatpush.bf16.msra.mxu1 %v1177_v16  ;;  %v1169_v26 = vor.u32 %v1354_v24, %v1168_v23  ;;  %v1232_v27 = vld [vmem:[%s1536_s3 + $0x160] sm:$0xf]  ;;  %v1370_v28 = vld [vmem:[%s1536_s3 + $0x164] sm:$0xf0]  ;;  %v1096_v32 = vld [vmem:[%s1536_s3 + $0x50] sm:$0xf] }
  0x34   : > { %749 = vmatpush.bf16.msra.mxu2 %v1241_v17  ;;  %v1296_v29 = vld [vmem:[%s1536_s3 + $0x1e0] sm:$0xf]  ;;  %v1233_v30 = vor.u32 %v1370_v28, %v1232_v27  ;;  %v1386_v31 = vld [vmem:[%s1536_s3 + $0x1e4] sm:$0xf0]  ;;  %v1336_v33 = vld [vmem:[%s1536_s3 + $0x54] sm:$0xf0] }
  0x35   : > { %768 = vmatpush.bf16.msra.mxu3 %v1305_v21  ;;  %v1297_v34 = vor.u32 %v1386_v31, %v1296_v29  ;;  %v1160_v35 = vld [vmem:[%s1536_s3 + $0xd0] sm:$0xf]  ;;  %v1352_v36 = vld [vmem:[%s1536_s3 + $0xd4] sm:$0xf0]  ;;  %v1097_v38 = vor.u32 %v1336_v33, %v1096_v32  ;;  %v1088_v44 = vld [vmem:[%s1536_s3 + $0x40] sm:$0xf] }
  0x36   : > { %v1224_v37 = vld [vmem:[%s1536_s3 + $0x150] sm:$0xf]  ;;  %712 = vmatpush.bf16.msra.mxu0 %v1105_v25  ;;  %v1368_v39 = vld [vmem:[%s1536_s3 + $0x154] sm:$0xf0]  ;;  %v1161_v42 = vor.u32 %v1352_v36, %v1160_v35  ;;  %v1334_v45 = vld [vmem:[%s1536_s3 + $0x44] sm:$0xf0] }
  0x37   : > { %v1288_v40 = vld [vmem:[%s1536_s3 + $0x1d0] sm:$0xf]  ;;  %v1384_v41 = vld [vmem:[%s1536_s3 + $0x1d4] sm:$0xf0]  ;;  %731 = vmatpush.bf16.msra.mxu1 %v1169_v26  ;;  %v1225_v43 = vor.u32 %v1368_v39, %v1224_v37  ;;  %v1152_v46 = vld [vmem:[%s1536_s3 + $0xc0] sm:$0xf]  ;;  %v1089_v53 = vor.u32 %v1334_v45, %v1088_v44 }
  0x38   : > { %750 = vmatpush.bf16.msra.mxu2 %v1233_v30  ;;  %v1289_v47 = vor.u32 %v1384_v41, %v1288_v40  ;;  %v1350_v48 = vld [vmem:[%s1536_s3 + $0xc4] sm:$0xf0]  ;;  %v1216_v49 = vld [vmem:[%s1536_s3 + $0x140] sm:$0xf]  ;;  %v1080_v56 = vld [vmem:[%s1536_s3 + $0x30] sm:$0xf] }
  0x39   : > { %769 = vmatpush.bf16.msra.mxu3 %v1297_v34  ;;  %v1366_v50 = vld [vmem:[%s1536_s3 + $0x144] sm:$0xf0]  ;;  %v1280_v51 = vld [vmem:[%s1536_s3 + $0x1c0] sm:$0xf]  ;;  %v1153_v54 = vor.u32 %v1350_v48, %v1152_v46  ;;  %v1332_v57 = vld [vmem:[%s1536_s3 + $0x34] sm:$0xf0] }
  0x3a   : > { %v1382_v52 = vld [vmem:[%s1536_s3 + $0x1c4] sm:$0xf0]  ;;  %713 = vmatpush.bf16.msra.mxu0 %v1097_v38  ;;  %v1217_v55 = vor.u32 %v1366_v50, %v1216_v49  ;;  %v1144_v58 = vld [vmem:[%s1536_s3 + $0xb0] sm:$0xf]  ;;  %v1348_v60 = vld [vmem:[%s1536_s3 + $0xb4] sm:$0xf0]  ;;  %v1081_v1 = vor.u32 %v1332_v57, %v1080_v56 }
  0x3b   : > { %732 = vmatpush.bf16.msra.mxu1 %v1161_v42  ;;  %v1281_v59 = vor.u32 %v1382_v52, %v1280_v51  ;;  %v1208_v61 = vld [vmem:[%s1536_s3 + $0x130] sm:$0xf]  ;;  %v1364_v62 = vld [vmem:[%s1536_s3 + $0x134] sm:$0xf0]  ;;  %v1145_v2 = vor.u32 %v1348_v60, %v1144_v58  ;;  %v1072_v4 = vld [vmem:[%s1536_s3 + $0x20] sm:$0xf] }
  0x3c   : > { %751 = vmatpush.bf16.msra.mxu2 %v1225_v43  ;;  %v1272_v63 = vld [vmem:[%s1536_s3 + $0x1b0] sm:$0xf]  ;;  %v1380_v0 = vld [vmem:[%s1536_s3 + $0x1b4] sm:$0xf0]  ;;  %v1209_v3 = vor.u32 %v1364_v62, %v1208_v61  ;;  %v1330_v5 = vld [vmem:[%s1536_s3 + $0x24] sm:$0xf0] }
  0x3d   : > { %770 = vmatpush.bf16.msra.mxu3 %v1289_v47  ;;  %v1136_v6 = vld [vmem:[%s1536_s3 + $0xa0] sm:$0xf]  ;;  %v1273_v7 = vor.u32 %v1380_v0, %v1272_v63  ;;  %v1346_v8 = vld [vmem:[%s1536_s3 + $0xa4] sm:$0xf0]  ;;  %v1073_v13 = vor.u32 %v1330_v5, %v1072_v4  ;;  %v1064_v16 = vld [vmem:[%s1536_s3 + $0x10] sm:$0xf] }
  0x3e   : > { %714 = vmatpush.bf16.msra.mxu0 %v1089_v53  ;;  %v1200_v9 = vld [vmem:[%s1536_s3 + $0x120] sm:$0xf]  ;;  %v1362_v10 = vld [vmem:[%s1536_s3 + $0x124] sm:$0xf0]  ;;  %v1137_v14 = vor.u32 %v1346_v8, %v1136_v6  ;;  %v1328_v17 = vld [vmem:[%s1536_s3 + $0x14] sm:$0xf0] }
  0x3f   : > { %733 = vmatpush.bf16.msra.mxu1 %v1153_v54  ;;  %v1264_v11 = vld [vmem:[%s1536_s3 + $0x1a0] sm:$0xf]  ;;  %v1378_v12 = vld [vmem:[%s1536_s3 + $0x1a4] sm:$0xf0]  ;;  %v1201_v15 = vor.u32 %v1362_v10, %v1200_v9  ;;  %v1128_v18 = vld [vmem:[%s1536_s3 + $0x90] sm:$0xf]  ;;  %v1065_v26 = vor.u32 %v1328_v17, %v1064_v16 }
  0x40   : > { %752 = vmatpush.bf16.msra.mxu2 %v1217_v55  ;;  %v1265_v19 = vor.u32 %v1378_v12, %v1264_v11  ;;  %v1344_v20 = vld [vmem:[%s1536_s3 + $0x94] sm:$0xf0]  ;;  %v1192_v21 = vld [vmem:[%s1536_s3 + $0x110] sm:$0xf]  ;;  %v1056_v25 = vld [vmem:[%s1536_s3] sm:$0xf] }
  0x41   : > { %771 = vmatpush.bf16.msra.mxu3 %v1281_v59  ;;  %v1360_v22 = vld [vmem:[%s1536_s3 + $0x114] sm:$0xf0]  ;;  %v1256_v23 = vld [vmem:[%s1536_s3 + $0x190] sm:$0xf]  ;;  %v1326_v27 = vld [vmem:[%s1536_s3 + $0x4] sm:$0xf0]  ;;  %v1129_v30 = vor.u32 %v1344_v20, %v1128_v18 }
  0x42   : > { %715 = vmatpush.bf16.msra.mxu0 %v1081_v1  ;;  %v1376_v24 = vld [vmem:[%s1536_s3 + $0x194] sm:$0xf0]  ;;  %v1120_v28 = vld [vmem:[%s1536_s3 + $0x80] sm:$0xf]  ;;  %v1342_v29 = vld [vmem:[%s1536_s3 + $0x84] sm:$0xf0]  ;;  %v1193_v31 = vor.u32 %v1360_v22, %v1192_v21  ;;  %v1057_v43 = vor.u32 %v1326_v27, %v1056_v25 }
  0x43   : > { %734 = vmatpush.bf16.msra.mxu1 %v1145_v2  ;;  %v1184_v32 = vld [vmem:[%s1536_s3 + $0x100] sm:$0xf]  ;;  %v1358_v33 = vld [vmem:[%s1536_s3 + $0x104] sm:$0xf0]  ;;  %v1257_v35 = vor.u32 %v1376_v24, %v1256_v23  ;;  %v1319_v38 = vld [vmem:[%s1538_s4 + $0xc] sm:$0xf0]  ;;  %v1121_v47 = vor.u32 %v1342_v29, %v1120_v28 }
  0x44   : > { %753 = vmatpush.bf16.msra.mxu2 %v1209_v3  ;;  %v1248_v34 = vld [vmem:[%s1536_s3 + $0x180] sm:$0xf]  ;;  %v1374_v36 = vld [vmem:[%s1536_s3 + $0x184] sm:$0xf0]  ;;  %v1317_v39 = vld [vmem:[%s1538_s4 + $0x4] sm:$0xf]  ;;  %v1185_v48 = vor.u32 %v1358_v33, %v1184_v32 }
  0x45   : > { %772 = vmatpush.bf16.msra.mxu3 %v1273_v7  ;;  %v1024_v37 = vld [vmem:[%s1538_s4] sm:$0xf]  ;;  %v1026_v40 = vld [vmem:[%s1538_s4 + $0x10] sm:$0xf0]  ;;  %v1242_v42 = vld [vmem:[%s1536_s3 + $0x178] sm:$0xf0]  ;;  %v1249_v52 = vor.u32 %v1374_v36, %v1248_v34 }
  0x46   : > { %716 = vmatpush.bf16.msra.mxu0 %v1073_v13  ;;  %v1371_v41 = vld [vmem:[%s1536_s3 + $0x174] sm:$0xf]  ;;  %v1032_v44 = vld [vmem:[%s1538_s4 + $0x8] sm:$0xf]  ;;  %v1178_v46 = vld [vmem:[%s1536_s3 + $0xf8] sm:$0xf0]  ;;  %v1620_v57 = vor.u32 %v1319_v38, %v1024_v37  ;;  %v1625_v62 = vor.u32 %v1317_v39, %v1026_v40 }
  0x47   : > { %735 = vmatpush.bf16.msra.mxu1 %v1137_v14  ;;  %v1355_v45 = vld [vmem:[%s1536_s3 + $0xf4] sm:$0xf]  ;;  %v1320_v49 = vld [vmem:[%s1538_s4 + $0x14] sm:$0xf0]  ;;  %v1318_v50 = vld [vmem:[%s1538_s4 + $0xc] sm:$0xf]  ;;  %v1245_v53 = vor.u32 %v1371_v41, %v1242_v42 }
  0x48   : > { %754 = vmatpush.bf16.msra.mxu2 %v1201_v15  ;;  %v1034_v51 = vld [vmem:[%s1538_s4 + $0x18] sm:$0xf0]  ;;  %v1339_v54 = vld [vmem:[%s1536_s3 + $0x74] sm:$0xf]  ;;  %v1181_v58 = vor.u32 %v1355_v45, %v1178_v46  ;;  %v1369_v60 = vld [vmem:[%s1536_s3 + $0x164] sm:$0xf]  ;;  %v1627_v63 = vor.u32 %v1320_v49, %v1032_v44 }
  0x49   : > { %773 = vmatpush.bf16.msra.mxu3 %v1265_v19  ;;  %v1114_v55 = vld [vmem:[%s1536_s3 + $0x78] sm:$0xf0]  ;;  %v1387_v56 = vld [vmem:[%s1536_s3 + $0x1f4] sm:$0xf]  ;;  %v1234_v61 = vld [vmem:[%s1536_s3 + $0x168] sm:$0xf0]  ;;  %v1631_v2 = vor.u32 %v1318_v50, %v1034_v51 }
  0x4a   : > { %717 = vmatpush.bf16.msra.mxu0 %v1065_v26  ;;  %v1306_v59 = vld [vmem:[%s1536_s3 + $0x1f8] sm:$0xf0]  ;;  %v1353_v0 = vld [vmem:[%s1536_s3 + $0xe4] sm:$0xf]  ;;  %v1170_v1 = vld [vmem:[%s1536_s3 + $0xe8] sm:$0xf0]  ;;  %v1117_v3 = vor.u32 %v1339_v54, %v1114_v55  ;;  %v1237_v5 = vor.u32 %v1369_v60, %v1234_v61 }
  0x4b   : > { %736 = vmatpush.bf16.msra.mxu1 %v1129_v30  ;;  %v1309_v4 = vor.u32 %v1387_v56, %v1306_v59  ;;  %v1337_v6 = vld [vmem:[%s1536_s3 + $0x64] sm:$0xf]  ;;  %v1106_v7 = vld [vmem:[%s1536_s3 + $0x68] sm:$0xf0]  ;;  %v1173_v9 = vor.u32 %v1353_v0, %v1170_v1  ;;  %v1367_v11 = vld [vmem:[%s1536_s3 + $0x154] sm:$0xf] }
  0x4c   : > { %755 = vmatpush.bf16.msra.mxu2 %v1193_v31  ;;  %v1385_v8 = vld [vmem:[%s1536_s3 + $0x1e4] sm:$0xf]  ;;  %v1298_v10 = vld [vmem:[%s1536_s3 + $0x1e8] sm:$0xf0]  ;;  %v1226_v12 = vld [vmem:[%s1536_s3 + $0x158] sm:$0xf0]  ;;  %v1109_v15 = vor.u32 %v1337_v6, %v1106_v7 }
  0x4d   : > { %774 = vmatpush.bf16.msra.mxu3 %v1257_v35  ;;  %v1351_v13 = vld [vmem:[%s1536_s3 + $0xd4] sm:$0xf]  ;;  %v1162_v14 = vld [vmem:[%s1536_s3 + $0xd8] sm:$0xf0]  ;;  %v1301_v16 = vor.u32 %v1385_v8, %v1298_v10  ;;  %v1229_v17 = vor.u32 %v1367_v11, %v1226_v12  ;;  %v1365_v23 = vld [vmem:[%s1536_s3 + $0x144] sm:$0xf] }
  0x4e   : > { %718 = vmatpush.bf16.msra.mxu0 %v1057_v43  ;;  %v1335_v18 = vld [vmem:[%s1536_s3 + $0x54] sm:$0xf]  ;;  %v1098_v19 = vld [vmem:[%s1536_s3 + $0x58] sm:$0xf0]  ;;  %v1165_v21 = vor.u32 %v1351_v13, %v1162_v14  ;;  %v1218_v24 = vld [vmem:[%s1536_s3 + $0x148] sm:$0xf0] }
  0x4f   : > { %737 = vmatpush.bf16.msra.mxu1 %v1121_v47  ;;  %v1383_v20 = vld [vmem:[%s1536_s3 + $0x1d4] sm:$0xf]  ;;  %v1290_v22 = vld [vmem:[%s1536_s3 + $0x1d8] sm:$0xf0]  ;;  %v1349_v25 = vld [vmem:[%s1536_s3 + $0xc4] sm:$0xf]  ;;  %v1101_v27 = vor.u32 %v1335_v18, %v1098_v19  ;;  %v1221_v32 = vor.u32 %v1365_v23, %v1218_v24 }
  0x50   : > { %756 = vmatpush.bf16.msra.mxu2 %v1185_v48  ;;  %v1154_v26 = vld [vmem:[%s1536_s3 + $0xc8] sm:$0xf0]  ;;  %v1333_v28 = vld [vmem:[%s1536_s3 + $0x44] sm:$0xf]  ;;  %v1293_v31 = vor.u32 %v1383_v20, %v1290_v22  ;;  %v1040_v34 = vld [vmem:[%s1538_s4 + $0x20] sm:$0xf] }
  0x51   : > { %775 = vmatpush.bf16.msra.mxu3 %v1249_v52  ;;  %719 = vmatmul.bf16.vlgmr.msra.gmra.mxu0 %v1620_v57  ;;  %v1090_v29 = vld [vmem:[%s1536_s3 + $0x48] sm:$0xf0]  ;;  %v1381_v30 = vld [vmem:[%s1536_s3 + $0x1c4] sm:$0xf]  ;;  %v1323_v35 = vld [vmem:[%s1538_s4 + $0x2c] sm:$0xf0]  ;;  %v1157_v36 = vor.u32 %v1349_v25, %v1154_v26 }
  0x52   : > { %738 = vmatmul.bf16.vlgmr.msra.gmra.mxu1 %v1625_v62  ;;  %787 = vmatpush.bf16.msrb.mxu0 %v1117_v3  ;;  %v1282_v33 = vld [vmem:[%s1536_s3 + $0x1c8] sm:$0xf0]  ;;  %v1321_v37 = vld [vmem:[%s1538_s4 + $0x24] sm:$0xf]  ;;  %v1042_v38 = vld [vmem:[%s1538_s4 + $0x30] sm:$0xf0]  ;;  %v1093_v44 = vor.u32 %v1333_v28, %v1090_v29 }
  0x53   : > { %806 = vmatpush.bf16.msrb.mxu1 %v1181_v58  ;;  %757 = vmatmul.bf16.vlgmr.msra.gmra.mxu2 %v1627_v63  ;;  %v1363_v39 = vld [vmem:[%s1536_s3 + $0x134] sm:$0xf]  ;;  %v1210_v40 = vld [vmem:[%s1536_s3 + $0x138] sm:$0xf0]  ;;  %v1048_v41 = vld [vmem:[%s1538_s4 + $0x28] sm:$0xf]  ;;  %v1285_v48 = vor.u32 %v1381_v30, %v1282_v33  ;;  %v1677_v59 = vor.u32 %v1321_v37, %v1042_v38 }
  0x54   : > { %825 = vmatpush.bf16.msrb.mxu2 %v1245_v53  ;;  %776 = vmatmul.bf16.vlgmr.msra.gmra.mxu3 %v1631_v2  ;;  %v1347_v42 = vld [vmem:[%s1536_s3 + $0xb4] sm:$0xf]  ;;  %v1146_v43 = vld [vmem:[%s1536_s3 + $0xb8] sm:$0xf0]  ;;  %v1324_v45 = vld [vmem:[%s1538_s4 + $0x34] sm:$0xf0]  ;;  %v1213_v49 = vor.u32 %v1363_v39, %v1210_v40  ;;  %v1672_v53 = vor.u32 %v1323_v35, %v1040_v34 }
  0x55   : > { %844 = vmatpush.bf16.msrb.mxu3 %v1309_v4  ;;  %v1322_v46 = vld [vmem:[%s1538_s4 + $0x2c] sm:$0xf]  ;;  %v1050_v47 = vld [vmem:[%s1538_s4 + $0x38] sm:$0xf0]  ;;  %v1331_v50 = vld [vmem:[%s1536_s3 + $0x34] sm:$0xf]  ;;  %v1149_v54 = vor.u32 %v1347_v42, %v1146_v43  ;;  %v1679_v60 = vor.u32 %v1324_v45, %v1048_v41 }
  0x56   : > { %788 = vmatpush.bf16.msrb.mxu0 %v1109_v15  ;;  %v1082_v51 = vld [vmem:[%s1536_s3 + $0x38] sm:$0xf0]  ;;  %v1379_v52 = vld [vmem:[%s1536_s3 + $0x1b4] sm:$0xf]  ;;  %v1361_v56 = vld [vmem:[%s1536_s3 + $0x124] sm:$0xf]  ;;  %v1053_v1 = vor.u32 %v1322_v46, %v1050_v47 }
  0x57   : > { %807 = vmatpush.bf16.msrb.mxu1 %v1173_v9  ;;  %v1274_v55 = vld [vmem:[%s1536_s3 + $0x1b8] sm:$0xf0]  ;;  %v1202_v58 = vld [vmem:[%s1536_s3 + $0x128] sm:$0xf0]  ;;  %v1345_v61 = vld [vmem:[%s1536_s3 + $0xa4] sm:$0xf]  ;;  %v1085_v3 = vor.u32 %v1331_v50, %v1082_v51 }
  0x58   : > { %826 = vmatpush.bf16.msrb.mxu2 %v1237_v5  ;;  %v1138_v0 = vld [vmem:[%s1536_s3 + $0xa8] sm:$0xf0]  ;;  %v1277_v4 = vor.u32 %v1379_v52, %v1274_v55  ;;  %v1205_v5 = vor.u32 %v1361_v56, %v1202_v58  ;;  %v1329_v6 = vld [vmem:[%s1536_s3 + $0x24] sm:$0xf]  ;;  %v1359_v11 = vld [vmem:[%s1536_s3 + $0x114] sm:$0xf] }
  0x59   : > { %845 = vmatpush.bf16.msrb.mxu3 %v1301_v16  ;;  %v1074_v7 = vld [vmem:[%s1536_s3 + $0x28] sm:$0xf0]  ;;  %v1377_v8 = vld [vmem:[%s1536_s3 + $0x1a4] sm:$0xf]  ;;  %v1141_v9 = vor.u32 %v1345_v61, %v1138_v0  ;;  %v1194_v12 = vld [vmem:[%s1536_s3 + $0x118] sm:$0xf0] }
  0x5a   : > { %789 = vmatpush.bf16.msrb.mxu0 %v1101_v27  ;;  %v1266_v10 = vld [vmem:[%s1536_s3 + $0x1a8] sm:$0xf0]  ;;  %v1343_v13 = vld [vmem:[%s1536_s3 + $0x94] sm:$0xf]  ;;  %v1130_v14 = vld [vmem:[%s1536_s3 + $0x98] sm:$0xf0]  ;;  %v1077_v15 = vor.u32 %v1329_v6, %v1074_v7 }
  0x5b   : > { %808 = vmatpush.bf16.msrb.mxu1 %v1165_v21  ;;  %v1269_v16 = vor.u32 %v1377_v8, %v1266_v10  ;;  %v1327_v18 = vld [vmem:[%s1536_s3 + $0x14] sm:$0xf]  ;;  %v1066_v19 = vld [vmem:[%s1536_s3 + $0x18] sm:$0xf0]  ;;  %v1133_v21 = vor.u32 %v1343_v13, %v1130_v14  ;;  %v1357_v23 = vld [vmem:[%s1536_s3 + $0x104] sm:$0xf] }
  0x5c   : > { %827 = vmatpush.bf16.msrb.mxu2 %v1229_v17  ;;  %v1197_v17 = vor.u32 %v1359_v11, %v1194_v12  ;;  %v1375_v20 = vld [vmem:[%s1536_s3 + $0x194] sm:$0xf]  ;;  %v1258_v22 = vld [vmem:[%s1536_s3 + $0x198] sm:$0xf0]  ;;  %v1186_v24 = vld [vmem:[%s1536_s3 + $0x108] sm:$0xf0]  ;;  %v1069_v27 = vor.u32 %v1327_v18, %v1066_v19 }
  0x5d   : > { %846 = vmatpush.bf16.msrb.mxu3 %v1293_v31  ;;  %v1341_v25 = vld [vmem:[%s1536_s3 + $0x84] sm:$0xf]  ;;  %v1122_v26 = vld [vmem:[%s1536_s3 + $0x88] sm:$0xf0]  ;;  %v1261_v28 = vor.u32 %v1375_v20, %v1258_v22  ;;  %v1189_v29 = vor.u32 %v1357_v23, %v1186_v24  ;;  %v271_v43 = vld [vmem:[#allocation2 + $0x30] sm:$0xff]  ;;  %p1310_p11 = scmp.ne.s32.totalorder %s1460_s11, 3 }
  0x5e   : > { %790 = vmatpush.bf16.msrb.mxu0 %v1093_v44  ;;  %v1325_v30 = vld [vmem:[%s1536_s3 + $0x4] sm:$0xf]  ;;  %v1058_v31 = vld [vmem:[%s1536_s3 + $0x8] sm:$0xf0]  ;;  %v274_v24 = vld [vmem:[#allocation2 + $0x10] sm:$0xff] }
  0x5f   : > { %809 = vmatpush.bf16.msrb.mxu1 %v1157_v36  ;;  %v1373_v33 = vld [vmem:[%s1536_s3 + $0x184] sm:$0xf]  ;;  %v1250_v34 = vld [vmem:[%s1536_s3 + $0x188] sm:$0xf0]  ;;  %v1061_v35 = vor.u32 %v1325_v30, %v1058_v31 }
  0x60   : > { %828 = vmatpush.bf16.msrb.mxu2 %v1221_v32  ;;  %v1125_v32 = vor.u32 %v1341_v25, %v1122_v26  ;;  %v1253_v36 = vor.u32 %v1373_v33, %v1250_v34  ;;  %v277_v6 = vld [vmem:[#allocation2 + $0x28] sm:$0xff]  ;;  %v276_v33 = vld [vmem:[#allocation2 + $0x20] sm:$0xff] }
  0x61   : > { %847 = vmatpush.bf16.msrb.mxu3 %v1285_v48  ;;  %724 = vmatmul.bf16.gmra.mxu0 %v1672_v53 }
  0x62   : > { %743 = vmatmul.bf16.gmra.mxu1 %v1677_v59  ;;  %791 = vmatpush.bf16.msrb.mxu0 %v1085_v3 }
  0x63   : > { %810 = vmatpush.bf16.msrb.mxu1 %v1149_v54  ;;  %762 = vmatmul.bf16.gmra.mxu2 %v1679_v60 }
  0x64   : > { %829 = vmatpush.bf16.msrb.mxu2 %v1213_v49  ;;  %781 = vmatmul.bf16.gmra.mxu3 %v1053_v1  ;;  %v273_v49 = vld [vmem:[#allocation2 + $0x18] sm:$0xff] }
  0x65   : > { %848 = vmatpush.bf16.msrb.mxu3 %v1277_v4 }
  0x66   : > { %792 = vmatpush.bf16.msrb.mxu0 %v1077_v15 }
  0x67   : > { %811 = vmatpush.bf16.msrb.mxu1 %v1141_v9 }
  0x68   : > { %830 = vmatpush.bf16.msrb.mxu2 %v1205_v5 }
  0x69   : > { %849 = vmatpush.bf16.msrb.mxu3 %v1269_v16 }
  0x6a   : > { %793 = vmatpush.bf16.msrb.mxu0 %v1069_v27 }
  0x6b   : > { %812 = vmatpush.bf16.msrb.mxu1 %v1133_v21 }
  0x6c   : > { %831 = vmatpush.bf16.msrb.mxu2 %v1197_v17  ;;  %v272_v17 = vld [vmem:[#allocation2] sm:$0xff] }
  0x6d   : > { %850 = vmatpush.bf16.msrb.mxu3 %v1261_v28 }
  0x6e   : > { %794 = vmatpush.bf16.msrb.mxu0 %v1061_v35 }
  0x6f   : > { %813 = vmatpush.bf16.msrb.mxu1 %v1125_v32 }
  0x70   : > { %832 = vmatpush.bf16.msrb.mxu2 %v1189_v29 }
  0x71   : > { %851 = vmatpush.bf16.msrb.mxu3 %v1253_v36  ;;  %795 = vmatmul.bf16.vlgmr.msrb.gmra.mxu0 %v1620_v57 }
  0x72   : > { %814 = vmatmul.bf16.vlgmr.msrb.gmra.mxu1 %v1625_v62 }
  0x73   : > { %833 = vmatmul.bf16.vlgmr.msrb.gmra.mxu2 %v1627_v63 }
  0x74   : > { %852 = vmatmul.bf16.vlgmr.msrb.gmra.mxu3 %v1631_v2 }
  0x81   : > { %800 = vmatmul.bf16.gmra.mxu0 %v1672_v53 }
  0x82   : > { %819 = vmatmul.bf16.gmra.mxu1 %v1677_v59  ;;  %v275_v59 = vld [vmem:[#allocation2 + $0x8] sm:$0xff] }
  0x83   : > { %838 = vmatmul.bf16.gmra.mxu2 %v1679_v60 }
  0x84   : > { %857 = vmatmul.bf16.gmra.mxu3 %v1053_v1 }
  0xce   : > { %v720_v37 = vpop.f32.mrf.mxu0 }
  0xcf   : > { %v739_v38 = vpop.f32.mrf.mxu1 }
  0xd0   : > { %v740_v39 = vadd.f32 %v739_v38, %v720_v37 }
  0xd6   : > { %v758_v40 = vpop.f32.mrf.mxu2  ;;  %v722_v57 = vpop.f32.mrf.mxu0 }
  0xd7   : > { %v759_v41 = vadd.f32 %v758_v40, %v740_v39  ;;  %v777_v42 = vpop.f32.mrf.mxu3  ;;  %v741_v62 = vpop.f32.mrf.mxu1 }
  0xd8   : > { %v742_v2 = vadd.f32 %v741_v62, %v722_v57 }
  0xd9   : > { %v778_v44 = vadd.f32 %v777_v42, %v759_v41  ;;  %v278_v41 = vld [vmem:[#allocation2 + $0x38] sm:$0xff] }
  0xdb   : > { %v863_v63 = vadd.f32 %v778_v44, %v271_v43 }
  0xdd   : > { %871 = vst [vmem:[#allocation2 + $0x30] sm:$0xff] %v863_v63 }
  0xde   : > { %v760_v45 = vpop.f32.mrf.mxu2  ;;  %v725_v48 = vpop.f32.mrf.mxu0 }
  0xdf   : > { %v761_v46 = vadd.f32 %v760_v45, %v742_v2  ;;  %v779_v47 = vpop.f32.mrf.mxu3  ;;  %v744_v50 = vpop.f32.mrf.mxu1 }
  0xe0   : > { %v745_v53 = vadd.f32 %v744_v50, %v725_v48 }
  0xe1   : > { %v780_v51 = vadd.f32 %v779_v47, %v761_v46 }
  0xe3   : > { %v865_v52 = vadd.f32 %v780_v51, %v273_v49 }
  0xe5   : > { %873 = vst [vmem:[#allocation2 + $0x18] sm:$0xff] %v865_v52 }
  0xe6   : > { %v763_v54 = vpop.f32.mrf.mxu2  ;;  %v727_v58 = vpop.f32.mrf.mxu0 }
  0xe7   : > { %v764_v55 = vadd.f32 %v763_v54, %v745_v53  ;;  %v782_v56 = vpop.f32.mrf.mxu3  ;;  %v746_v60 = vpop.f32.mrf.mxu1 }
  0xe8   : > { %v747_v1 = vadd.f32 %v746_v60, %v727_v58 }
  0xe9   : > { %v783_v61 = vadd.f32 %v782_v56, %v764_v55 }
  0xeb   : > { %v867_v0 = vadd.f32 %v783_v61, %v275_v59 }
  0xed   : > { %875 = vst [vmem:[#allocation2 + $0x8] sm:$0xff] %v867_v0 }
  0xee   : > { %v765_v3 = vpop.f32.mrf.mxu2  ;;  %v796_v7 = vpop.f32.mrf.mxu0 }
  0xef   : > { %v766_v4 = vadd.f32 %v765_v3, %v747_v1  ;;  %v784_v5 = vpop.f32.mrf.mxu3  ;;  %v815_v8 = vpop.f32.mrf.mxu1 }
  0xf0   : > { %v816_v11 = vadd.f32 %v815_v8, %v796_v7 }
  0xf1   : > { %v785_v9 = vadd.f32 %v784_v5, %v766_v4 }
  0xf3   : > { %v869_v10 = vadd.f32 %v785_v9, %v277_v6 }
  0xf5   : > { %877 = vst [vmem:[#allocation2 + $0x28] sm:$0xff] %v869_v10 }
  0xf6   : > { %v834_v12 = vpop.f32.mrf.mxu2  ;;  %v798_v15 = vpop.f32.mrf.mxu0 }
  0xf7   : > { %v853_v13 = vpop.f32.mrf.mxu3  ;;  %v835_v14 = vadd.f32 %v834_v12, %v816_v11  ;;  %v817_v16 = vpop.f32.mrf.mxu1 }
  0xf8   : > { %v818_v20 = vadd.f32 %v817_v16, %v798_v15 }
  0xf9   : > { %v854_v18 = vadd.f32 %v853_v13, %v835_v14 }
  0xfb   : > { %v864_v19 = vadd.f32 %v854_v18, %v272_v17 }
  0xfd   : > { %872 = vst [vmem:[#allocation2] sm:$0xff] %v864_v19 }
  0xfe   : > { %v836_v21 = vpop.f32.mrf.mxu2  ;;  %v801_v25 = vpop.f32.mrf.mxu0 }
  0xff   : > { %v855_v22 = vpop.f32.mrf.mxu3  ;;  %v837_v23 = vadd.f32 %v836_v21, %v818_v20  ;;  %v820_v26 = vpop.f32.mrf.mxu1 }
 0x100   : > { %v821_v29 = vadd.f32 %v820_v26, %v801_v25 }
 0x101   : > { %v856_v27 = vadd.f32 %v855_v22, %v837_v23 }
 0x103   : > { %v866_v28 = vadd.f32 %v856_v27, %v274_v24 }
 0x105   : > { %874 = vst [vmem:[#allocation2 + $0x10] sm:$0xff] %v866_v28 }
 0x106   : > { %v839_v30 = vpop.f32.mrf.mxu2  ;;  %v803_v35 = vpop.f32.mrf.mxu0 }
 0x107   : > { %v858_v31 = vpop.f32.mrf.mxu3  ;;  %v840_v32 = vadd.f32 %v839_v30, %v821_v29  ;;  %v822_v36 = vpop.f32.mrf.mxu1 }
 0x108   : > { %v823_v38 = vadd.f32 %v822_v36, %v803_v35 }
 0x109   : > { %v859_v34 = vadd.f32 %v858_v31, %v840_v32 }
 0x10b   : > { %v868_v37 = vadd.f32 %v859_v34, %v276_v33 }
 0x10d   : > { %876 = vst [vmem:[#allocation2 + $0x20] sm:$0xff] %v868_v37 }
 0x10e   : > { %v841_v39 = vpop.f32.mrf.mxu2 }
 0x10f   : > { %v842_v40 = vadd.f32 %v841_v39, %v823_v38  ;;  %v860_v42 = vpop.f32.mrf.mxu3 }
 0x111   : > { %v861_v57 = vadd.f32 %v860_v42, %v842_v40  ;;  %882 = sbr.rel (%p1310_p11) target bundleno = 287 (0x11f), region = 59 }
 0x113   : > { %v870_v43 = vadd.f32 %v861_v57, %v278_v41 }
 0x115   : > { %878 = vst [vmem:[#allocation2 + $0x38] sm:$0xff] %v870_v43 }
 0x116   : > { %v883_v62 = vld [vmem:[#allocation2 + $0x30] sm:$0xff]  ;;  %v884_v44 = vld [vmem:[#allocation2] sm:$0xff]  ;;  %v885_v63 = vld [vmem:[#allocation2 + $0x18] sm:$0xff] }
 0x117   : > { %891 = vst [vmem:[%s1755_s2] sm:$0xff] %v883_v62  ;;  %v886_v2 = vld [vmem:[#allocation2 + $0x10] sm:$0xff]  ;;  %v887_v45 = vld [vmem:[#allocation2 + $0x8] sm:$0xff]  ;;  %v888_v46 = vld [vmem:[#allocation2 + $0x20] sm:$0xff] }
 0x118   : > { %892 = vst [vmem:[%s1755_s2 + $0x8] sm:$0xff] %v884_v44  ;;  %v889_v47 = vld [vmem:[#allocation2 + $0x28] sm:$0xff] }
 0x119   : > { %893 = vst [vmem:[%s1755_s2 + $0x10] sm:$0xff] %v885_v63 }
 0x11a   : > { %894 = vst [vmem:[%s1755_s2 + $0x18] sm:$0xff] %v886_v2 }
 0x11b   : > { %895 = vst [vmem:[%s1755_s2 + $0x20] sm:$0xff] %v887_v45 }
 0x11c   : > { %v890_v48 = vld [vmem:[#allocation2 + $0x38] sm:$0xff]  ;;  %896 = vst [vmem:[%s1755_s2 + $0x28] sm:$0xff] %v888_v46 }
 0x11d   : > { %897 = vst [vmem:[%s1755_s2 + $0x30] sm:$0xff] %v889_v47 }
 0x11e   : > { %898 = vst [vmem:[%s1755_s2 + $0x38] sm:$0xff] %v890_v48 }
 0x11f PF: > { %s12_s13 = sadd.s32 1, %s1468_s13   ;;  %s1756_s9 = smov %s1456_s10 }
 0x120   : > { %p9_p12 = scmp.ge.s32.totalorder %s12_s13, 6   ;;  %s1757_s10 = smov %s1521_s17 }
 0x121   : > { %s1758_s11 = smov %s1464_s12  ;;  %s1759_s12 = smov %s1761_s14 }
 0x122   :  { %11 = sbr.rel (!%p9_p12) target bundleno = 3 (0x3), region = 97 }

// kernel: discriminator_forward.14
= control target key start
LH: loop header
LB: loop body
LE: loop exit
PB: predicated region body
PF: predicated region fallthrough
CT: control target
= control target key end

     0   :  { %s419_s6 = smov 0   ;;  %s554_s0 = inlined_call_operand.vmem [shape: f32[2,9,512], index: 0, kind: input, shape index: {}]   ;;  %s555_s1 = inlined_call_operand.vmem [shape: f32[2,9,512], index: 1, kind: output, shape index: {}]  }
   0x1 LB: > { %s368_s7 = sadd.s32 4294967295, %s406_s6   ;;  %p372_p0 = scmp.ge.s32.totalorder %s406_s6, 1  ;;  %s406_s6 = sphi %s419_s6, %s11_s6  }
   0x2   : > { %p87_p1 = scmp.lt.s32.totalorder %s406_s6, 3 }
   0x4   : > { %p88_p2 = pnand %p372_p0, %p87_p1 }
   0x5   : > { %p107_p3 = scmp.lt.s32.totalorder (!%p88_p2), %s368_s7, 1 }
   0x6   : > { %91 = sbr.rel (%p88_p2) target bundleno = 80 (0x50), region = 24 }
   0xb   : > { %v408_v0 = vmov 9.0   ;;  %s557_s7 = smov (!%p107_p3, %s368_s7), 1  ;;  %vm125_vm0 = vcmask 1040384  }
   0xc   : > { %390 = vrcp.f32 %v408_v0  ;;  %s379_s8 = sshll.u32 %s557_s7, 6 }
   0xd   : > { %s435_s11 = scalar_lea.vmem %s554_s0, %s379_s8  ;;  %s537_s14 = scalar_lea.vmem %s555_s1, %s379_s8 }
   0xe   : > { %v438_v1 = vld [vmem:[%s435_s11] sm:$0xff]  ;;  %v444_v3 = vld [vmem:[%s435_s11 + $0x8] sm:$0xff]  ;;  %v458_v10 = vld [vmem:[%s435_s11 + $0x10] sm:$0xff] }
   0xf   : > { %v441_v2 = vld [vmem:[%s435_s11 + $0x20] sm:$0x1]  ;;  %v169_v6 = vmul.f32 %v438_v1, %v438_v1  ;;  %v453_v8 = vld [vmem:[%s435_s11 + $0x28] sm:$0x1]  ;;  %v170_v9 = vmul.f32 %v444_v3, %v444_v3  ;;  %v461_v11 = vld [vmem:[%s435_s11 + $0x30] sm:$0x1]  ;;  %v171_v26 = vmul.f32 %v458_v10, %v458_v10 }
  0x10   : > { %v126_v5 = vsel %vm125_vm0, %v441_v2, 0.0  ;;  %v173_v7 = vmul.f32 %v441_v2, %v441_v2  ;;  %v134_v14 = vsel %vm125_vm0, %v453_v8, 0.0  ;;  %v174_v17 = vmul.f32 %v453_v8, %v453_v8  ;;  %v474_v23 = vld [vmem:[%s435_s11 + $0x38] sm:$0x1] }
  0x11   : > { %v127_v12 = vadd.f32 %v126_v5, %v438_v1  ;;  %v135_v16 = vadd.f32 %v134_v14, %v444_v3  ;;  %v142_v18 = vsel %vm125_vm0, %v461_v11, 0.0  ;;  %v175_v27 = vmul.f32 %v461_v11, %v461_v11  ;;  %v482_v32 = vld [vmem:[%s435_s11 + $0x18] sm:$0xff] }
  0x12   : > { %v391_v4 = vpop.eup %390  ;;  %v177_v15 = vsel %vm125_vm0, %v173_v7, 0.0  ;;  %v143_v22 = vadd.f32 %v142_v18, %v458_v10  ;;  %v185_v25 = vsel %vm125_vm0, %v174_v17, 0.0  ;;  %v150_v36 = vsel %vm125_vm0, %v474_v23, 0.0 }
  0x13   : > { %v159_v13 = vmul.f32 9.0, %v391_v4  ;;  %vm163_vm1 = vweird.f32 %v391_v4  ;;  %v128_v19 = vrot.slane %v127_v12, 4  ;;  %v178_v21 = vadd.f32 %v177_v15, %v169_v6 }
  0x14   : > { %v136_v24 = vrot.slane %v135_v16, 4  ;;  %v186_v31 = vadd.f32 %v185_v25, %v170_v9  ;;  %v144_v34 = vrot.slane %v143_v22, 4  ;;  %v193_v35 = vsel %vm125_vm0, %v175_v27, 0.0 }
  0x15   : > { %v160_v20 = vsub.f32 1.0, %v159_v13  ;;  %v129_v28 = vadd.f32 %v128_v19, %v127_v12  ;;  %v179_v30 = vrot.slane %v178_v21, 4  ;;  %v194_v43 = vadd.f32 %v193_v35, %v171_v26 }
  0x16   : > { %v137_v33 = vadd.f32 %v136_v24, %v135_v16  ;;  %v187_v40 = vrot.slane %v186_v31, 4  ;;  %v145_v42 = vadd.f32 %v144_v34, %v143_v22  ;;  %v151_v44 = vadd.f32 %v150_v36, %v482_v32 }
  0x17   : > { %v161_v29 = vmul.f32 %v391_v4, %v160_v20  ;;  %v130_v37 = vrot.slane %v129_v28, 2  ;;  %v180_v39 = vadd.f32 %v179_v30, %v178_v21  ;;  %v195_v51 = vrot.slane %v194_v43, 4 }
  0x18   : > { %v138_v41 = vrot.slane %v137_v33, 2  ;;  %v188_v48 = vadd.f32 %v187_v40, %v186_v31  ;;  %v146_v50 = vrot.slane %v145_v42, 2  ;;  %v152_v52 = vrot.slane %v151_v44, 4 }
  0x19   : > { %v162_v38 = vadd.f32 %v391_v4, %v161_v29  ;;  %v131_v45 = vadd.f32 %v130_v37, %v129_v28  ;;  %v181_v47 = vrot.slane %v180_v39, 2  ;;  %v172_v56 = vmul.f32 %v482_v32, %v482_v32 }
  0x1a   : > { %v139_v49 = vadd.f32 %v138_v41, %v137_v33  ;;  %v189_v55 = vrot.slane %v188_v48, 2  ;;  %v147_v58 = vadd.f32 %v146_v50, %v145_v42  ;;  %v196_v59 = vadd.f32 %v195_v51, %v194_v43 }
  0x1b   : > { %v489_v46 = vsel %vm163_vm1, %v391_v4, %v162_v38  ;;  %v132_v53 = vrot.slane %v131_v45, 1  ;;  %v182_v54 = vadd.f32 %v181_v47, %v180_v39  ;;  %v153_v60 = vadd.f32 %v152_v52, %v151_v44 }
  0x1c   : > { %v140_v57 = vrot.slane %v139_v49, 1  ;;  %v190_v63 = vadd.f32 %v189_v55, %v188_v48  ;;  %v176_v0 = vmul.f32 %v474_v23, %v474_v23  ;;  %v148_v5 = vrot.slane %v147_v58, 1 }
  0x1d   : > { %v133_v61 = vadd.f32 %v132_v53, %v131_v45  ;;  %v183_v62 = vrot.slane %v182_v54, 1  ;;  %v197_v6 = vrot.slane %v196_v59, 2  ;;  %v154_v7 = vrot.slane %v153_v60, 2 }
  0x1e   : > { %v141_v4 = vadd.f32 %v140_v57, %v139_v49  ;;  %v191_v13 = vrot.slane %v190_v63, 1  ;;  %v201_v14 = vsel %vm125_vm0, %v176_v0, 0.0  ;;  %v149_v16 = vadd.f32 %v148_v5, %v147_v58 }
  0x1f   : > { %v496_v9 = vmul.f32 %v489_v46, %v133_v61  ;;  %v184_v12 = vadd.f32 %v183_v62, %v182_v54  ;;  %v198_v17 = vadd.f32 %v197_v6, %v196_v59  ;;  %v155_v18 = vadd.f32 %v154_v7, %v153_v60 }
  0x20   : > { %v500_v15 = vmul.f32 %v489_v46, %v141_v4  ;;  %v192_v21 = vadd.f32 %v191_v13, %v190_v63  ;;  %v508_v24 = vmul.f32 %v489_v46, %v149_v16  ;;  %v202_v28 = vadd.f32 %v201_v14, %v172_v56 }
  0x21   : > { %v209_v19 = vmul.f32 %v184_v12, %v489_v46  ;;  %v213_v20 = vmul.f32 %v496_v9, %v496_v9  ;;  %v199_v25 = vrot.slane %v198_v17, 1  ;;  %v156_v31 = vrot.slane %v155_v18, 1 }
  0x22   : > { %v214_v22 = vmul.f32 %v500_v15, %v500_v15  ;;  %v210_v27 = vmul.f32 %v192_v21, %v489_v46  ;;  %v215_v30 = vmul.f32 %v508_v24, %v508_v24  ;;  %v203_v35 = vrot.slane %v202_v28, 4 }
  0x23   : > { %v217_v26 = vsub.f32 %v209_v19, %v213_v20  ;;  %v200_v29 = vadd.f32 %v199_v25, %v198_v17  ;;  %v157_v39 = vadd.f32 %v156_v31, %v155_v18  ;;  %v221_v62 = vsub.f32 %v438_v1, %v496_v9 }
  0x24   : > { %v218_v34 = vsub.f32 %v210_v27, %v214_v22  ;;  %v204_v40 = vadd.f32 %v203_v35, %v202_v28  ;;  %v225_v0 = vsub.f32 %v441_v2, %v496_v9  ;;  %v226_v1 = vsub.f32 %v453_v8, %v500_v15 }
  0x25   : > { %v229_v33 = vadd.f32 1e-05, %v217_v26  ;;  %v211_v36 = vmul.f32 %v200_v29, %v489_v46  ;;  %v515_v43 = vmul.f32 %v489_v46, %v157_v39  ;;  %v223_v17 = vsub.f32 %v458_v10, %v508_v24 }
  0x26   : > { %v230_v37 = vadd.f32 1e-05, %v218_v34  ;;  %v205_v42 = vrot.slane %v204_v40, 2 }
  0x27   : > { %392 = vrsqrt.f32 %v229_v33  ;;  %v219_v38 = vsub.f32 %v211_v36, %v215_v30  ;;  %v216_v53 = vmul.f32 %v515_v43, %v515_v43  ;;  %vm239_vm2 = vweird.f32 %v229_v33 }
  0x28   : > { %394 = vrsqrt.f32 %v230_v37  ;;  %v206_v44 = vadd.f32 %v205_v42, %v204_v40  ;;  %vm249_vm4 = vweird.f32 %v230_v37  ;;  %v224_v39 = vsub.f32 %v482_v32, %v515_v43 }
  0x29   : > { %v231_v41 = vadd.f32 1e-05, %v219_v38  ;;  %v228_v40 = vsub.f32 %v474_v23, %v515_v43 }
  0x2a   : > { %v207_v48 = vrot.slane %v206_v44, 1 }
  0x2b   : > { %396 = vrsqrt.f32 %v231_v41  ;;  %vm259_vm8 = vweird.f32 %v231_v41 }
  0x2c   : > { %v208_v52 = vadd.f32 %v207_v48, %v206_v44 }
  0x2d   : > { %v393_v45 = vpop.eup %392 }
  0x2e   : > { %v234_v47 = vmul.f32 %v393_v45, %v229_v33  ;;  %v395_v49 = vpop.eup %394  ;;  %vm240_vm3 = vweird.f32 %v393_v45  ;;  %v212_v57 = vmul.f32 %v208_v52, %v489_v46  ;;  %v222_v46 = vsub.f32 %v444_v3, %v500_v15 }
  0x2f   : > { %v244_v51 = vmul.f32 %v395_v49, %v230_v37  ;;  %vm250_vm5 = vweird.f32 %v395_v49  ;;  %vm241_vm6 = vmor %vm239_vm2, %vm240_vm3  ;;  %v227_v3 = vsub.f32 %v461_v11, %v508_v24 }
  0x30   : > { %v235_v50 = vmul.f32 %v393_v45, %v234_v47  ;;  %v220_v61 = vsub.f32 %v212_v57, %v216_v53  ;;  %vm251_vm7 = vmor %vm249_vm4, %vm250_vm5 }
  0x31   : > { %v397_v54 = vpop.eup %396  ;;  %v245_v56 = vmul.f32 %v395_v49, %v244_v51 }
  0x32   : > { %v236_v55 = vmul.f32 0.5, %v235_v50  ;;  %v254_v58 = vmul.f32 %v397_v54, %v231_v41  ;;  %v232_v6 = vadd.f32 1e-05, %v220_v61  ;;  %vm260_vm9 = vweird.f32 %v397_v54 }
  0x33   : > { %v246_v60 = vmul.f32 0.5, %v245_v56  ;;  %vm261_vm10 = vmor %vm259_vm8, %vm260_vm9 }
  0x34   : > { %v237_v59 = vsub.f32 1.5, %v236_v55  ;;  %v255_v63 = vmul.f32 %v397_v54, %v254_v58  ;;  %398 = vrsqrt.f32 %v232_v6  ;;  %vm269_vm1 = vweird.f32 %v232_v6 }
  0x35   : > { %v247_v5 = vsub.f32 1.5, %v246_v60 }
  0x36   : > { %v238_v4 = vmul.f32 %v393_v45, %v237_v59  ;;  %v256_v7 = vmul.f32 0.5, %v255_v63 }
  0x37   : > { %v248_v13 = vmul.f32 %v395_v49, %v247_v5 }
  0x38   : > { %v242_v12 = vsel %vm241_vm6, %v393_v45, %v238_v4  ;;  %v257_v16 = vsub.f32 1.5, %v256_v7 }
  0x39   : > { %v273_v14 = vmul.f32 %v242_v12, %v221_v62  ;;  %v277_v2 = vmul.f32 %v242_v12, %v225_v0  ;;  %v252_v9 = vsel %vm251_vm7, %v395_v49, %v248_v13 }
  0x3a   : > { %v274_v15 = vmul.f32 %v252_v9, %v222_v46  ;;  %v258_v18 = vmul.f32 %v397_v54, %v257_v16  ;;  %v278_v10 = vmul.f32 %v252_v9, %v226_v1  ;;  %v399_v22 = vpop.eup %398 }
  0x3b   : > { %vm281_vm11 = vcmp.ge.f32.partialorder %v273_v14, 0.0  ;;  %v289_v8 = vmul.f32 0.2, %v273_v14  ;;  %vm285_vm12 = vcmp.ge.f32.partialorder %v277_v2, 0.0  ;;  %v293_v19 = vmul.f32 0.2, %v277_v2 }
  0x3c   : > { %vm282_vm13 = vcmp.ge.f32.partialorder %v274_v15, 0.0  ;;  %v290_v21 = vmul.f32 0.2, %v274_v15  ;;  %v262_v11 = vsel %vm261_vm10, %v397_v54, %v258_v18  ;;  %vm286_vm14 = vcmp.ge.f32.partialorder %v278_v10, 0.0 }
  0x3d   : > { %v297_v20 = vsel %vm281_vm11, %v273_v14, %v289_v8  ;;  %v275_v24 = vmul.f32 %v262_v11, %v223_v17  ;;  %v301_v25 = vsel %vm285_vm12, %v277_v2, %v293_v19  ;;  %v294_v26 = vmul.f32 0.2, %v278_v10 }
  0x3e   : > { %305 = vst [vmem:[%s537_s14] sm:$0xff] %v297_v20  ;;  %v298_v27 = vsel %vm282_vm13, %v274_v15, %v290_v21  ;;  %v264_v28 = vmul.f32 %v399_v22, %v232_v6  ;;  %v279_v29 = vmul.f32 %v262_v11, %v227_v3  ;;  %vm270_vm2 = vweird.f32 %v399_v22 }
  0x3f   : > { %309 = vst [vmem:[%s537_s14 + $0x20] sm:$0x1] %v301_v25  ;;  %vm283_vm15 = vcmp.ge.f32.partialorder %v275_v24, 0.0  ;;  %v291_v30 = vmul.f32 0.2, %v275_v24  ;;  %v302_v31 = vsel %vm286_vm14, %v278_v10, %v294_v26  ;;  %vm271_vm3 = vmor %vm269_vm1, %vm270_vm2 }
  0x40   : > { %306 = vst [vmem:[%s537_s14 + $0x8] sm:$0xff] %v298_v27  ;;  %v265_v33 = vmul.f32 %v399_v22, %v264_v28  ;;  %vm287_vm0 = vcmp.ge.f32.partialorder %v279_v29, 0.0  ;;  %v295_v34 = vmul.f32 0.2, %v279_v29 }
  0x41   : > { %310 = vst [vmem:[%s537_s14 + $0x28] sm:$0x1] %v302_v31  ;;  %v299_v35 = vsel %vm283_vm15, %v275_v24, %v291_v30 }
  0x42   : > { %307 = vst [vmem:[%s537_s14 + $0x10] sm:$0xff] %v299_v35  ;;  %v266_v36 = vmul.f32 0.5, %v265_v33  ;;  %v303_v37 = vsel %vm287_vm0, %v279_v29, %v295_v34 }
  0x43   : > { %311 = vst [vmem:[%s537_s14 + $0x30] sm:$0x1] %v303_v37 }
  0x44   : > { %v267_v38 = vsub.f32 1.5, %v266_v36 }
  0x46   : > { %v268_v41 = vmul.f32 %v399_v22, %v267_v38 }
  0x48   : > { %v272_v42 = vsel %vm271_vm3, %v399_v22, %v268_v41 }
  0x49   : > { %v276_v44 = vmul.f32 %v272_v42, %v224_v39  ;;  %v280_v45 = vmul.f32 %v272_v42, %v228_v40 }
  0x4b   : > { %vm284_vm4 = vcmp.ge.f32.partialorder %v276_v44, 0.0  ;;  %v292_v47 = vmul.f32 0.2, %v276_v44  ;;  %vm288_vm5 = vcmp.ge.f32.partialorder %v280_v45, 0.0  ;;  %v296_v48 = vmul.f32 0.2, %v280_v45 }
  0x4d   : > { %v300_v49 = vsel %vm284_vm4, %v276_v44, %v292_v47  ;;  %v304_v50 = vsel %vm288_vm5, %v280_v45, %v296_v48 }
  0x4e   : > { %308 = vst [vmem:[%s537_s14 + $0x18] sm:$0xff] %v300_v49 }
  0x4f   : > { %312 = vst [vmem:[%s537_s14 + $0x38] sm:$0x1] %v304_v50 }
  0x50 PF: > { %s11_s6 = sadd.s32 1, %s406_s6  }
  0x51   : > { %p8_p4 = scmp.ge.s32.totalorder %s11_s6, 4  }
  0x53   :  { %10 = sbr.rel (!%p8_p4) target bundleno = 1 (0x1), region = 54 }

// kernel: discriminator_forward.13
= control target key start
LH: loop header
LB: loop body
LE: loop exit
PB: predicated region body
PF: predicated region fallthrough
CT: control target
= control target key end

     0   :  { %s1821_s9 = smov 0   ;;  %s1823_s10 = smov 0   ;;  %s2297_s0 = inlined_call_operand.vmem [shape: bf16[18,4096], index: 0, kind: input, shape index: {}]   ;;  %s2298_s1 = inlined_call_operand.vmem [shape: bf16[4096,512], index: 1, kind: input, shape index: {}]   ;;  %s2299_s2 = inlined_call_operand.vmem [shape: f32[18,512], index: 2, kind: output, shape index: {}]  }
   0x1   :  { %s1825_s11 = smov 0   ;;  %s1827_s12 = smov 0  }
   0x2   :  { %s1829_s13 = smov 0   ;;  %s1831_s14 = smov 0  }
   0x3   :  { %s1833_s15 = smov 0   ;;  %s1835_s16 = smov 0  }
   0x4   :  { %s1837_s17 = smov 0   ;;  %s1839_s18 = smov 0  }
   0x5   :  { %s1841_s19 = smov 0  }
   0x6 LB: > { %s1263_s20 = sadd.s32 4294967295, %s1803_s19   ;;  %s24_s21 = sadd.s32 1, %s1795_s17  ;;  %s1803_s19 = sphi %s1841_s19, %s12_s19   ;;  %s1799_s18 = sphi %s1839_s18, %s2312_s18   ;;  %s1795_s17 = sphi %s1837_s17, %s2311_s17   ;;  %s1791_s16 = sphi %s1835_s16, %s2310_s16   ;;  %s1787_s15 = sphi %s1833_s15, %s2309_s15   ;;  %s1783_s14 = sphi %s1831_s14, %s2308_s14   ;;  %s1779_s13 = sphi %s1829_s13, %s2307_s13   ;;  %s1775_s12 = sphi %s1827_s12, %s2306_s12   ;;  %s1771_s11 = sphi %s1825_s11, %s2305_s11   ;;  %s1767_s10 = sphi %s1823_s10, %s2304_s10   ;;  %s1763_s9 = sphi %s1821_s9, %s2303_s9  }
   0x7   : > { %p25_p0 = scmp.ge.s32.totalorder %s24_s21, 8  ;;  %s27_s22 = sadd.s32 1, %s1799_s18 }
   0x8   : > { %s40_s23 = sadd.s32 1, %s1783_s14  ;;  %p47_p1 = scmp.ne.s32.totalorder %s1783_s14, %s1779_s13 }
   0x9   : > { %s2314_s21 = smov (%p25_p0, %s24_s21), 0  ;;  %s2316_s22 = smov (!%p25_p0, %s27_s22), %s1799_s18 }
   0xa   : > { %s36_s24 = ssub.s32 %s1795_s17, %s2314_s21  ;;  %p48_p2 = scmp.eq.s32.totalorder %s1803_s19, 0 }
   0xb   : > { %p29_p3 = scmp.ge.s32.totalorder %s2316_s22, 2  ;;  %p38_p4 = scmp.eq.s32.totalorder %s36_s24, 0 }
   0xc   : > { %p1888_p5 = por %p48_p2, %p47_p1  ;;  %s68_s26 = sadd.s32 1, %s1775_s12 }
   0xd   : > { %s2318_s22 = smov (%p29_p3, %s2316_s22), 0  ;;  %p75_p6 = scmp.ne.s32.totalorder %s1775_s12, %s1771_s11 }
   0xe   : > { %s1896_s27 = scalar_select %p38_p4, %s1783_s14, %s40_s23  }
   0xf   : > { %s64_s28 = ssub.s32 %s1799_s18, %s2318_s22  ;;  %p1902_p9 = por %p75_p6, %p48_p2 }
  0x10   : > { %s65_s29 = sor.u32 %s64_s28, %s36_s24  ;;  %p94_p7 = scmp.eq.s32.totalorder %s64_s28, 0 }
  0x11   : > { %p66_p8 = scmp.eq.s32.totalorder %s65_s29, 0  ;;  %s96_s3 = sadd.s32 1, %s1767_s10 }
  0x12   : > { %p106_p10 = scmp.ne.s32.totalorder %s1767_s10, %s1763_s9  ;;  %p107_p11 = scmp.eq.s32.totalorder %s1263_s20, 15 }
  0x13   : > { %s1910_s4 = scalar_select %p66_p8, %s1775_s12, %s68_s26  }
  0x14   : > { %s1913_s5 = scalar_select %p94_p7, %s1767_s10, %s96_s3  }
  0x15   : > { %p1915_p12 = por %p107_p11, %p106_p10  ;;  %p1266_p13 = scmp.ge.s32.totalorder %s1803_s19, 16 }
  0x17   : > { %129 = sbr.rel (%p1266_p13) target bundleno = 109 (0x6d), region = 16 }
  0x1c   : > { %132 = sbr.rel (!%p1888_p5) target bundleno = 38 (0x26), region = 20  ;;  %s134_s7 = sand.u32 (%p1888_p5), 1, %s1783_s14  }
  0x1d   : > { %s1554_s8 = sshll.u32 (%p1888_p5), %s1795_s17, 4  ;;  %s1625_s23 = smul.u32 (%p1888_p5), 48, %s134_s7 }
  0x1e   : > { %s142_s28 = scalar_lea.vmem (%p1888_p5), %s2297_s0, %s1554_s8 }
  0x1f   : > { %v155_v0 = vld [vmem:[%s142_s28] sm:$0xff] (%p1888_p5)  ;;  %v157_v1 = vld [vmem:[%s142_s28 + $0x8] sm:$0xff] (%p1888_p5)  ;;  %s136_s20 = scalar_lea.vmem (%p1888_p5), [#allocation3], %s1625_s23 }
  0x20   : > { %v159_v2 = vld [vmem:[%s142_s28 + $0x80] sm:$0xff] (%p1888_p5)  ;;  %156 = vst [vmem:[%s136_s20] sm:$0xff] (%p1888_p5), %v155_v0  ;;  %v161_v3 = vld [vmem:[%s142_s28 + $0x88] sm:$0xff] (%p1888_p5) }
  0x21   : > { %158 = vst [vmem:[%s136_s20 + $0x8] sm:$0xff] %v157_v1  ;;  %v163_v4 = vld [vmem:[%s142_s28 + $0x100] sm:$0xff]  ;;  %v165_v5 = vld [vmem:[%s142_s28 + $0x108] sm:$0xff] }
  0x22   : > { %160 = vst [vmem:[%s136_s20 + $0x10] sm:$0xff] %v159_v2 }
  0x23   : > { %162 = vst [vmem:[%s136_s20 + $0x18] sm:$0xff] %v161_v3 }
  0x24   : > { %164 = vst [vmem:[%s136_s20 + $0x20] sm:$0xff] %v163_v4 }
  0x25   : > { %166 = vst [vmem:[%s136_s20 + $0x28] sm:$0xff] %v165_v5 }
  0x26 PF: > { %172 = sbr.rel (!%p1902_p9) target bundleno = 109 (0x6d), region = 43  ;;  %s174_s25 = sand.u32 (%p1902_p9), 1, %s1775_s12  }
  0x27   : > { %s1271_s29 = sshll.u32 (%p1902_p9), %s1799_s18, 1  ;;  %s1269_s3 = sshll.u32 (%p1902_p9), %s174_s25, 9 }
  0x28   : > { %s1555_s7 = sshll.u32 (%p1902_p9), %s1795_s17, 8  ;;  %s1940_s30 = scalar_lea.vmem (%p1902_p9), [#allocation4], %s1269_s3 }
  0x29   : > { %s180_s8 = sadd.s32 (%p1902_p9), %s1555_s7, %s1271_s29 }
  0x2a   : > { %s1273_s23 = sshll.u32 (%p1902_p9), %s180_s8, 2 }
  0x2b   : > { %s1935_s28 = scalar_lea.vmem %s2298_s1, %s1273_s23 }
  0x2c   : > { %v337_v6 = vld [vmem:[%s1935_s28] sm:$0xff]  ;;  %v339_v7 = vld [vmem:[%s1935_s28 + $0x10] sm:$0xff] }
  0x2d   : > { %v341_v8 = vld [vmem:[%s1935_s28 + $0x20] sm:$0xff]  ;;  %338 = vst [vmem:[%s1940_s30] sm:$0xff] %v337_v6  ;;  %v343_v9 = vld [vmem:[%s1935_s28 + $0x30] sm:$0xff] }
  0x2e   : > { %340 = vst [vmem:[%s1940_s30 + $0x8] sm:$0xff] %v339_v7  ;;  %v345_v10 = vld [vmem:[%s1935_s28 + $0x40] sm:$0xff]  ;;  %v347_v11 = vld [vmem:[%s1935_s28 + $0x50] sm:$0xff] }
  0x2f   : > { %342 = vst [vmem:[%s1940_s30 + $0x10] sm:$0xff] %v341_v8  ;;  %v349_v12 = vld [vmem:[%s1935_s28 + $0x60] sm:$0xff]  ;;  %v351_v13 = vld [vmem:[%s1935_s28 + $0x70] sm:$0xff] }
  0x30   : > { %344 = vst [vmem:[%s1940_s30 + $0x18] sm:$0xff] %v343_v9  ;;  %v353_v14 = vld [vmem:[%s1935_s28 + $0x80] sm:$0xff]  ;;  %v355_v15 = vld [vmem:[%s1935_s28 + $0x90] sm:$0xff] }
  0x31   : > { %346 = vst [vmem:[%s1940_s30 + $0x20] sm:$0xff] %v345_v10  ;;  %v357_v16 = vld [vmem:[%s1935_s28 + $0xa0] sm:$0xff]  ;;  %v359_v17 = vld [vmem:[%s1935_s28 + $0xb0] sm:$0xff] }
  0x32   : > { %348 = vst [vmem:[%s1940_s30 + $0x28] sm:$0xff] %v347_v11  ;;  %v361_v18 = vld [vmem:[%s1935_s28 + $0xc0] sm:$0xff]  ;;  %v363_v19 = vld [vmem:[%s1935_s28 + $0xd0] sm:$0xff] }
  0x33   : > { %350 = vst [vmem:[%s1940_s30 + $0x30] sm:$0xff] %v349_v12  ;;  %v365_v20 = vld [vmem:[%s1935_s28 + $0xe0] sm:$0xff]  ;;  %v367_v21 = vld [vmem:[%s1935_s28 + $0xf0] sm:$0xff] }
  0x34   : > { %352 = vst [vmem:[%s1940_s30 + $0x38] sm:$0xff] %v351_v13  ;;  %v369_v22 = vld [vmem:[%s1935_s28 + $0x100] sm:$0xff]  ;;  %v371_v23 = vld [vmem:[%s1935_s28 + $0x110] sm:$0xff] }
  0x35   : > { %354 = vst [vmem:[%s1940_s30 + $0x40] sm:$0xff] %v353_v14  ;;  %v373_v24 = vld [vmem:[%s1935_s28 + $0x120] sm:$0xff]  ;;  %v375_v25 = vld [vmem:[%s1935_s28 + $0x130] sm:$0xff] }
  0x36   : > { %356 = vst [vmem:[%s1940_s30 + $0x48] sm:$0xff] %v355_v15  ;;  %v377_v26 = vld [vmem:[%s1935_s28 + $0x140] sm:$0xff]  ;;  %v379_v27 = vld [vmem:[%s1935_s28 + $0x150] sm:$0xff] }
  0x37   : > { %358 = vst [vmem:[%s1940_s30 + $0x50] sm:$0xff] %v357_v16  ;;  %v381_v28 = vld [vmem:[%s1935_s28 + $0x160] sm:$0xff]  ;;  %v383_v29 = vld [vmem:[%s1935_s28 + $0x170] sm:$0xff] }
  0x38   : > { %360 = vst [vmem:[%s1940_s30 + $0x58] sm:$0xff] %v359_v17  ;;  %v385_v30 = vld [vmem:[%s1935_s28 + $0x180] sm:$0xff]  ;;  %v387_v31 = vld [vmem:[%s1935_s28 + $0x190] sm:$0xff] }
  0x39   : > { %362 = vst [vmem:[%s1940_s30 + $0x60] sm:$0xff] %v361_v18  ;;  %v389_v32 = vld [vmem:[%s1935_s28 + $0x1a0] sm:$0xff]  ;;  %v391_v33 = vld [vmem:[%s1935_s28 + $0x1b0] sm:$0xff] }
  0x3a   : > { %364 = vst [vmem:[%s1940_s30 + $0x68] sm:$0xff] %v363_v19  ;;  %v393_v34 = vld [vmem:[%s1935_s28 + $0x1c0] sm:$0xff]  ;;  %v395_v35 = vld [vmem:[%s1935_s28 + $0x1d0] sm:$0xff] }
  0x3b   : > { %366 = vst [vmem:[%s1940_s30 + $0x70] sm:$0xff] %v365_v20  ;;  %v397_v36 = vld [vmem:[%s1935_s28 + $0x1e0] sm:$0xff]  ;;  %v399_v37 = vld [vmem:[%s1935_s28 + $0x1f0] sm:$0xff] }
  0x3c   : > { %368 = vst [vmem:[%s1940_s30 + $0x78] sm:$0xff] %v367_v21  ;;  %v401_v38 = vld [vmem:[%s1935_s28 + $0x200] sm:$0xff]  ;;  %v403_v39 = vld [vmem:[%s1935_s28 + $0x210] sm:$0xff] }
  0x3d   : > { %370 = vst [vmem:[%s1940_s30 + $0x80] sm:$0xff] %v369_v22  ;;  %v405_v40 = vld [vmem:[%s1935_s28 + $0x220] sm:$0xff]  ;;  %v407_v41 = vld [vmem:[%s1935_s28 + $0x230] sm:$0xff] }
  0x3e   : > { %372 = vst [vmem:[%s1940_s30 + $0x88] sm:$0xff] %v371_v23  ;;  %v409_v42 = vld [vmem:[%s1935_s28 + $0x240] sm:$0xff]  ;;  %v411_v43 = vld [vmem:[%s1935_s28 + $0x250] sm:$0xff] }
  0x3f   : > { %374 = vst [vmem:[%s1940_s30 + $0x90] sm:$0xff] %v373_v24  ;;  %v413_v44 = vld [vmem:[%s1935_s28 + $0x260] sm:$0xff]  ;;  %v415_v45 = vld [vmem:[%s1935_s28 + $0x270] sm:$0xff] }
  0x40   : > { %376 = vst [vmem:[%s1940_s30 + $0x98] sm:$0xff] %v375_v25  ;;  %v417_v46 = vld [vmem:[%s1935_s28 + $0x280] sm:$0xff]  ;;  %v419_v47 = vld [vmem:[%s1935_s28 + $0x290] sm:$0xff] }
  0x41   : > { %378 = vst [vmem:[%s1940_s30 + $0xa0] sm:$0xff] %v377_v26  ;;  %v421_v48 = vld [vmem:[%s1935_s28 + $0x2a0] sm:$0xff]  ;;  %v423_v49 = vld [vmem:[%s1935_s28 + $0x2b0] sm:$0xff] }
  0x42   : > { %380 = vst [vmem:[%s1940_s30 + $0xa8] sm:$0xff] %v379_v27  ;;  %v425_v50 = vld [vmem:[%s1935_s28 + $0x2c0] sm:$0xff]  ;;  %v427_v51 = vld [vmem:[%s1935_s28 + $0x2d0] sm:$0xff] }
  0x43   : > { %382 = vst [vmem:[%s1940_s30 + $0xb0] sm:$0xff] %v381_v28  ;;  %v429_v52 = vld [vmem:[%s1935_s28 + $0x2e0] sm:$0xff]  ;;  %v431_v53 = vld [vmem:[%s1935_s28 + $0x2f0] sm:$0xff] }
  0x44   : > { %384 = vst [vmem:[%s1940_s30 + $0xb8] sm:$0xff] %v383_v29  ;;  %v433_v54 = vld [vmem:[%s1935_s28 + $0x300] sm:$0xff]  ;;  %v435_v55 = vld [vmem:[%s1935_s28 + $0x310] sm:$0xff] }
  0x45   : > { %386 = vst [vmem:[%s1940_s30 + $0xc0] sm:$0xff] %v385_v30  ;;  %v437_v56 = vld [vmem:[%s1935_s28 + $0x320] sm:$0xff]  ;;  %v439_v57 = vld [vmem:[%s1935_s28 + $0x330] sm:$0xff] }
  0x46   : > { %388 = vst [vmem:[%s1940_s30 + $0xc8] sm:$0xff] %v387_v31  ;;  %v441_v58 = vld [vmem:[%s1935_s28 + $0x340] sm:$0xff]  ;;  %v443_v59 = vld [vmem:[%s1935_s28 + $0x350] sm:$0xff] }
  0x47   : > { %390 = vst [vmem:[%s1940_s30 + $0xd0] sm:$0xff] %v389_v32  ;;  %v445_v60 = vld [vmem:[%s1935_s28 + $0x360] sm:$0xff]  ;;  %v447_v61 = vld [vmem:[%s1935_s28 + $0x370] sm:$0xff] }
  0x48   : > { %392 = vst [vmem:[%s1940_s30 + $0xd8] sm:$0xff] %v391_v33  ;;  %v449_v62 = vld [vmem:[%s1935_s28 + $0x380] sm:$0xff]  ;;  %v451_v63 = vld [vmem:[%s1935_s28 + $0x390] sm:$0xff] }
  0x49   : > { %394 = vst [vmem:[%s1940_s30 + $0xe0] sm:$0xff] %v393_v34  ;;  %v453_v0 = vld [vmem:[%s1935_s28 + $0x3a0] sm:$0xff]  ;;  %v455_v1 = vld [vmem:[%s1935_s28 + $0x3b0] sm:$0xff] }
  0x4a   : > { %396 = vst [vmem:[%s1940_s30 + $0xe8] sm:$0xff] %v395_v35  ;;  %v457_v2 = vld [vmem:[%s1935_s28 + $0x3c0] sm:$0xff]  ;;  %v459_v3 = vld [vmem:[%s1935_s28 + $0x3d0] sm:$0xff] }
  0x4b   : > { %398 = vst [vmem:[%s1940_s30 + $0xf0] sm:$0xff] %v397_v36  ;;  %v461_v4 = vld [vmem:[%s1935_s28 + $0x3e0] sm:$0xff]  ;;  %v463_v5 = vld [vmem:[%s1935_s28 + $0x3f0] sm:$0xff] }
  0x4c   : > { %400 = vst [vmem:[%s1940_s30 + $0xf8] sm:$0xff] %v399_v37 }
  0x4d   : > { %402 = vst [vmem:[%s1940_s30 + $0x100] sm:$0xff] %v401_v38 }
  0x4e   : > { %404 = vst [vmem:[%s1940_s30 + $0x108] sm:$0xff] %v403_v39 }
  0x4f   : > { %406 = vst [vmem:[%s1940_s30 + $0x110] sm:$0xff] %v405_v40 }
  0x50   : > { %408 = vst [vmem:[%s1940_s30 + $0x118] sm:$0xff] %v407_v41 }
  0x51   : > { %410 = vst [vmem:[%s1940_s30 + $0x120] sm:$0xff] %v409_v42 }
  0x52   : > { %412 = vst [vmem:[%s1940_s30 + $0x128] sm:$0xff] %v411_v43 }
  0x53   : > { %414 = vst [vmem:[%s1940_s30 + $0x130] sm:$0xff] %v413_v44 }
  0x54   : > { %416 = vst [vmem:[%s1940_s30 + $0x138] sm:$0xff] %v415_v45 }
  0x55   : > { %418 = vst [vmem:[%s1940_s30 + $0x140] sm:$0xff] %v417_v46 }
  0x56   : > { %420 = vst [vmem:[%s1940_s30 + $0x148] sm:$0xff] %v419_v47 }
  0x57   : > { %422 = vst [vmem:[%s1940_s30 + $0x150] sm:$0xff] %v421_v48 }
  0x58   : > { %424 = vst [vmem:[%s1940_s30 + $0x158] sm:$0xff] %v423_v49 }
  0x59   : > { %426 = vst [vmem:[%s1940_s30 + $0x160] sm:$0xff] %v425_v50 }
  0x5a   : > { %428 = vst [vmem:[%s1940_s30 + $0x168] sm:$0xff] %v427_v51 }
  0x5b   : > { %430 = vst [vmem:[%s1940_s30 + $0x170] sm:$0xff] %v429_v52 }
  0x5c   : > { %432 = vst [vmem:[%s1940_s30 + $0x178] sm:$0xff] %v431_v53 }
  0x5d   : > { %434 = vst [vmem:[%s1940_s30 + $0x180] sm:$0xff] %v433_v54 }
  0x5e   : > { %436 = vst [vmem:[%s1940_s30 + $0x188] sm:$0xff] %v435_v55 }
  0x5f   : > { %438 = vst [vmem:[%s1940_s30 + $0x190] sm:$0xff] %v437_v56 }
  0x60   : > { %440 = vst [vmem:[%s1940_s30 + $0x198] sm:$0xff] %v439_v57 }
  0x61   : > { %442 = vst [vmem:[%s1940_s30 + $0x1a0] sm:$0xff] %v441_v58 }
  0x62   : > { %444 = vst [vmem:[%s1940_s30 + $0x1a8] sm:$0xff] %v443_v59 }
  0x63   : > { %446 = vst [vmem:[%s1940_s30 + $0x1b0] sm:$0xff] %v445_v60 }
  0x64   : > { %448 = vst [vmem:[%s1940_s30 + $0x1b8] sm:$0xff] %v447_v61 }
  0x65   : > { %450 = vst [vmem:[%s1940_s30 + $0x1c0] sm:$0xff] %v449_v62 }
  0x66   : > { %452 = vst [vmem:[%s1940_s30 + $0x1c8] sm:$0xff] %v451_v63 }
  0x67   : > { %454 = vst [vmem:[%s1940_s30 + $0x1d0] sm:$0xff] %v453_v0 }
  0x68   : > { %456 = vst [vmem:[%s1940_s30 + $0x1d8] sm:$0xff] %v455_v1 }
  0x69   : > { %458 = vst [vmem:[%s1940_s30 + $0x1e0] sm:$0xff] %v457_v2 }
  0x6a   : > { %460 = vst [vmem:[%s1940_s30 + $0x1e8] sm:$0xff] %v459_v3 }
  0x6b   : > { %462 = vst [vmem:[%s1940_s30 + $0x1f0] sm:$0xff] %v461_v4 }
  0x6c   : > { %464 = vst [vmem:[%s1940_s30 + $0x1f8] sm:$0xff] %v463_v5 }
  0x6d PF: > { %p1274_p0 = scmp.ge.s32.totalorder %s1803_s19, 1  ;;  %p469_p1 = scmp.lt.s32.totalorder %s1803_s19, 17 }
  0x6f   : > { %p470_p2 = pnand %p1274_p0, %p469_p1 }
  0x70   : > { %s476_s20 = sand.u32 (!%p470_p2), 1, %s1779_s13   ;;  %s483_s25 = sand.u32 (!%p470_p2), 1, %s1771_s11  }
  0x71   : > { %473 = sbr.rel (%p470_p2) target bundleno = 370 (0x172), region = 81  ;;  %s1275_s3 = sshll.u32 (!%p470_p2), %s483_s25, 9 }
  0x72   : > { %s1626_s29 = smul.u32 (!%p470_p2), 48, %s476_s20  ;;  %s504_s7 = sand.u32 (!%p470_p2), 1, %s1763_s9  }
  0x73   : > { %s1627_s8 = smul.u32 (!%p470_p2), 48, %s504_s7  ;;  %s2074_s24 = scalar_lea.vmem (!%p470_p2), [#allocation4], %s1275_s3 }
  0x74   : > { %s2072_s23 = scalar_lea.vmem (!%p470_p2), [#allocation3], %s1626_s29  ;;  %p1276_p3 = scmp.ne.s32.totalorder (!%p470_p2), %s1787_s15, 0 }
  0x75   : > { %s2076_s26 = scalar_lea.vmem (!%p470_p2), [#allocation5], %s1627_s8 }
  0x76   : > { %516 = sbr.rel (%p1276_p3) target bundleno = 130 (0x82), region = 93 }
  0x7b   : > { %v1805_v6 = vmov 0.0  }
  0x7c   : > { %517 = vst [vmem:[#allocation2 + $0x28] sm:$0xff] %v1805_v6 }
  0x7d   : > { %518 = vst [vmem:[#allocation2 + $0x10] sm:$0xff] %v1805_v6 }
  0x7e   : > { %519 = vst [vmem:[#allocation2 + $0x8] sm:$0xff] %v1805_v6 }
  0x7f   : > { %520 = vst [vmem:[#allocation2] sm:$0xff] %v1805_v6 }
  0x80   : > { %521 = vst [vmem:[#allocation2 + $0x18] sm:$0x3] %v1805_v6 }
  0x81   : > { %522 = vst [vmem:[#allocation2 + $0x20] sm:$0x3] %v1805_v6 }
  0x82 PF: > { %v1351_v7 = vld [vmem:[%s2074_s24 + $0x70] sm:$0xf]  ;;  %v1575_v8 = vld [vmem:[%s2074_s24 + $0x74] sm:$0xf0]  ;;  %v1343_v18 = vld [vmem:[%s2074_s24 + $0x60] sm:$0xf] }
  0x83   : > { %v1415_v9 = vld [vmem:[%s2074_s24 + $0xf0] sm:$0xf]  ;;  %v1352_v10 = vor.u32 %v1575_v8, %v1351_v7  ;;  %v1591_v11 = vld [vmem:[%s2074_s24 + $0xf4] sm:$0xf0]  ;;  %v1573_v20 = vld [vmem:[%s2074_s24 + $0x64] sm:$0xf0] }
  0x84   : > { %v1479_v12 = vld [vmem:[%s2074_s24 + $0x170] sm:$0xf]  ;;  %v1607_v13 = vld [vmem:[%s2074_s24 + $0x174] sm:$0xf0]  ;;  %v1416_v14 = vor.u32 %v1591_v11, %v1415_v9  ;;  %v1407_v21 = vld [vmem:[%s2074_s24 + $0xe0] sm:$0xf]  ;;  %v1344_v23 = vor.u32 %v1573_v20, %v1343_v18 }
  0x85   : > { %v1480_v15 = vor.u32 %v1607_v13, %v1479_v12  ;;  %v1543_v16 = vld [vmem:[%s2074_s24 + $0x1f0] sm:$0xf]  ;;  %v1623_v17 = vld [vmem:[%s2074_s24 + $0x1f4] sm:$0xf0]  ;;  %953 = vmatpush.bf16.msra.mxu0 %v1352_v10  ;;  %v1589_v22 = vld [vmem:[%s2074_s24 + $0xe4] sm:$0xf0] }
  0x86   : > { %v1544_v19 = vor.u32 %v1623_v17, %v1543_v16  ;;  %971 = vmatpush.bf16.msra.mxu1 %v1416_v14  ;;  %v1408_v24 = vor.u32 %v1589_v22, %v1407_v21  ;;  %v1471_v25 = vld [vmem:[%s2074_s24 + $0x160] sm:$0xf]  ;;  %v1605_v26 = vld [vmem:[%s2074_s24 + $0x164] sm:$0xf0]  ;;  %v1335_v30 = vld [vmem:[%s2074_s24 + $0x50] sm:$0xf] }
  0x87   : > { %989 = vmatpush.bf16.msra.mxu2 %v1480_v15  ;;  %v1535_v27 = vld [vmem:[%s2074_s24 + $0x1e0] sm:$0xf]  ;;  %v1472_v28 = vor.u32 %v1605_v26, %v1471_v25  ;;  %v1621_v29 = vld [vmem:[%s2074_s24 + $0x1e4] sm:$0xf0]  ;;  %v1571_v31 = vld [vmem:[%s2074_s24 + $0x54] sm:$0xf0] }
  0x88   : > { %1007 = vmatpush.bf16.msra.mxu3 %v1544_v19  ;;  %v1536_v32 = vor.u32 %v1621_v29, %v1535_v27  ;;  %v1399_v33 = vld [vmem:[%s2074_s24 + $0xd0] sm:$0xf]  ;;  %v1587_v34 = vld [vmem:[%s2074_s24 + $0xd4] sm:$0xf0]  ;;  %v1336_v36 = vor.u32 %v1571_v31, %v1335_v30  ;;  %v1327_v42 = vld [vmem:[%s2074_s24 + $0x40] sm:$0xf] }
  0x89   : > { %v1463_v35 = vld [vmem:[%s2074_s24 + $0x150] sm:$0xf]  ;;  %954 = vmatpush.bf16.msra.mxu0 %v1344_v23  ;;  %v1603_v37 = vld [vmem:[%s2074_s24 + $0x154] sm:$0xf0]  ;;  %v1400_v40 = vor.u32 %v1587_v34, %v1399_v33  ;;  %v1569_v43 = vld [vmem:[%s2074_s24 + $0x44] sm:$0xf0] }
  0x8a   : > { %v1527_v38 = vld [vmem:[%s2074_s24 + $0x1d0] sm:$0xf]  ;;  %v1619_v39 = vld [vmem:[%s2074_s24 + $0x1d4] sm:$0xf0]  ;;  %972 = vmatpush.bf16.msra.mxu1 %v1408_v24  ;;  %v1464_v41 = vor.u32 %v1603_v37, %v1463_v35  ;;  %v1391_v44 = vld [vmem:[%s2074_s24 + $0xc0] sm:$0xf]  ;;  %v1328_v51 = vor.u32 %v1569_v43, %v1327_v42 }
  0x8b   : > { %990 = vmatpush.bf16.msra.mxu2 %v1472_v28  ;;  %v1528_v45 = vor.u32 %v1619_v39, %v1527_v38  ;;  %v1585_v46 = vld [vmem:[%s2074_s24 + $0xc4] sm:$0xf0]  ;;  %v1455_v47 = vld [vmem:[%s2074_s24 + $0x140] sm:$0xf]  ;;  %v1319_v54 = vld [vmem:[%s2074_s24 + $0x30] sm:$0xf] }
  0x8c   : > { %1008 = vmatpush.bf16.msra.mxu3 %v1536_v32  ;;  %v1601_v48 = vld [vmem:[%s2074_s24 + $0x144] sm:$0xf0]  ;;  %v1519_v49 = vld [vmem:[%s2074_s24 + $0x1c0] sm:$0xf]  ;;  %v1392_v52 = vor.u32 %v1585_v46, %v1391_v44  ;;  %v1567_v55 = vld [vmem:[%s2074_s24 + $0x34] sm:$0xf0] }
  0x8d   : > { %v1617_v50 = vld [vmem:[%s2074_s24 + $0x1c4] sm:$0xf0]  ;;  %955 = vmatpush.bf16.msra.mxu0 %v1336_v36  ;;  %v1456_v53 = vor.u32 %v1601_v48, %v1455_v47  ;;  %v1383_v56 = vld [vmem:[%s2074_s24 + $0xb0] sm:$0xf]  ;;  %v1583_v58 = vld [vmem:[%s2074_s24 + $0xb4] sm:$0xf0]  ;;  %v1320_v63 = vor.u32 %v1567_v55, %v1319_v54 }
  0x8e   : > { %973 = vmatpush.bf16.msra.mxu1 %v1400_v40  ;;  %v1520_v57 = vor.u32 %v1617_v50, %v1519_v49  ;;  %v1447_v59 = vld [vmem:[%s2074_s24 + $0x130] sm:$0xf]  ;;  %v1599_v60 = vld [vmem:[%s2074_s24 + $0x134] sm:$0xf0]  ;;  %v1384_v0 = vor.u32 %v1583_v58, %v1383_v56  ;;  %v1311_v2 = vld [vmem:[%s2074_s24 + $0x20] sm:$0xf] }
  0x8f   : > { %991 = vmatpush.bf16.msra.mxu2 %v1464_v41  ;;  %v1511_v61 = vld [vmem:[%s2074_s24 + $0x1b0] sm:$0xf]  ;;  %v1615_v62 = vld [vmem:[%s2074_s24 + $0x1b4] sm:$0xf0]  ;;  %v1448_v1 = vor.u32 %v1599_v60, %v1447_v59  ;;  %v1565_v3 = vld [vmem:[%s2074_s24 + $0x24] sm:$0xf0] }
  0x90   : > { %1009 = vmatpush.bf16.msra.mxu3 %v1528_v45  ;;  %v1375_v4 = vld [vmem:[%s2074_s24 + $0xa0] sm:$0xf]  ;;  %v1512_v5 = vor.u32 %v1615_v62, %v1511_v61  ;;  %v1581_v6 = vld [vmem:[%s2074_s24 + $0xa4] sm:$0xf0]  ;;  %v1312_v11 = vor.u32 %v1565_v3, %v1311_v2  ;;  %v1303_v14 = vld [vmem:[%s2074_s24 + $0x10] sm:$0xf] }
  0x91   : > { %956 = vmatpush.bf16.msra.mxu0 %v1328_v51  ;;  %v1439_v7 = vld [vmem:[%s2074_s24 + $0x120] sm:$0xf]  ;;  %v1597_v8 = vld [vmem:[%s2074_s24 + $0x124] sm:$0xf0]  ;;  %v1376_v12 = vor.u32 %v1581_v6, %v1375_v4  ;;  %v1563_v15 = vld [vmem:[%s2074_s24 + $0x14] sm:$0xf0] }
  0x92   : > { %974 = vmatpush.bf16.msra.mxu1 %v1392_v52  ;;  %v1503_v9 = vld [vmem:[%s2074_s24 + $0x1a0] sm:$0xf]  ;;  %v1613_v10 = vld [vmem:[%s2074_s24 + $0x1a4] sm:$0xf0]  ;;  %v1440_v13 = vor.u32 %v1597_v8, %v1439_v7  ;;  %v1367_v16 = vld [vmem:[%s2074_s24 + $0x90] sm:$0xf]  ;;  %v1304_v24 = vor.u32 %v1563_v15, %v1303_v14 }
  0x93   : > { %992 = vmatpush.bf16.msra.mxu2 %v1456_v53  ;;  %v1504_v17 = vor.u32 %v1613_v10, %v1503_v9  ;;  %v1579_v18 = vld [vmem:[%s2074_s24 + $0x94] sm:$0xf0]  ;;  %v1431_v19 = vld [vmem:[%s2074_s24 + $0x110] sm:$0xf]  ;;  %v1295_v23 = vld [vmem:[%s2074_s24] sm:$0xf] }
  0x94   : > { %1010 = vmatpush.bf16.msra.mxu3 %v1520_v57  ;;  %v1595_v20 = vld [vmem:[%s2074_s24 + $0x114] sm:$0xf0]  ;;  %v1495_v21 = vld [vmem:[%s2074_s24 + $0x190] sm:$0xf]  ;;  %v1561_v25 = vld [vmem:[%s2074_s24 + $0x4] sm:$0xf0]  ;;  %v1368_v28 = vor.u32 %v1579_v18, %v1367_v16 }
  0x95   : > { %957 = vmatpush.bf16.msra.mxu0 %v1320_v63  ;;  %v1611_v22 = vld [vmem:[%s2074_s24 + $0x194] sm:$0xf0]  ;;  %v1359_v26 = vld [vmem:[%s2074_s24 + $0x80] sm:$0xf]  ;;  %v1577_v27 = vld [vmem:[%s2074_s24 + $0x84] sm:$0xf0]  ;;  %v1432_v29 = vor.u32 %v1595_v20, %v1431_v19  ;;  %v1296_v41 = vor.u32 %v1561_v25, %v1295_v23 }
  0x96   : > { %975 = vmatpush.bf16.msra.mxu1 %v1384_v0  ;;  %v1423_v30 = vld [vmem:[%s2074_s24 + $0x100] sm:$0xf]  ;;  %v1593_v31 = vld [vmem:[%s2074_s24 + $0x104] sm:$0xf0]  ;;  %v1496_v33 = vor.u32 %v1611_v22, %v1495_v21  ;;  %v1556_v37 = vld [vmem:[%s2072_s23 + $0x4] sm:$0xf]  ;;  %v1360_v45 = vor.u32 %v1577_v27, %v1359_v26 }
  0x97   : > { %993 = vmatpush.bf16.msra.mxu2 %v1448_v1  ;;  %v1487_v32 = vld [vmem:[%s2074_s24 + $0x180] sm:$0xf]  ;;  %v1609_v34 = vld [vmem:[%s2074_s24 + $0x184] sm:$0xf0]  ;;  %v1281_v38 = vld [vmem:[%s2072_s23 + $0x10] sm:$0xf0]  ;;  %v1424_v46 = vor.u32 %v1593_v31, %v1423_v30 }
  0x98   : > { %1011 = vmatpush.bf16.msra.mxu3 %v1512_v5  ;;  %v1279_v35 = vld [vmem:[%s2072_s23] sm:$0xf]  ;;  %v1558_v36 = vld [vmem:[%s2072_s23 + $0xc] sm:$0xf0]  ;;  %v1606_v39 = vld [vmem:[%s2074_s24 + $0x174] sm:$0xf]  ;;  %v1488_v50 = vor.u32 %v1609_v34, %v1487_v32  ;;  %v2163_v60 = vor.u32 %v1556_v37, %v1281_v38 }
  0x99   : > { %958 = vmatpush.bf16.msra.mxu0 %v1312_v11  ;;  %v1481_v40 = vld [vmem:[%s2074_s24 + $0x178] sm:$0xf0]  ;;  %v1287_v42 = vld [vmem:[%s2072_s23 + $0x8] sm:$0xf]  ;;  %v1622_v43 = vld [vmem:[%s2074_s24 + $0x1f4] sm:$0xf]  ;;  %v2158_v55 = vor.u32 %v1558_v36, %v1279_v35 }
  0x9a   : > { %976 = vmatpush.bf16.msra.mxu1 %v1376_v12  ;;  %v1545_v44 = vld [vmem:[%s2074_s24 + $0x1f8] sm:$0xf0]  ;;  %v1559_v47 = vld [vmem:[%s2072_s23 + $0x14] sm:$0xf0]  ;;  %v1484_v51 = vor.u32 %v1606_v39, %v1481_v40  ;;  %v1574_v52 = vld [vmem:[%s2074_s24 + $0x74] sm:$0xf] }
  0x9b   : > { %994 = vmatpush.bf16.msra.mxu2 %v1440_v13  ;;  %v1557_v48 = vld [vmem:[%s2072_s23 + $0xc] sm:$0xf]  ;;  %v1289_v49 = vld [vmem:[%s2072_s23 + $0x18] sm:$0xf0]  ;;  %v1590_v54 = vld [vmem:[%s2074_s24 + $0xf4] sm:$0xf]  ;;  %v1548_v56 = vor.u32 %v1622_v43, %v1545_v44  ;;  %v2165_v61 = vor.u32 %v1559_v47, %v1287_v42 }
  0x9c   : > { %1012 = vmatpush.bf16.msra.mxu3 %v1504_v17  ;;  %v1353_v53 = vld [vmem:[%s2074_s24 + $0x78] sm:$0xf0]  ;;  %v1604_v58 = vld [vmem:[%s2074_s24 + $0x164] sm:$0xf]  ;;  %v1473_v59 = vld [vmem:[%s2074_s24 + $0x168] sm:$0xf0]  ;;  %v2169_v0 = vor.u32 %v1557_v48, %v1289_v49 }
  0x9d   : > { %959 = vmatpush.bf16.msra.mxu0 %v1304_v24  ;;  %v1417_v57 = vld [vmem:[%s2074_s24 + $0xf8] sm:$0xf0]  ;;  %v1620_v62 = vld [vmem:[%s2074_s24 + $0x1e4] sm:$0xf]  ;;  %v1537_v63 = vld [vmem:[%s2074_s24 + $0x1e8] sm:$0xf0]  ;;  %v1356_v1 = vor.u32 %v1574_v52, %v1353_v53  ;;  %v1476_v3 = vor.u32 %v1604_v58, %v1473_v59 }
  0x9e   : > { %977 = vmatpush.bf16.msra.mxu1 %v1368_v28  ;;  %v1420_v2 = vor.u32 %v1590_v54, %v1417_v57  ;;  %v1572_v4 = vld [vmem:[%s2074_s24 + $0x64] sm:$0xf]  ;;  %v1345_v5 = vld [vmem:[%s2074_s24 + $0x68] sm:$0xf0]  ;;  %v1540_v7 = vor.u32 %v1620_v62, %v1537_v63  ;;  %v1602_v9 = vld [vmem:[%s2074_s24 + $0x154] sm:$0xf] }
  0x9f   : > { %995 = vmatpush.bf16.msra.mxu2 %v1432_v29  ;;  %v1588_v6 = vld [vmem:[%s2074_s24 + $0xe4] sm:$0xf]  ;;  %v1409_v8 = vld [vmem:[%s2074_s24 + $0xe8] sm:$0xf0]  ;;  %v1465_v10 = vld [vmem:[%s2074_s24 + $0x158] sm:$0xf0]  ;;  %v1348_v13 = vor.u32 %v1572_v4, %v1345_v5 }
  0xa0   : > { %1013 = vmatpush.bf16.msra.mxu3 %v1496_v33  ;;  %v1618_v11 = vld [vmem:[%s2074_s24 + $0x1d4] sm:$0xf]  ;;  %v1529_v12 = vld [vmem:[%s2074_s24 + $0x1d8] sm:$0xf0]  ;;  %v1412_v14 = vor.u32 %v1588_v6, %v1409_v8  ;;  %v1468_v15 = vor.u32 %v1602_v9, %v1465_v10  ;;  %v1600_v21 = vld [vmem:[%s2074_s24 + $0x144] sm:$0xf] }
  0xa1   : > { %960 = vmatpush.bf16.msra.mxu0 %v1296_v41  ;;  %v1570_v16 = vld [vmem:[%s2074_s24 + $0x54] sm:$0xf]  ;;  %v1337_v17 = vld [vmem:[%s2074_s24 + $0x58] sm:$0xf0]  ;;  %v1532_v19 = vor.u32 %v1618_v11, %v1529_v12  ;;  %v1457_v22 = vld [vmem:[%s2074_s24 + $0x148] sm:$0xf0] }
  0xa2   : > { %978 = vmatpush.bf16.msra.mxu1 %v1360_v45  ;;  %v1586_v18 = vld [vmem:[%s2074_s24 + $0xd4] sm:$0xf]  ;;  %v1401_v20 = vld [vmem:[%s2074_s24 + $0xd8] sm:$0xf0]  ;;  %v1616_v23 = vld [vmem:[%s2074_s24 + $0x1c4] sm:$0xf]  ;;  %v1340_v26 = vor.u32 %v1570_v16, %v1337_v17  ;;  %v1460_v29 = vor.u32 %v1600_v21, %v1457_v22 }
  0xa3   : > { %996 = vmatpush.bf16.msra.mxu2 %v1424_v46  ;;  %v1521_v24 = vld [vmem:[%s2074_s24 + $0x1c8] sm:$0xf0]  ;;  %v533_v25 = vld [vmem:[%s2072_s23 + $0x20] sm:$0x11]  ;;  %v1404_v28 = vor.u32 %v1586_v18, %v1401_v20  ;;  %v1449_v37 = vld [vmem:[%s2074_s24 + $0x138] sm:$0xf0] }
  0xa4   : > { %1014 = vmatpush.bf16.msra.mxu3 %v1488_v50  ;;  %961 = vmatmul.bf16.vlgmr.msra.gmra.mxu0 %v2158_v55  ;;  %v534_v27 = vld [vmem:[%s2072_s23 + $0x28] sm:$0x11]  ;;  %v1568_v30 = vld [vmem:[%s2074_s24 + $0x44] sm:$0xf]  ;;  %v1524_v33 = vor.u32 %v1616_v23, %v1521_v24  ;;  %v613_v35 = vunpack.c.l.b16 %v533_v25  ;;  %v1598_v36 = vld [vmem:[%s2074_s24 + $0x134] sm:$0xf]  ;;  %v614_v38 = vunpack.c.h.b16 %v533_v25 }
  0xa5   : > { %979 = vmatmul.bf16.vlgmr.msra.gmra.mxu1 %v2163_v60  ;;  %1025 = vmatpush.bf16.msrb.mxu0 %v1356_v1  ;;  %v1329_v31 = vld [vmem:[%s2074_s24 + $0x48] sm:$0xf0]  ;;  %v1584_v32 = vld [vmem:[%s2074_s24 + $0xc4] sm:$0xf]  ;;  %v615_v39 = vunpack.c.l.b16 %v534_v27  ;;  %v1614_v40 = vld [vmem:[%s2074_s24 + $0x1b4] sm:$0xf]  ;;  %v616_v43 = vunpack.c.h.b16 %v534_v27  ;;  %v1452_v45 = vor.u32 %v1598_v36, %v1449_v37 }
  0xa6   : > { %997 = vmatmul.bf16.vlgmr.msra.gmra.mxu2 %v2165_v61  ;;  %1043 = vmatpush.bf16.msrb.mxu1 %v1420_v2  ;;  %v1393_v34 = vld [vmem:[%s2074_s24 + $0xc8] sm:$0xf0]  ;;  %v1513_v41 = vld [vmem:[%s2074_s24 + $0x1b8] sm:$0xf0]  ;;  %v1332_v42 = vor.u32 %v1568_v30, %v1329_v31  ;;  %v1566_v46 = vld [vmem:[%s2074_s24 + $0x34] sm:$0xf]  ;;  %v2204_v49 = vpack.c.b16 %v613_v35, %v613_v35  ;;  %v2209_v54 = vpack.c.b16 %v614_v38, %v614_v38 }
  0xa7   : > { %1061 = vmatpush.bf16.msrb.mxu2 %v1484_v51  ;;  %1015 = vmatmul.bf16.vlgmr.msra.gmra.mxu3 %v2169_v0  ;;  %v1396_v44 = vor.u32 %v1584_v32, %v1393_v34  ;;  %v1321_v47 = vld [vmem:[%s2074_s24 + $0x38] sm:$0xf0]  ;;  %v1582_v48 = vld [vmem:[%s2074_s24 + $0xb4] sm:$0xf]  ;;  %v1516_v50 = vor.u32 %v1614_v40, %v1513_v41  ;;  %v1596_v52 = vld [vmem:[%s2074_s24 + $0x124] sm:$0xf]  ;;  %v624_v59 = vpack.c.b16 %v616_v43, %v616_v43 }
  0xa8   : > { %1079 = vmatpush.bf16.msrb.mxu3 %v1548_v56  ;;  %v1385_v51 = vld [vmem:[%s2074_s24 + $0xb8] sm:$0xf0]  ;;  %v1441_v53 = vld [vmem:[%s2074_s24 + $0x128] sm:$0xf0]  ;;  %v2211_v56 = vpack.c.b16 %v615_v39, %v615_v39  ;;  %v1612_v57 = vld [vmem:[%s2074_s24 + $0x1a4] sm:$0xf]  ;;  %v1324_v62 = vor.u32 %v1566_v46, %v1321_v47 }
  0xa9   : > { %1026 = vmatpush.bf16.msrb.mxu0 %v1348_v13  ;;  %v1505_v58 = vld [vmem:[%s2074_s24 + $0x1a8] sm:$0xf0]  ;;  %v1388_v63 = vor.u32 %v1582_v48, %v1385_v51  ;;  %v1444_v1 = vor.u32 %v1596_v52, %v1441_v53  ;;  %v1564_v2 = vld [vmem:[%s2074_s24 + $0x24] sm:$0xf]  ;;  %v1433_v8 = vld [vmem:[%s2074_s24 + $0x118] sm:$0xf0] }
  0xaa   : > { %1044 = vmatpush.bf16.msrb.mxu1 %v1412_v14  ;;  %v1580_v4 = vld [vmem:[%s2074_s24 + $0xa4] sm:$0xf]  ;;  %v1508_v5 = vor.u32 %v1612_v57, %v1505_v58  ;;  %v1377_v6 = vld [vmem:[%s2074_s24 + $0xa8] sm:$0xf0]  ;;  %v1610_v9 = vld [vmem:[%s2074_s24 + $0x194] sm:$0xf] }
  0xab   : > { %1062 = vmatpush.bf16.msrb.mxu2 %v1476_v3  ;;  %v1313_v3 = vld [vmem:[%s2074_s24 + $0x28] sm:$0xf0]  ;;  %v1497_v10 = vld [vmem:[%s2074_s24 + $0x198] sm:$0xf0]  ;;  %v1380_v12 = vor.u32 %v1580_v4, %v1377_v6  ;;  %v1562_v14 = vld [vmem:[%s2074_s24 + $0x14] sm:$0xf] }
  0xac   : > { %1080 = vmatpush.bf16.msrb.mxu3 %v1540_v7  ;;  %v1594_v7 = vld [vmem:[%s2074_s24 + $0x114] sm:$0xf]  ;;  %v1316_v11 = vor.u32 %v1564_v2, %v1313_v3  ;;  %v1500_v17 = vor.u32 %v1610_v9, %v1497_v10  ;;  %v1369_v18 = vld [vmem:[%s2074_s24 + $0x98] sm:$0xf0]  ;;  %v1425_v20 = vld [vmem:[%s2074_s24 + $0x108] sm:$0xf0] }
  0xad   : > { %1027 = vmatpush.bf16.msrb.mxu0 %v1340_v26  ;;  %v1436_v13 = vor.u32 %v1594_v7, %v1433_v8  ;;  %v1578_v16 = vld [vmem:[%s2074_s24 + $0x94] sm:$0xf]  ;;  %v1608_v21 = vld [vmem:[%s2074_s24 + $0x184] sm:$0xf]  ;;  %v1489_v22 = vld [vmem:[%s2074_s24 + $0x188] sm:$0xf0] }
  0xae   : > { %1045 = vmatpush.bf16.msrb.mxu1 %v1404_v28  ;;  %v1372_v24 = vor.u32 %v1578_v16, %v1369_v18  ;;  %v1560_v26 = vld [vmem:[%s2074_s24 + $0x4] sm:$0xf]  ;;  %v1297_v27 = vld [vmem:[%s2074_s24 + $0x8] sm:$0xf0]  ;;  %v1492_v28 = vor.u32 %v1608_v21, %v1489_v22  ;;  %v523_v39 = vld [vmem:[#allocation2 + $0x28] sm:$0xff]  ;;  %p1549_p4 = scmp.ne.s32.totalorder %s1787_s15, 7 }
  0xaf   : > { %1063 = vmatpush.bf16.msrb.mxu2 %v1468_v15  ;;  %v1305_v15 = vld [vmem:[%s2074_s24 + $0x18] sm:$0xf0]  ;;  %v1361_v30 = vld [vmem:[%s2074_s24 + $0x88] sm:$0xf0]  ;;  %v1300_v31 = vor.u32 %v1560_v26, %v1297_v27  ;;  %v524_v6 = vld [vmem:[#allocation2 + $0x10] sm:$0xff] }
  0xb0   : > { %1081 = vmatpush.bf16.msrb.mxu3 %v1532_v19  ;;  %v1592_v19 = vld [vmem:[%s2074_s24 + $0x104] sm:$0xf]  ;;  %v1308_v23 = vor.u32 %v1562_v14, %v1305_v15  ;;  %v526_v15 = vld [vmem:[#allocation2] sm:$0xff] }
  0xb1   : > { %1028 = vmatpush.bf16.msrb.mxu0 %v1332_v42  ;;  %v1428_v25 = vor.u32 %v1592_v19, %v1425_v20 }
  0xb2   : > { %1046 = vmatpush.bf16.msrb.mxu1 %v1396_v44 }
  0xb3   : > { %1064 = vmatpush.bf16.msrb.mxu2 %v1460_v29  ;;  %v1576_v29 = vld [vmem:[%s2074_s24 + $0x84] sm:$0xf] }
  0xb4   : > { %1082 = vmatpush.bf16.msrb.mxu3 %v1524_v33  ;;  %966 = vmatmul.bf16.gmra.mxu0 %v2204_v49  ;;  %v1364_v32 = vor.u32 %v1576_v29, %v1361_v30 }
  0xb5   : > { %984 = vmatmul.bf16.gmra.mxu1 %v2209_v54  ;;  %1029 = vmatpush.bf16.msrb.mxu0 %v1324_v62 }
  0xb6   : > { %1002 = vmatmul.bf16.gmra.mxu2 %v2211_v56  ;;  %1047 = vmatpush.bf16.msrb.mxu1 %v1388_v63 }
  0xb7   : > { %1065 = vmatpush.bf16.msrb.mxu2 %v1452_v45  ;;  %1020 = vmatmul.bf16.gmra.mxu3 %v624_v59  ;;  %v525_v45 = vld [vmem:[#allocation2 + $0x8] sm:$0xff] }
  0xb8   : > { %1083 = vmatpush.bf16.msrb.mxu3 %v1516_v50 }
  0xb9   : > { %1030 = vmatpush.bf16.msrb.mxu0 %v1316_v11 }
  0xba   : > { %1048 = vmatpush.bf16.msrb.mxu1 %v1380_v12 }
  0xbb   : > { %1066 = vmatpush.bf16.msrb.mxu2 %v1444_v1 }
  0xbc   : > { %1084 = vmatpush.bf16.msrb.mxu3 %v1508_v5 }
  0xbd   : > { %1031 = vmatpush.bf16.msrb.mxu0 %v1308_v23 }
  0xbe   : > { %1049 = vmatpush.bf16.msrb.mxu1 %v1372_v24  ;;  %v528_v24 = vld [vmem:[#allocation2 + $0x20] sm:$0x3] }
  0xbf   : > { %1067 = vmatpush.bf16.msrb.mxu2 %v1436_v13 }
  0xc0   : > { %1085 = vmatpush.bf16.msrb.mxu3 %v1500_v17 }
  0xc1   : > { %1032 = vmatpush.bf16.msrb.mxu0 %v1300_v31 }
  0xc2   : > { %1050 = vmatpush.bf16.msrb.mxu1 %v1364_v32 }
  0xc3   : > { %1068 = vmatpush.bf16.msrb.mxu2 %v1428_v25 }
  0xc4   : > { %1086 = vmatpush.bf16.msrb.mxu3 %v1492_v28  ;;  %1033 = vmatmul.bf16.vlgmr.msrb.gmra.mxu0 %v2158_v55 }
  0xc5   : > { %1051 = vmatmul.bf16.vlgmr.msrb.gmra.mxu1 %v2163_v60 }
  0xc6   : > { %1069 = vmatmul.bf16.vlgmr.msrb.gmra.mxu2 %v2165_v61 }
  0xc7   : > { %1087 = vmatmul.bf16.vlgmr.msrb.gmra.mxu3 %v2169_v0 }
  0xd4   : > { %1038 = vmatmul.bf16.gmra.mxu0 %v2204_v49 }
  0xd5   : > { %1056 = vmatmul.bf16.gmra.mxu1 %v2209_v54  ;;  %v527_v54 = vld [vmem:[#allocation2 + $0x18] sm:$0x3] }
  0xd6   : > { %1074 = vmatmul.bf16.gmra.mxu2 %v2211_v56 }
  0xd7   : > { %1092 = vmatmul.bf16.gmra.mxu3 %v624_v59 }
 0x121   : > { %v962_v33 = vpop.f32.mrf.mxu0 }
 0x122   : > { %v980_v34 = vpop.f32.mrf.mxu1 }
 0x123   : > { %v981_v35 = vadd.f32 %v980_v34, %v962_v33 }
 0x129   : > { %v998_v36 = vpop.f32.mrf.mxu2  ;;  %v964_v55 = vpop.f32.mrf.mxu0 }
 0x12a   : > { %v999_v37 = vadd.f32 %v998_v36, %v981_v35  ;;  %v1016_v38 = vpop.f32.mrf.mxu3  ;;  %v982_v61 = vpop.f32.mrf.mxu1 }
 0x12b   : > { %v983_v0 = vadd.f32 %v982_v61, %v964_v55 }
 0x12c   : > { %v1017_v40 = vadd.f32 %v1016_v38, %v999_v37 }
 0x12e   : > { %v1097_v60 = vadd.f32 %v1017_v40, %v523_v39 }
 0x130   : > { %1103 = vst [vmem:[#allocation2 + $0x28] sm:$0xff] %v1097_v60 }
 0x131   : > { %v1000_v41 = vpop.f32.mrf.mxu2  ;;  %v967_v44 = vpop.f32.mrf.mxu0 }
 0x132   : > { %v1001_v42 = vadd.f32 %v1000_v41, %v983_v0  ;;  %v1018_v43 = vpop.f32.mrf.mxu3  ;;  %v985_v46 = vpop.f32.mrf.mxu1 }
 0x133   : > { %v986_v49 = vadd.f32 %v985_v46, %v967_v44 }
 0x134   : > { %v1019_v47 = vadd.f32 %v1018_v43, %v1001_v42 }
 0x136   : > { %v1099_v48 = vadd.f32 %v1019_v47, %v525_v45 }
 0x138   : > { %1105 = vst [vmem:[#allocation2 + $0x8] sm:$0xff] %v1099_v48 }
 0x139   : > { %v1003_v50 = vpop.f32.mrf.mxu2  ;;  %v969_v53 = vpop.f32.mrf.mxu0 }
 0x13a   : > { %v1004_v51 = vadd.f32 %v1003_v50, %v986_v49  ;;  %v1021_v52 = vpop.f32.mrf.mxu3  ;;  %v987_v56 = vpop.f32.mrf.mxu1 }
 0x13c   : > { %v1022_v57 = vadd.f32 %v1021_v52, %v1004_v51 }
 0x13e   : > { %v1101_v58 = vadd.f32 %v1022_v57, %v527_v54 }
 0x140   : > { %1107 = vst [vmem:[#allocation2 + $0x18] sm:$0x3] %v1101_v58 }
 0x141   : > { %v1005_v59 = vpop.f32.mrf.mxu2  ;;  %v1034_v63 = vpop.f32.mrf.mxu0 }
 0x142   : > { %v1023_v62 = vpop.f32.mrf.mxu3  ;;  %v1052_v1 = vpop.f32.mrf.mxu1 }
 0x143   : > { %v1053_v2 = vadd.f32 %v1052_v1, %v1034_v63 }
 0x149   : > { %v1070_v3 = vpop.f32.mrf.mxu2  ;;  %v1036_v7 = vpop.f32.mrf.mxu0 }
 0x14a   : > { %v1071_v4 = vadd.f32 %v1070_v3, %v1053_v2  ;;  %v1088_v5 = vpop.f32.mrf.mxu3  ;;  %v1054_v9 = vpop.f32.mrf.mxu1 }
 0x14b   : > { %v1055_v11 = vadd.f32 %v1054_v9, %v1036_v7 }
 0x14c   : > { %v1089_v8 = vadd.f32 %v1088_v5, %v1071_v4 }
 0x14e   : > { %v1098_v10 = vadd.f32 %v1089_v8, %v524_v6 }
 0x150   : > { %1104 = vst [vmem:[#allocation2 + $0x10] sm:$0xff] %v1098_v10 }
 0x151   : > { %v1072_v12 = vpop.f32.mrf.mxu2  ;;  %v1039_v16 = vpop.f32.mrf.mxu0 }
 0x152   : > { %v1073_v13 = vadd.f32 %v1072_v12, %v1055_v11  ;;  %v1090_v14 = vpop.f32.mrf.mxu3  ;;  %v1057_v18 = vpop.f32.mrf.mxu1 }
 0x153   : > { %v1058_v20 = vadd.f32 %v1057_v18, %v1039_v16 }
 0x154   : > { %v1091_v17 = vadd.f32 %v1090_v14, %v1073_v13 }
 0x156   : > { %v1100_v19 = vadd.f32 %v1091_v17, %v526_v15 }
 0x158   : > { %1106 = vst [vmem:[#allocation2] sm:$0xff] %v1100_v19 }
 0x159   : > { %v1075_v21 = vpop.f32.mrf.mxu2  ;;  %v1041_v25 = vpop.f32.mrf.mxu0 }
 0x15a   : > { %v1076_v22 = vadd.f32 %v1075_v21, %v1058_v20  ;;  %v1093_v23 = vpop.f32.mrf.mxu3  ;;  %v1059_v27 = vpop.f32.mrf.mxu1 }
 0x15c   : > { %v1094_v26 = vadd.f32 %v1093_v23, %v1076_v22 }
 0x15e   : > { %v1102_v28 = vadd.f32 %v1094_v26, %v528_v24  ;;  %1112 = sbr.rel (%p1549_p4) target bundleno = 362 (0x16a), region = 97 }
 0x160   : > { %1108 = vst [vmem:[#allocation2 + $0x20] sm:$0x3] %v1102_v28 }
 0x161   : > { %v1077_v29 = vpop.f32.mrf.mxu2 }
 0x162   : > { %v1095_v30 = vpop.f32.mrf.mxu3 }
 0x163   : > { %v1113_v31 = vld [vmem:[#allocation2 + $0x28] sm:$0xff]  ;;  %v1114_v32 = vld [vmem:[#allocation2 + $0x10] sm:$0xff]  ;;  %v1116_v34 = vld [vmem:[#allocation2] sm:$0xff] }
 0x164   : > { %v1115_v33 = vld [vmem:[#allocation2 + $0x8] sm:$0xff]  ;;  %1119 = vst [vmem:[%s2076_s26] sm:$0xff] %v1113_v31  ;;  %v1117_v35 = vld [vmem:[#allocation2 + $0x18] sm:$0x3] }
 0x165   : > { %1120 = vst [vmem:[%s2076_s26 + $0x8] sm:$0xff] %v1114_v32 }
 0x166   : > { %1121 = vst [vmem:[%s2076_s26 + $0x10] sm:$0xff] %v1115_v33 }
 0x167   : > { %v1118_v36 = vld [vmem:[#allocation2 + $0x20] sm:$0x3]  ;;  %1122 = vst [vmem:[%s2076_s26 + $0x18] sm:$0xff] %v1116_v34 }
 0x168   : > { %1123 = vst [vmem:[%s2076_s26 + $0x20] sm:$0x3] %v1117_v35 }
 0x169   : > { %1124 = vst [vmem:[%s2076_s26 + $0x28] sm:$0x3] %v1118_v36 }
 0x16a PF: > { %1131 = sbr.rel (!%p1915_p12) target bundleno = 370 (0x172), region = 101  ;;  %s1624_s9 = sshll.u32 (%p1915_p12), %s1791_s16, 4 }
 0x16b   : > { %v1150_v37 = vld [vmem:[%s2076_s26] sm:$0xff] (%p1915_p12)  ;;  %s1137_s15 = scalar_lea.vmem (%p1915_p12), %s2299_s2, %s1624_s9 }
 0x16c   : > { %v1152_v38 = vld [vmem:[%s2076_s26 + $0x8] sm:$0xff] (%p1915_p12)  ;;  %1151 = vst [vmem:[%s1137_s15] sm:$0xff] (%p1915_p12), %v1150_v37 }
 0x16d   : > { %v1154_v55 = vld [vmem:[%s2076_s26 + $0x10] sm:$0xff] (%p1915_p12)  ;;  %1153 = vst [vmem:[%s1137_s15 + $0x8] sm:$0xff] (%p1915_p12), %v1152_v38 }
 0x16e   : > { %v1156_v39 = vld [vmem:[%s2076_s26 + $0x18] sm:$0xff] (%p1915_p12)  ;;  %1155 = vst [vmem:[%s1137_s15 + $0x20] sm:$0xff] (%p1915_p12), %v1154_v55 }
 0x16f   : > { %v1158_v61 = vld [vmem:[%s2076_s26 + $0x20] sm:$0xff]  ;;  %1157 = vst [vmem:[%s1137_s15 + $0x28] sm:$0xff] %v1156_v39 }
 0x170   : > { %v1160_v40 = vld [vmem:[%s2076_s26 + $0x28] sm:$0xff]  ;;  %1159 = vst [vmem:[%s1137_s15 + $0x40] sm:$0xff] %v1158_v61 }
 0x171   : > { %1161 = vst [vmem:[%s1137_s15 + $0x48] sm:$0xff] %v1160_v40 }
 0x172 PF: > { %s12_s19 = sadd.s32 1, %s1803_s19   ;;  %s2303_s9 = smov %s1767_s10 }
 0x173   : > { %p9_p5 = scmp.ge.s32.totalorder %s12_s19, 18   ;;  %s2304_s10 = smov %s1913_s5 }
 0x174   : > { %s2305_s11 = smov %s1775_s12  ;;  %s2306_s12 = smov %s1910_s4 }
 0x175   : > { %s2307_s13 = smov %s1783_s14  ;;  %s2308_s14 = smov %s1896_s27 }
 0x176   : > { %s2309_s15 = smov %s1795_s17  ;;  %s2310_s16 = smov %s1799_s18 }
 0x177   : > { %s2311_s17 = smov %s2314_s21  ;;  %s2312_s18 = smov %s2318_s22 }
 0x178   :  { %11 = sbr.rel (!%p9_p5) target bundleno = 6 (0x6), region = 163 }

// kernel: discriminator_forward.15
= control target key start
LH: loop header
LB: loop body
LE: loop exit
PB: predicated region body
PF: predicated region fallthrough
CT: control target
= control target key end

     0   :  { %s959_s14 = smov 0   ;;  %s961_s15 = smov 0   ;;  %s1039_s0 = inlined_call_operand.vmem [shape: bf16[8,8192], index: 0, kind: input, shape index: {}]   ;;  %s1040_s1 = inlined_call_operand.vmem [shape: bf16[8192,1], index: 1, kind: input, shape index: {}]   ;;  %s1041_s2 = inlined_call_operand.<no memory space> [shape: f32[1,1], index: 2, kind: input, shape index: {}]   ;;  %s1042_s3 = inlined_call_operand.vmem [shape: f32[8,1], index: 3, kind: output, shape index: {}]  }
   0x1   :  { %v8_v0 = vstv %s1041_s2  ;;  %s963_s16 = smov 0  }
   0x2   :  { %9 = vst [vmem:[#allocation3] sm:$0x1] %v8_v0 }
   0x3 LB: > { %s27_s2 = sadd.s32 1, %s929_s15  ;;  %p715_p0 = scmp.ge.s32.totalorder %s933_s16, 1  ;;  %s933_s16 = sphi %s963_s16, %s15_s16   ;;  %s929_s15 = sphi %s961_s15, %s1044_s15   ;;  %s925_s14 = sphi %s959_s14, %s1043_s14  }
   0x4   : > { %p28_p1 = scmp.ge.s32.totalorder %s27_s2, 16  ;;  %p191_p2 = scmp.lt.s32.totalorder %s933_s16, 17 }
   0x6   : > { %s1046_s2 = smov (%p28_p1, %s27_s2), 0  ;;  %p192_p3 = pnand %p715_p0, %p191_p2 }
   0x7   : > { %s716_s17 = sshll.u32 (!%p192_p3), %s925_s14, 2  ;;  %s718_s18 = sshll.u32 (!%p192_p3), %s925_s14, 6 }
   0x8   : > { %195 = sbr.rel (%p192_p3) target bundleno = 206 (0xce), region = 32  ;;  %p235_p4 = scmp.lt.s32.totalorder (!%p192_p3), %s716_s17, 63 }
   0x9   : > { %p243_p5 = scmp.lt.s32.totalorder (!%p192_p3), %s718_s18, 1023  ;;  %p720_p6 = scmp.ne.s32.totalorder (!%p192_p3), %s925_s14, 0 }
   0xd   : > { %s1048_s17 = smov (!%p235_p4, %s716_s17), 63  ;;  %s1050_s18 = smov (!%p243_p5, %s718_s18), 1023 }
   0xe   : > { %s717_s19 = sshll.u32 %s1048_s17, 2  ;;  %s719_s23 = sshll.u32 %s1050_s18, 2 }
   0xf   : > { %s984_s22 = scalar_lea.vmem %s1039_s0, %s717_s19  ;;  %s989_s26 = scalar_lea.vmem %s1040_s1, %s719_s23 }
  0x10   : > { %264 = sbr.rel (%p720_p6) target bundleno = 23 (0x17), region = 36 }
  0x15   : > { %vm265_vm0 = vcmask 7168   ;;  %v935_v1 = vmov 0.0  }
  0x16   : > { %266 = vst.msk [vmem:[#allocation2] sm:$0xff] %vm265_vm0, %v935_v1 }
  0x17 PF: > { %v860_v2 = vld [vmem:[%s989_s26 + $0x38] sm:$0xff]  ;;  %v859_v6 = vld [vmem:[%s989_s26 + $0x30] sm:$0xff]  ;;  %v858_v10 = vld [vmem:[%s989_s26 + $0x28] sm:$0xff]  ;;  %vm593_vm1 = vcmask 7168   ;;  %p849_p7 = scmp.ne.s32.totalorder %s925_s14, 15 }
  0x18   : > { %v868_v3 = vld [vmem:[%s989_s26 + $0x78] sm:$0xff]  ;;  %540 = vmatpush.bf16.msra.mxu0 %v860_v2  ;;  %v867_v7 = vld [vmem:[%s989_s26 + $0x70] sm:$0xff]  ;;  %v866_v11 = vld [vmem:[%s989_s26 + $0x68] sm:$0xff] }
  0x19   : > { %v876_v4 = vld [vmem:[%s989_s26 + $0xb8] sm:$0xff]  ;;  %553 = vmatpush.bf16.msra.mxu1 %v868_v3  ;;  %v875_v8 = vld [vmem:[%s989_s26 + $0xb0] sm:$0xff]  ;;  %v874_v12 = vld [vmem:[%s989_s26 + $0xa8] sm:$0xff] }
  0x1a   : > { %v884_v5 = vld [vmem:[%s989_s26 + $0xf8] sm:$0xff]  ;;  %566 = vmatpush.bf16.msra.mxu2 %v876_v4  ;;  %v883_v9 = vld [vmem:[%s989_s26 + $0xf0] sm:$0xff]  ;;  %v882_v13 = vld [vmem:[%s989_s26 + $0xe8] sm:$0xff] }
  0x1b   : > { %579 = vmatpush.bf16.msra.mxu3 %v884_v5  ;;  %v857_v14 = vld [vmem:[%s989_s26 + $0x20] sm:$0xff]  ;;  %v856_v18 = vld [vmem:[%s989_s26 + $0x18] sm:$0xff]  ;;  %v855_v22 = vld [vmem:[%s989_s26 + $0x10] sm:$0xff] }
  0x1c   : > { %541 = vmatpush.bf16.msra.mxu0 %v859_v6  ;;  %v865_v15 = vld [vmem:[%s989_s26 + $0x60] sm:$0xff]  ;;  %v864_v19 = vld [vmem:[%s989_s26 + $0x58] sm:$0xff]  ;;  %v863_v23 = vld [vmem:[%s989_s26 + $0x50] sm:$0xff] }
  0x1d   : > { %554 = vmatpush.bf16.msra.mxu1 %v867_v7  ;;  %v873_v16 = vld [vmem:[%s989_s26 + $0xa0] sm:$0xff]  ;;  %v872_v20 = vld [vmem:[%s989_s26 + $0x98] sm:$0xff]  ;;  %v871_v24 = vld [vmem:[%s989_s26 + $0x90] sm:$0xff] }
  0x1e   : > { %567 = vmatpush.bf16.msra.mxu2 %v875_v8  ;;  %v881_v17 = vld [vmem:[%s989_s26 + $0xe0] sm:$0xff]  ;;  %v880_v21 = vld [vmem:[%s989_s26 + $0xd8] sm:$0xff]  ;;  %v879_v25 = vld [vmem:[%s989_s26 + $0xd0] sm:$0xff] }
  0x1f   : > { %580 = vmatpush.bf16.msra.mxu3 %v883_v9  ;;  %v854_v26 = vld [vmem:[%s989_s26 + $0x8] sm:$0xff]  ;;  %v268_v28 = vld [vmem:[%s984_s22] sm:$0xff] }
  0x20   : > { %542 = vmatpush.bf16.msra.mxu0 %v858_v10  ;;  %v862_v27 = vld [vmem:[%s989_s26 + $0x48] sm:$0xff]  ;;  %v336_v32 = vunpack.c.l.b16 %v268_v28  ;;  %v337_v33 = vunpack.c.h.b16 %v268_v28  ;;  %v853_v34 = vld [vmem:[%s989_s26] sm:$0xff] }
  0x21   : > { %555 = vmatpush.bf16.msra.mxu1 %v866_v11  ;;  %v870_v29 = vld [vmem:[%s989_s26 + $0x88] sm:$0xff]  ;;  %v861_v35 = vld [vmem:[%s989_s26 + $0x40] sm:$0xff] }
  0x22   : > { %568 = vmatpush.bf16.msra.mxu2 %v874_v12  ;;  %v878_v30 = vld [vmem:[%s989_s26 + $0xc8] sm:$0xff]  ;;  %v869_v38 = vld [vmem:[%s989_s26 + $0x80] sm:$0xff]  ;;  %v340_v40 = vpack.c.b16 %v336_v32, %v336_v32  ;;  %v341_v41 = vpack.c.b16 %v337_v33, %v337_v33 }
  0x23   : > { %581 = vmatpush.bf16.msra.mxu3 %v882_v13  ;;  %v269_v31 = vld [vmem:[%s984_s22 + $0x8] sm:$0xff]  ;;  %v877_v39 = vld [vmem:[%s989_s26 + $0xc0] sm:$0xff] }
  0x24   : > { %543 = vmatpush.bf16.msra.mxu0 %v857_v14  ;;  %v338_v36 = vunpack.c.l.b16 %v269_v31  ;;  %v339_v37 = vunpack.c.h.b16 %v269_v31  ;;  %v267_v52 = vld [vmem:[#allocation2] sm:$0xff] }
  0x25   : > { %556 = vmatpush.bf16.msra.mxu1 %v865_v15 }
  0x26   : > { %569 = vmatpush.bf16.msra.mxu2 %v873_v16  ;;  %v342_v42 = vpack.c.b16 %v338_v36, %v338_v36  ;;  %v343_v43 = vpack.c.b16 %v339_v37, %v339_v37 }
  0x27   : > { %582 = vmatpush.bf16.msra.mxu3 %v881_v17 }
  0x28   : > { %544 = vmatpush.bf16.msra.mxu0 %v856_v18 }
  0x29   : > { %557 = vmatpush.bf16.msra.mxu1 %v864_v19 }
  0x2a   : > { %570 = vmatpush.bf16.msra.mxu2 %v872_v20 }
  0x2b   : > { %583 = vmatpush.bf16.msra.mxu3 %v880_v21 }
  0x2c   : > { %545 = vmatpush.bf16.msra.mxu0 %v855_v22 }
  0x2d   : > { %558 = vmatpush.bf16.msra.mxu1 %v863_v23 }
  0x2e   : > { %571 = vmatpush.bf16.msra.mxu2 %v871_v24 }
  0x2f   : > { %584 = vmatpush.bf16.msra.mxu3 %v879_v25 }
  0x30   : > { %546 = vmatpush.bf16.msra.mxu0 %v854_v26 }
  0x31   : > { %559 = vmatpush.bf16.msra.mxu1 %v862_v27 }
  0x32   : > { %572 = vmatpush.bf16.msra.mxu2 %v870_v29 }
  0x33   : > { %585 = vmatpush.bf16.msra.mxu3 %v878_v30 }
  0x34   : > { %547 = vmatpush.bf16.msra.mxu0 %v853_v34 }
  0x35   : > { %560 = vmatpush.bf16.msra.mxu1 %v861_v35 }
  0x36   : > { %573 = vmatpush.bf16.msra.mxu2 %v869_v38 }
  0x37   : > { %586 = vmatpush.bf16.msra.mxu3 %v877_v39  ;;  %548 = vmatmul.bf16.vlgmr.msra.gmra.mxu0 %v340_v40 }
  0x38   : > { %561 = vmatmul.bf16.vlgmr.msra.gmra.mxu1 %v341_v41 }
  0x39   : > { %574 = vmatmul.bf16.vlgmr.msra.gmra.mxu2 %v342_v42 }
  0x3a   : > { %587 = vmatmul.bf16.vlgmr.msra.gmra.mxu3 %v343_v43 }
  0xb4   : > { %v549_v44 = vpop.f32.mrf.mxu0 }
  0xb5   : > { %v562_v45 = vpop.f32.mrf.mxu1 }
  0xb6   : > { %v563_v46 = vadd.f32 %v562_v45, %v549_v44 }
  0xbc   : > { %v575_v47 = vpop.f32.mrf.mxu2  ;;  %v551_v50 = vpop.f32.mrf.mxu0 }
  0xbd   : > { %v588_v48 = vpop.f32.mrf.mxu3  ;;  %v576_v49 = vadd.f32 %v575_v47, %v563_v46  ;;  %v564_v51 = vpop.f32.mrf.mxu1 }
  0xbf   : > { %v589_v53 = vadd.f32 %v588_v48, %v576_v49 }
  0xc1   : > { %v592_v54 = vadd.f32 %v589_v53, %v267_v52  ;;  %598 = sbr.rel (%p849_p7) target bundleno = 206 (0xce), region = 40 }
  0xc3   : > { %594 = vst.msk [vmem:[#allocation2] sm:$0xff] %vm593_vm1, %v592_v54 }
  0xc4   : > { %v577_v55 = vpop.f32.mrf.mxu2 }
  0xc5   : > { %v590_v56 = vpop.f32.mrf.mxu3 }
  0xc6   : > { %v910_v58 = vld [vmem:[#allocation3] ss:$0 sm:$0xff] }
  0xca   : > { %v599_v57 = vld [vmem:[#allocation2] sm:$0xff] }
  0xcb   : > { %v604_v59 = vadd.f32 %v910_v58, %v599_v57 }
  0xcd   : > { %605 = vst.msk [vmem:[%s1042_s3] sm:$0xff] %vm593_vm1, %v604_v59 }
  0xce PF: > { %s15_s16 = sadd.s32 1, %s933_s16   ;;  %s1043_s14 = smov %s929_s15 }
  0xcf   : > { %p12_p8 = scmp.ge.s32.totalorder %s15_s16, 18   ;;  %s1044_s15 = smov %s1046_s2 }
  0xd1   :  { %14 = sbr.rel (!%p12_p8) target bundleno = 3 (0x3), region = 76 }

</bundles_post_ra>
